<compile_context>
chip_gen: v7x
topology: tpu7x:2x2x1
jax: 0.10.0
libtpu: 0.0.40
codegen_flags: <defaults>
</compile_context>

<pallas_src>
import jax
import jax.numpy as jnp
from jax.experimental import pallas as pl
from jax.experimental.pallas import tpu as pltpu


def _make_mlp_kernel(num_hidden: int, negative_slope: float = 0.2):
    """Fused MLP: (Linear + LeakyReLU) * num_hidden + Linear(512, 1)."""

    def kernel(x_ref, *refs):
        # refs = [W1t, b1, ..., Wkt, bk, w_head_row, b_head, out]
        o_ref = refs[-1]
        h = x_ref[...]                                   # [tb, D], native f32
        for li in range(num_hidden):
            wt = refs[2 * li][...]                       # [D, D] bf16 (W^T)
            b = refs[2 * li + 1][...]                    # [1, D] f32
            # MXU matmul: bf16 operands, f32 accumulation (cast only at the dot).
            h = jnp.dot(h.astype(wt.dtype), wt,
                        preferred_element_type=jnp.float32) + b
            # LeakyReLU(0.2) in f32 on the VPU.
            h = jnp.where(h >= 0.0, h, negative_slope * h)
        # Final Linear(512, 1): VPU multiply + XLU lane reduce (avoids an
        # almost-empty 1-column MXU pass).
        w_row = refs[2 * num_hidden][...]                # [1, D] f32
        b_head = refs[2 * num_hidden + 1][...]           # [1, 1] f32
        y = jnp.sum(h.astype(jnp.float32) * w_row, axis=-1, keepdims=True) + b_head
        # Lane-dense store: [tb, 1] -> [1, tb] so the writeback is full-lane vst
        # instead of 1-lane masked stores + strided DMA.
        o_ref[...] = y.reshape(1, -1).astype(o_ref.dtype)

    return kernel


def init_params(key, style_dim: int, n_mlp: int):
    """PyTorch-layout params [(W[out,in], b[out]), ...] with nn.Linear-like init."""
    layers = []
    dims = [(style_dim, style_dim)] * (n_mlp - 1) + [(512, 1)]  # (in, out)
    for fan_in, fan_out in dims:
        key, k_w, k_b = jax.random.split(key, 3)
        bound = 1.0 / jnp.sqrt(jnp.float32(fan_in))
        w = jax.random.uniform(k_w, (fan_out, fan_in), jnp.float32, -bound, bound)
        b = jax.random.uniform(k_b, (fan_out,), jnp.float32, -bound, bound)
        layers.append((w, b))
    return layers


def prepare_params(layers):
    """Convert PyTorch-layout params to the kernel's flat layout.

    Hidden layers: Wt bf16 [in, out], b f32 [1, out].
    Final layer:   weight as f32 row [1, 512], bias as f32 [1, 1].
    """
    flat = []
    for w, b in layers[:-1]:
        flat.append(jnp.asarray(w, jnp.float32).T.astype(jnp.bfloat16))
        flat.append(jnp.asarray(b, jnp.float32).reshape(1, -1))
    w_f, b_f = layers[-1]
    flat.append(jnp.asarray(w_f, jnp.float32).reshape(1, -1))   # [1, 512]
    flat.append(jnp.asarray(b_f, jnp.float32).reshape(1, 1))    # [1, 1]
    return flat


def _choose_batch_tile(batch: int, cap: int) -> int:
    """Largest 256- (then 128-) aligned tile <= cap that divides `batch`.

    No forced halving: on single-TC chips (v5e/v6e) one big step beats two,
    and large batches still produce multiple "parallel" steps for v7x.
    """
    cap = min(cap, batch)
    for align in (256, 128):
        t = (cap // align) * align
        while t >= align:
            if batch % t == 0:
                return t
            t -= align
    return batch  # defensive; batch is always padded to a multiple of 128


def _vmem_limit_bytes(tb: int, d: int, params) -> int:
    """Right-sized scoped-VMEM request (stays at/below the 32 MiB default)."""
    in_bytes = 2 * tb * d * 4                                   # double-buffered f32 input
    w_bytes = 2 * sum(int(p.size) * p.dtype.itemsize for p in params)
    act_bytes = 4 * tb * d * 4                                  # f32 activations + temps
    out_bytes = 2 * tb * 4
    slack = 8 * 1024 * 1024                                     # compiler-internal scratch
    return min(32 * 1024 * 1024, in_bytes + w_bytes + act_bytes + out_bytes + slack)


def latent_codes_discriminator(w, params, *, max_batch_tile: int = 1024):
    """Fused MLP forward. w: [B, 512] -> [B, 1] f32. `params` from prepare_params()."""
    B, D = w.shape
    assert D == 512, "final layer is Linear(512, 1); style_dim must be 512"
    num_hidden = (len(params) - 2) // 2

    # Pad the batch up to a multiple of 128 (no-op for aligned batches) so every
    # block shape satisfies the (8, 128) tiling rules.
    Bp = -(-B // 128) * 128
    w_in = w if Bp == B else jnp.pad(w, ((0, Bp - B), (0, 0)))

    tb = _choose_batch_tile(Bp, max_batch_tile)
    grid = (Bp // tb,)
    kernel = _make_mlp_kernel(num_hidden)

    in_specs = [pl.BlockSpec((tb, D), lambda i: (i, 0))]
    for p in params:
        # Grid-invariant blocks (constant index map) are not re-DMA'd per step.
        in_specs.append(pl.BlockSpec(p.shape, lambda i: (0, 0)))

    out = pl.pallas_call(
        kernel,
        out_shape=jax.ShapeDtypeStruct((1, Bp), jnp.float32),
        grid_spec=pltpu.PrefetchScalarGridSpec(
            num_scalar_prefetch=0,
            grid=grid,
            in_specs=in_specs,
            out_specs=pl.BlockSpec((1, tb), lambda i: (0, i)),
        ),
        compiler_params=pltpu.CompilerParams(
            dimension_semantics=("parallel",),
            vmem_limit_bytes=_vmem_limit_bytes(tb, D, params),
        ),
    )(w_in, *params)

    out = out.reshape(Bp, 1)        # free metadata reshape of the lane-dense row
    return out if Bp == B else out[:B]


def _reference_f32(w, torch_layers):
    """Pure f32 reference matching the PyTorch module semantics exactly."""
    h = w
    for W, b in torch_layers[:-1]:
        h = h @ W.T + b
        h = jnp.where(h >= 0.0, h, 0.2 * h)
    W, b = torch_layers[-1]
    return h @ W.T + b


def _reference_kernel_numerics(w, params):
    """JAX mirror of the kernel's bf16-operand / f32-accumulate numerics."""
    num_hidden = (len(params) - 2) // 2
    h = w
    for li in range(num_hidden):
        wt = params[2 * li]
        b = params[2 * li + 1]
        h = jnp.dot(h.astype(wt.dtype), wt, preferred_element_type=jnp.float32) + b
        h = jnp.where(h >= 0.0, h, 0.2 * h)
    return jnp.sum(h * params[-2], axis=-1, keepdims=True) + params[-1]


if __name__ == "__main__":
    style_dim = 512      # required: the module's final layer is Linear(512, 1)
    n_mlp = 3            # 2 x (Linear(512,512) + LeakyReLU(0.2)) + Linear(512,1)
    batch = 256          # small example batch -> one 256-row grid step

    key = jax.random.PRNGKey(0)
    key, k_in = jax.random.split(key)
    w_in = jax.random.normal(k_in, (batch, style_dim), jnp.float32)

    torch_layers = init_params(key, style_dim, n_mlp)
    params = prepare_params(torch_layers)

    out = jax.block_until_ready(latent_codes_discriminator(w_in, params))
    assert out.shape == (batch, 1), out.shape

    # Self-consistency vs. a JAX mirror of the kernel's numerics (tight).
    ref_mirror = _reference_kernel_numerics(w_in, params)
    err_mirror = float(jnp.max(jnp.abs(out - ref_mirror)))
    assert jnp.allclose(out, ref_mirror, atol=1e-2, rtol=1e-2), f"mirror err {err_mirror}"

    # Fidelity vs. the pure-f32 PyTorch module (bf16 MXU operands => looser tol;
    # intentionally not bit-exact with torch f32).
    ref_f32 = _reference_f32(w_in, torch_layers)
    err_f32 = float(jnp.max(jnp.abs(out - ref_f32)))
    assert jnp.allclose(out, ref_f32, atol=5e-2, rtol=5e-2), f"f32 err {err_f32}"

    print("KERNEL_OK")
</pallas_src>

<mosaic_0001>
module attributes {stable_mosaic.version = 11 : i64} {
  func.func @kernel(%arg0: i32, %arg1: memref<256x512xf32, #tpu.memory_space<vmem>>, %arg2: memref<512x512xbf16, #tpu.memory_space<vmem>>, %arg3: memref<1x512xf32, #tpu.memory_space<vmem>>, %arg4: memref<512x512xbf16, #tpu.memory_space<vmem>>, %arg5: memref<1x512xf32, #tpu.memory_space<vmem>>, %arg6: memref<1x512xf32, #tpu.memory_space<vmem>>, %arg7: memref<1x1xf32, #tpu.memory_space<vmem>>, %arg8: memref<1x256xf32, #tpu.memory_space<vmem>>) attributes {dimension_semantics = [#tpu.dimension_semantics<parallel>], iteration_bounds = array<i64: 1>, scalar_prefetch = 0 : i64, scratch_operands = 0 : i64, tpu.core_type = #tpu.core_type<tc>, window_params = [{transform_indices = @transform_0, window_bounds = array<i64: 256, 512>}, {pipeline_mode = #tpu.pipeline_mode<synchronous>, transform_indices = @transform_1, window_bounds = array<i64: 512, 512>}, {pipeline_mode = #tpu.pipeline_mode<synchronous>, transform_indices = @transform_2, window_bounds = array<i64: 1, 512>}, {pipeline_mode = #tpu.pipeline_mode<synchronous>, transform_indices = @transform_3, window_bounds = array<i64: 512, 512>}, {pipeline_mode = #tpu.pipeline_mode<synchronous>, transform_indices = @transform_4, window_bounds = array<i64: 1, 512>}, {pipeline_mode = #tpu.pipeline_mode<synchronous>, transform_indices = @transform_5, window_bounds = array<i64: 1, 512>}, {pipeline_mode = #tpu.pipeline_mode<synchronous>, transform_indices = @transform_6, window_bounds = array<i64: 1, 1>}, {transform_indices = @transform_7, window_bounds = array<i64: 1, 256>}]} {
    %c0 = arith.constant 0 : index
    %c0_0 = arith.constant 0 : index
    %0 = vector.load %arg1[%c0, %c0_0] : memref<256x512xf32, #tpu.memory_space<vmem>>, vector<256x512xf32>
    %c0_1 = arith.constant 0 : index
    %c0_2 = arith.constant 0 : index
    %1 = vector.load %arg2[%c0_1, %c0_2] : memref<512x512xbf16, #tpu.memory_space<vmem>>, vector<512x512xbf16>
    %c0_3 = arith.constant 0 : index
    %c0_4 = arith.constant 0 : index
    %2 = vector.load %arg3[%c0_3, %c0_4] : memref<1x512xf32, #tpu.memory_space<vmem>>, vector<1x512xf32>
    %3 = arith.truncf %0 : vector<256x512xf32> to vector<256x512xbf16>
    %cst = arith.constant dense<0.000000e+00> : vector<256x512xf32>
    %4 = tpu.matmul %3, %1, %cst {dimension_numbers = #tpu.dot_dimension_numbers<[1], [0], [0], [1], [0, 0, 1, 1], [], []>} : vector<256x512xbf16>, vector<512x512xbf16>, vector<256x512xf32> -> vector<256x512xf32>
    %5 = vector.broadcast %2 : vector<1x512xf32> to vector<256x512xf32>
    %6 = arith.addf %4, %5 : vector<256x512xf32>
    %cst_5 = arith.constant 0.000000e+00 : f32
    %7 = vector.broadcast %cst_5 : f32 to vector<256x512xf32>
    %8 = arith.cmpf oge, %6, %7 : vector<256x512xf32>
    %cst_6 = arith.constant 2.000000e-01 : f32
    %9 = vector.broadcast %cst_6 : f32 to vector<256x512xf32>
    %10 = arith.mulf %9, %6 : vector<256x512xf32>
    %11 = arith.select %8, %6, %10 : vector<256x512xi1>, vector<256x512xf32>
    %c0_7 = arith.constant 0 : index
    %c0_8 = arith.constant 0 : index
    %12 = vector.load %arg4[%c0_7, %c0_8] : memref<512x512xbf16, #tpu.memory_space<vmem>>, vector<512x512xbf16>
    %c0_9 = arith.constant 0 : index
    %c0_10 = arith.constant 0 : index
    %13 = vector.load %arg5[%c0_9, %c0_10] : memref<1x512xf32, #tpu.memory_space<vmem>>, vector<1x512xf32>
    %14 = arith.truncf %11 : vector<256x512xf32> to vector<256x512xbf16>
    %cst_11 = arith.constant dense<0.000000e+00> : vector<256x512xf32>
    %15 = tpu.matmul %14, %12, %cst_11 {dimension_numbers = #tpu.dot_dimension_numbers<[1], [0], [0], [1], [0, 0, 1, 1], [], []>} : vector<256x512xbf16>, vector<512x512xbf16>, vector<256x512xf32> -> vector<256x512xf32>
    %16 = vector.broadcast %13 : vector<1x512xf32> to vector<256x512xf32>
    %17 = arith.addf %15, %16 : vector<256x512xf32>
    %cst_12 = arith.constant 0.000000e+00 : f32
    %18 = vector.broadcast %cst_12 : f32 to vector<256x512xf32>
    %19 = arith.cmpf oge, %17, %18 : vector<256x512xf32>
    %cst_13 = arith.constant 2.000000e-01 : f32
    %20 = vector.broadcast %cst_13 : f32 to vector<256x512xf32>
    %21 = arith.mulf %20, %17 : vector<256x512xf32>
    %22 = arith.select %19, %17, %21 : vector<256x512xi1>, vector<256x512xf32>
    %c0_14 = arith.constant 0 : index
    %c0_15 = arith.constant 0 : index
    %23 = vector.load %arg6[%c0_14, %c0_15] : memref<1x512xf32, #tpu.memory_space<vmem>>, vector<1x512xf32>
    %c0_16 = arith.constant 0 : index
    %c0_17 = arith.constant 0 : index
    %24 = vector.load %arg7[%c0_16, %c0_17] : memref<1x1xf32, #tpu.memory_space<vmem>>, vector<1x1xf32>
    %25 = vector.broadcast %23 : vector<1x512xf32> to vector<256x512xf32>
    %26 = arith.mulf %22, %25 : vector<256x512xf32>
    %cst_18 = arith.constant dense<0.000000e+00> : vector<256xf32>
    %27 = vector.multi_reduction <add>, %26, %cst_18 [1] : vector<256x512xf32> to vector<256xf32>
    %28 = vector.shape_cast %27 : vector<256xf32> to vector<256x1xf32>
    %29 = vector.broadcast %24 : vector<1x1xf32> to vector<256x1xf32>
    %30 = arith.addf %28, %29 : vector<256x1xf32>
    %31 = vector.shape_cast %30 : vector<256x1xf32> to vector<1x256xf32>
    %c0_19 = arith.constant 0 : index
    %c0_20 = arith.constant 0 : index
    %32 = vector.load %arg8[%c0_19, %c0_20] : memref<1x256xf32, #tpu.memory_space<vmem>>, vector<1x256xf32>
    tpu.vector_store %arg8[%c0_19, %c0_20], %31 {strides = array<i32>} : memref<1x256xf32, #tpu.memory_space<vmem>>, vector<1x256xf32>,
    return
  }
  func.func @transform_0(%arg0: i32) -> (i32, i32) {
    %c0_i32 = arith.constant 0 : i32
    %c0_i32_0 = arith.constant 0 : i32
    return %arg0, %c0_i32 : i32, i32
  }
  func.func @transform_1(%arg0: i32) -> (i32, i32) {
    %c0_i32 = arith.constant 0 : i32
    %c0_i32_0 = arith.constant 0 : i32
    %c0_i32_1 = arith.constant 0 : i32
    return %c0_i32, %c0_i32_0 : i32, i32
  }
  func.func @transform_2(%arg0: i32) -> (i32, i32) {
    %c0_i32 = arith.constant 0 : i32
    %c0_i32_0 = arith.constant 0 : i32
    %c0_i32_1 = arith.constant 0 : i32
    return %c0_i32, %c0_i32_0 : i32, i32
  }
  func.func @transform_3(%arg0: i32) -> (i32, i32) {
    %c0_i32 = arith.constant 0 : i32
    %c0_i32_0 = arith.constant 0 : i32
    %c0_i32_1 = arith.constant 0 : i32
    return %c0_i32, %c0_i32_0 : i32, i32
  }
  func.func @transform_4(%arg0: i32) -> (i32, i32) {
    %c0_i32 = arith.constant 0 : i32
    %c0_i32_0 = arith.constant 0 : i32
    %c0_i32_1 = arith.constant 0 : i32
    return %c0_i32, %c0_i32_0 : i32, i32
  }
  func.func @transform_5(%arg0: i32) -> (i32, i32) {
    %c0_i32 = arith.constant 0 : i32
    %c0_i32_0 = arith.constant 0 : i32
    %c0_i32_1 = arith.constant 0 : i32
    return %c0_i32, %c0_i32_0 : i32, i32
  }
  func.func @transform_6(%arg0: i32) -> (i32, i32) {
    %c0_i32 = arith.constant 0 : i32
    %c0_i32_0 = arith.constant 0 : i32
    %c0_i32_1 = arith.constant 0 : i32
    return %c0_i32, %c0_i32_0 : i32, i32
  }
  func.func @transform_7(%arg0: i32) -> (i32, i32) {
    %c0_i32 = arith.constant 0 : i32
    %c0_i32_0 = arith.constant 0 : i32
    return %c0_i32, %arg0 : i32, i32
  }
}

</mosaic_0001>

<bundles_post_ra>
// kernel: tpu_custom_call.1
= control target key start
LH: loop header
LB: loop body
LE: loop exit
PB: predicated region body
PF: predicated region fallthrough
CT: control target
= control target key end

     0   :  { %s12564_s0 = inlined_call_operand.hbm [shape: f32[256,512], index: 0, kind: input, shape index: {}]   ;;  %s12565_s1 = inlined_call_operand.hbm [shape: bf16[512,512], index: 1, kind: input, shape index: {}]   ;;  %s12566_s2 = inlined_call_operand.vmem [shape: f32[1,512], index: 2, kind: input, shape index: {}]   ;;  %s12567_s3 = inlined_call_operand.hbm [shape: bf16[512,512], index: 3, kind: input, shape index: {}]   ;;  %s12568_s4 = inlined_call_operand.vmem [shape: f32[1,512], index: 4, kind: input, shape index: {}]   ;;  %s12569_s5 = inlined_call_operand.vmem [shape: f32[1,512], index: 5, kind: input, shape index: {}]   ;;  %s12570_s6 = inlined_call_operand.<no memory space> [shape: f32[1,1], index: 6, kind: input, shape index: {}]   ;;  %s12571_s7 = inlined_call_operand.hbm [shape: f32[1,256], index: 7, kind: output, shape index: {}]  }
   0x1   :  { %v12_v0 = vstv %s12570_s6 }
   0x2   :  { %13 = vst [vmem:[#allocation2] sm:$0x1] %v12_v0 }
   0x3   :  { %14 = vsyncpa [#allocation4], 0 }
   0x4   :  { %15 = vsyncpa [#allocation7], 0 }
   0x5   :  { %16 = vsyncpa [#allocation5], 0  ;;  %s9382_s26 = smov [#allocation6]   ;;  %s9288_s30 = scalar_lea.hbm %s12565_s1, 16384 }
   0x6   :  { %s34_s27 = sshll.u32 %s9382_s26, 4  ;;  %p9289_p0 = scmp.ne.s32.totalorder %s12565_s1, %s9288_s30  ;;  %s35_s27 = int_to_ptr.vmem [resolvable:$true] %s34_s27 }
   0x7   :  { %p9292_p1 = scmp.lt.u32.totalorder %s9288_s30, %s12565_s1 }
   0x9   :  { %p9294_p2 = pnand %p9292_p1, %p9289_p0 }
   0xb   :  { %9297 = shalt.err (!%p9294_p2)
}
   0xc   :  { %s9298_s6 = scalar_lea.vmem %s35_s27, 16384  ;;  %p9303_p4 = scmp.lt.s32.totalorder %s35_s27, %s35_s27 }
   0xd   :  { %p9299_p3 = scmp.ne.s32.totalorder %s35_s27, %s9298_s6  ;;  %p9304_p5 = scmp.lt.s32.totalorder %s9298_s6, %s9298_s6 }
   0xf   :  { %p9305_p6 = por %p9304_p5, %p9303_p4 }
  0x11   :  { %p9306_p7 = pnand %p9305_p6, %p9299_p3 }
  0x13   :  { %9309 = shalt.err (!%p9306_p7)
}
  0x14   :  { %s9383_s12 = smov 256   ;;  %s9384_s13 = smov 16  }
  0x15   :  { %40 = dma.hbm_to_vmem [thread:$0]  %s12565_s1, 16384, %s35_s27, [#allocation7], %s9383_s12, %s9383_s12, %s9384_s13  }
  0x16   :  { %s9385_s16 = smov [#allocation3]   ;;  %s9310_s20 = scalar_lea.hbm %s12564_s0, 16384 }
  0x17   :  { %s22_s17 = sshll.u32 %s9385_s16, 4  ;;  %p9311_p8 = scmp.ne.s32.totalorder %s12564_s0, %s9310_s20  ;;  %s23_s17 = int_to_ptr.vmem [resolvable:$true] %s22_s17 }
  0x18   :  { %p9314_p9 = scmp.lt.u32.totalorder %s9310_s20, %s12564_s0 }
  0x1a   :  { %p9316_p10 = pnand %p9314_p9, %p9311_p8 }
  0x1c   :  { %9319 = shalt.err (!%p9316_p10)
}
  0x1d   :  { %s9320_s25 = scalar_lea.vmem %s23_s17, 16384  ;;  %p9325_p12 = scmp.lt.s32.totalorder %s23_s17, %s23_s17 }
  0x1e   :  { %p9321_p11 = scmp.ne.s32.totalorder %s23_s17, %s9320_s25  ;;  %p9326_p13 = scmp.lt.s32.totalorder %s9320_s25, %s9320_s25 }
  0x20   :  { %p9327_p0 = por %p9326_p13, %p9325_p12 }
  0x22   :  { %p9328_p1 = pnand %p9327_p0, %p9321_p11 }
  0x24   :  { %9331 = shalt.err (!%p9328_p1)
}
  0x25   :  { %s9386_s1 = smov 512   ;;  %s9387_s26 = smov 32  }
  0x26   :  { %28 = dma.hbm_to_vmem [thread:$0]  %s12564_s0, 16384, %s23_s17, [#allocation4], %s9386_s1, %s9386_s1, %s9387_s26  }
  0x27   :  { %s9388_s29 = smov [#allocation8]   ;;  %s9332_s10 = scalar_lea.hbm %s12567_s3, 16384 }
  0x28   :  { %s48_s30 = sshll.u32 %s9388_s29, 4  ;;  %p9333_p2 = scmp.ne.s32.totalorder %s12567_s3, %s9332_s10  ;;  %s49_s30 = int_to_ptr.vmem [resolvable:$true] %s48_s30 }
  0x29   :  { %p9336_p3 = scmp.lt.u32.totalorder %s9332_s10, %s12567_s3 }
  0x2b   :  { %p9338_p4 = pnand %p9336_p3, %p9333_p2 }
  0x2d   :  { %9341 = shalt.err (!%p9338_p4)
}
  0x2e   :  { %s9342_s16 = scalar_lea.vmem %s49_s30, 16384  ;;  %p9347_p6 = scmp.lt.s32.totalorder %s49_s30, %s49_s30 }
  0x2f   :  { %p9343_p5 = scmp.ne.s32.totalorder %s49_s30, %s9342_s16  ;;  %p9348_p7 = scmp.lt.s32.totalorder %s9342_s16, %s9342_s16 }
  0x31   :  { %p9349_p8 = por %p9348_p7, %p9347_p6 }
  0x33   :  { %p9350_p9 = pnand %p9349_p8, %p9343_p5 }
  0x35   :  { %9353 = shalt.err (!%p9350_p9)
}
  0x36   :  { %54 = dma.hbm_to_vmem [thread:$0]  %s12567_s3, 16384, %s49_s30, [#allocation7], %s9383_s12, %s9383_s12, %s9384_s13  }
  0x37   :  { %9376 = dma.done.wait [#allocation4], 16384  }
  0x38   :  { %9377 = vsyncadd [#allocation4], 4294950912 }
  0x39   :  { %9378 = dma.done.wait [#allocation7], 32768  }
  0x3a   :  { %9379 = vsyncadd [#allocation7], 4294934528  ;;  %v8903_v1 = vld [vmem:[#allocation6 + $0x4] ss:$16 sps:$4 sm:$0xff]   ;;  %v8905_v2 = vld [vmem:[#allocation6 + $0xc] ss:$16 sps:$4 sm:$0xff]  }
  0x3b   :  { %1052 = vmatprep.subr.bf16.mxu0 %v8903_v1  ;;  %v8907_v3 = vld [vmem:[#allocation6] ss:$16 sps:$4 sm:$0xff]   ;;  %v8908_v4 = vld [vmem:[#allocation6 + $0x8] ss:$16 sps:$4 sm:$0xff]   ;;  %1438 = vmatprep.subr.bf16.mxu1 %v8905_v2  ;;  %v8909_v5 = vld [vmem:[#allocation6 + $0x24] ss:$16 sps:$4 sm:$0xff]  }
  0x3c   :  { %1053 = vmatpush1.bf16.msra.mxu0 %v8907_v3  ;;  %1439 = vmatpush1.bf16.msra.mxu1 %v8908_v4  ;;  %v8911_v6 = vld [vmem:[#allocation6 + $0x2c] ss:$16 sps:$4 sm:$0xff]   ;;  %v8913_v7 = vld [vmem:[#allocation6 + $0x20] ss:$16 sps:$4 sm:$0xff]   ;;  %v8914_v8 = vld [vmem:[#allocation6 + $0x28] ss:$16 sps:$4 sm:$0xff]  }
  0x3d   :  { %1054 = vmatprep.subr.bf16.mxu0 %v8909_v5  ;;  %1440 = vmatprep.subr.bf16.mxu1 %v8911_v6  ;;  %v8915_v9 = vld [vmem:[#allocation6 + $0x44] ss:$16 sps:$4 sm:$0xff]   ;;  %v8917_v10 = vld [vmem:[#allocation6 + $0x4c] ss:$16 sps:$4 sm:$0xff]   ;;  %v8919_v11 = vld [vmem:[#allocation6 + $0x40] ss:$16 sps:$4 sm:$0xff]  }
  0x3e   :  { %v8920_v12 = vld [vmem:[#allocation6 + $0x48] ss:$16 sps:$4 sm:$0xff]   ;;  %v8921_v13 = vld [vmem:[#allocation6 + $0x64] ss:$16 sps:$4 sm:$0xff]   ;;  %v8923_v14 = vld [vmem:[#allocation6 + $0x6c] ss:$16 sps:$4 sm:$0xff]  }
  0x3f   :  { %v8925_v15 = vld [vmem:[#allocation6 + $0x60] ss:$16 sps:$4 sm:$0xff]   ;;  %v8926_v16 = vld [vmem:[#allocation6 + $0x68] ss:$16 sps:$4 sm:$0xff]   ;;  %v8927_v17 = vld [vmem:[#allocation6 + $0x84] ss:$16 sps:$4 sm:$0xff]  }
  0x40   :  { %1055 = vmatpush1.bf16.msra.mxu0 %v8913_v7  ;;  %1441 = vmatpush1.bf16.msra.mxu1 %v8914_v8  ;;  %v8929_v18 = vld [vmem:[#allocation6 + $0x8c] ss:$16 sps:$4 sm:$0xff]   ;;  %v8931_v19 = vld [vmem:[#allocation6 + $0x80] ss:$16 sps:$4 sm:$0xff]   ;;  %v8932_v20 = vld [vmem:[#allocation6 + $0x88] ss:$16 sps:$4 sm:$0xff]  }
  0x41   :  { %1056 = vmatprep.subr.bf16.mxu0 %v8915_v9  ;;  %1442 = vmatprep.subr.bf16.mxu1 %v8917_v10  ;;  %v8933_v21 = vld [vmem:[#allocation6 + $0xa4] ss:$16 sps:$4 sm:$0xff]   ;;  %v8935_v22 = vld [vmem:[#allocation6 + $0xac] ss:$16 sps:$4 sm:$0xff]   ;;  %v8937_v23 = vld [vmem:[#allocation6 + $0xa0] ss:$16 sps:$4 sm:$0xff]  }
  0x42   :  { %v8938_v24 = vld [vmem:[#allocation6 + $0xa8] ss:$16 sps:$4 sm:$0xff]   ;;  %v8939_v25 = vld [vmem:[#allocation6 + $0xc4] ss:$16 sps:$4 sm:$0xff]   ;;  %v8941_v26 = vld [vmem:[#allocation6 + $0xcc] ss:$16 sps:$4 sm:$0xff]  }
  0x43   :  { %v8943_v27 = vld [vmem:[#allocation6 + $0xc0] ss:$16 sps:$4 sm:$0xff]   ;;  %v8944_v28 = vld [vmem:[#allocation6 + $0xc8] ss:$16 sps:$4 sm:$0xff]   ;;  %v8945_v29 = vld [vmem:[#allocation6 + $0xe4] ss:$16 sps:$4 sm:$0xff]  }
  0x44   :  { %1057 = vmatpush1.bf16.msra.mxu0 %v8919_v11  ;;  %1443 = vmatpush1.bf16.msra.mxu1 %v8920_v12  ;;  %v8947_v30 = vld [vmem:[#allocation6 + $0xec] ss:$16 sps:$4 sm:$0xff]   ;;  %v8949_v31 = vld [vmem:[#allocation6 + $0xe0] ss:$16 sps:$4 sm:$0xff]   ;;  %v8950_v32 = vld [vmem:[#allocation6 + $0xe8] ss:$16 sps:$4 sm:$0xff]  }
  0x45   :  { %1058 = vmatprep.subr.bf16.mxu0 %v8921_v13  ;;  %1444 = vmatprep.subr.bf16.mxu1 %v8923_v14  ;;  %v8951_v33 = vld [vmem:[#allocation6 + $0x104] ss:$16 sps:$4 sm:$0xff]   ;;  %v8953_v34 = vld [vmem:[#allocation6 + $0x10c] ss:$16 sps:$4 sm:$0xff]   ;;  %v8955_v35 = vld [vmem:[#allocation6 + $0x100] ss:$16 sps:$4 sm:$0xff]  }
  0x46   :  { %v8956_v36 = vld [vmem:[#allocation6 + $0x108] ss:$16 sps:$4 sm:$0xff]   ;;  %v8957_v37 = vld [vmem:[#allocation6 + $0x124] ss:$16 sps:$4 sm:$0xff]   ;;  %v8959_v38 = vld [vmem:[#allocation6 + $0x12c] ss:$16 sps:$4 sm:$0xff]  }
  0x47   :  { %v8961_v39 = vld [vmem:[#allocation6 + $0x120] ss:$16 sps:$4 sm:$0xff]   ;;  %v8962_v40 = vld [vmem:[#allocation6 + $0x128] ss:$16 sps:$4 sm:$0xff]   ;;  %v8963_v41 = vld [vmem:[#allocation6 + $0x144] ss:$16 sps:$4 sm:$0xff]  }
  0x48   :  { %1059 = vmatpush1.bf16.msra.mxu0 %v8925_v15  ;;  %1445 = vmatpush1.bf16.msra.mxu1 %v8926_v16  ;;  %v8965_v42 = vld [vmem:[#allocation6 + $0x14c] ss:$16 sps:$4 sm:$0xff]   ;;  %v8967_v43 = vld [vmem:[#allocation6 + $0x140] ss:$16 sps:$4 sm:$0xff]   ;;  %v8968_v44 = vld [vmem:[#allocation6 + $0x148] ss:$16 sps:$4 sm:$0xff]  }
  0x49   :  { %1060 = vmatprep.subr.bf16.mxu0 %v8927_v17  ;;  %1446 = vmatprep.subr.bf16.mxu1 %v8929_v18  ;;  %v8969_v45 = vld [vmem:[#allocation6 + $0x164] ss:$16 sps:$4 sm:$0xff]   ;;  %v8971_v46 = vld [vmem:[#allocation6 + $0x16c] ss:$16 sps:$4 sm:$0xff]   ;;  %v8973_v48 = vld [vmem:[#allocation6 + $0x160] ss:$16 sps:$4 sm:$0xff]  }
  0x4a   :  { %v71_v47 = vld [vmem:[#allocation3 + $0x8] sm:$0xff]  ;;  %v8975_v52 = vld [vmem:[#allocation6 + $0x184] ss:$16 sps:$4 sm:$0xff]   ;;  %v8979_v54 = vld [vmem:[#allocation6 + $0x180] ss:$16 sps:$4 sm:$0xff]  }
  0x4b   :  { %v75_v49 = vld [vmem:[#allocation3 + $0x28] sm:$0xff]  ;;  %v8981_v56 = vld [vmem:[#allocation6 + $0x1a4] ss:$16 sps:$4 sm:$0xff]   ;;  %v8985_v58 = vld [vmem:[#allocation6 + $0x1a0] ss:$16 sps:$4 sm:$0xff]  }
  0x4c   :  { %1061 = vmatpush1.bf16.msra.mxu0 %v8931_v19  ;;  %1447 = vmatpush1.bf16.msra.mxu1 %v8932_v20  ;;  %v8974_v50 = vld [vmem:[#allocation6 + $0x168] ss:$16 sps:$4 sm:$0xff]   ;;  %v328_v51 = vpack.c.bf16 %v75_v49, %v71_v47  ;;  %v8977_v53 = vld [vmem:[#allocation6 + $0x18c] ss:$16 sps:$4 sm:$0xff]   ;;  %v8987_v60 = vld [vmem:[#allocation6 + $0x1c4] ss:$16 sps:$4 sm:$0xff]  }
  0x4d   :  { %1062 = vmatprep.subr.bf16.mxu0 %v8933_v21  ;;  %1448 = vmatprep.subr.bf16.mxu1 %v8935_v22  ;;  %v8980_v55 = vld [vmem:[#allocation6 + $0x188] ss:$16 sps:$4 sm:$0xff]   ;;  %v8983_v57 = vld [vmem:[#allocation6 + $0x1ac] ss:$16 sps:$4 sm:$0xff]   ;;  %v8991_v62 = vld [vmem:[#allocation6 + $0x1c0] ss:$16 sps:$4 sm:$0xff]  }
  0x4e   :  { %1084 = vmatprep.mubr.bf16.mxu0 %v328_v51  ;;  %1470 = vmatprep.mubr.bf16.mxu1 %v328_v51  ;;  %v8986_v59 = vld [vmem:[#allocation6 + $0x1a8] ss:$16 sps:$4 sm:$0xff]   ;;  %v8989_v61 = vld [vmem:[#allocation6 + $0x1cc] ss:$16 sps:$4 sm:$0xff]   ;;  %v8993_v0 = vld [vmem:[#allocation6 + $0x1e4] ss:$16 sps:$4 sm:$0xff]  }
  0x4f   :  { %v8992_v63 = vld [vmem:[#allocation6 + $0x1c8] ss:$16 sps:$4 sm:$0xff]   ;;  %v8995_v1 = vld [vmem:[#allocation6 + $0x1ec] ss:$16 sps:$4 sm:$0xff]   ;;  %v8997_v2 = vld [vmem:[#allocation6 + $0x1e0] ss:$16 sps:$4 sm:$0xff]  }
  0x50   :  { %1063 = vmatpush1.bf16.msra.mxu0 %v8937_v23  ;;  %1449 = vmatpush1.bf16.msra.mxu1 %v8938_v24  ;;  %v8998_v3 = vld [vmem:[#allocation6 + $0x1e8] ss:$16 sps:$4 sm:$0xff]   ;;  %v70_v4 = vld [vmem:[#allocation3] sm:$0xff]  ;;  %v9028_v17 = vld [vmem:[#allocation6 + $0x20c] ss:$16 sps:$4 sm:$0xff]  }
  0x51   :  { %1064 = vmatprep.subr.bf16.mxu0 %v8939_v25  ;;  %1450 = vmatprep.subr.bf16.mxu1 %v8941_v26  ;;  %v74_v5 = vld [vmem:[#allocation3 + $0x20] sm:$0xff]  ;;  %v79_v7 = vld [vmem:[#allocation3 + $0x48] sm:$0xff] }
  0x52   :  { %v9001_v6 = vld [vmem:[#allocation6 + $0x204] ss:$16 sps:$4 sm:$0xff]   ;;  %v83_v8 = vld [vmem:[#allocation3 + $0x68] sm:$0xff]  ;;  %v327_v9 = vpack.c.bf16 %v74_v5, %v70_v4  ;;  %v8999_v10 = vld [vmem:[#allocation6 + $0x200] ss:$16 sps:$4 sm:$0xff]  }
  0x53   :  { %v332_v11 = vpack.c.bf16 %v83_v8, %v79_v7  ;;  %v9004_v12 = vld [vmem:[#allocation6 + $0x224] ss:$16 sps:$4 sm:$0xff]   ;;  %v9002_v15 = vld [vmem:[#allocation6 + $0x220] ss:$16 sps:$4 sm:$0xff]   ;;  %v9026_v16 = vld [vmem:[#allocation6 + $0x208] ss:$16 sps:$4 sm:$0xff]  }
  0x54   :  { %1065 = vmatpush1.bf16.msra.mxu0 %v8943_v27  ;;  %1451 = vmatpush1.bf16.msra.mxu1 %v8944_v28  ;;  %v78_v13 = vld [vmem:[#allocation3 + $0x40] sm:$0xff]  ;;  %v87_v18 = vld [vmem:[#allocation3 + $0x88] sm:$0xff] }
  0x55   :  { %1066 = vmatprep.subr.bf16.mxu0 %v8945_v29  ;;  %1452 = vmatprep.subr.bf16.mxu1 %v8947_v30  ;;  %v82_v14 = vld [vmem:[#allocation3 + $0x60] sm:$0xff]  ;;  %v91_v19 = vld [vmem:[#allocation3 + $0xa8] sm:$0xff] }
  0x56   :  { %v9007_v20 = vld [vmem:[#allocation6 + $0x244] ss:$16 sps:$4 sm:$0xff]   ;;  %v9031_v21 = vld [vmem:[#allocation6 + $0x22c] ss:$16 sps:$4 sm:$0xff]   ;;  %v331_v22 = vpack.c.bf16 %v82_v14, %v78_v13  ;;  %v336_v23 = vpack.c.bf16 %v91_v19, %v87_v18  ;;  %v9005_v24 = vld [vmem:[#allocation6 + $0x240] ss:$16 sps:$4 sm:$0xff]  }
  0x57   :  { %v9029_v25 = vld [vmem:[#allocation6 + $0x228] ss:$16 sps:$4 sm:$0xff]   ;;  %v86_v26 = vld [vmem:[#allocation3 + $0x80] sm:$0xff]  ;;  %v9037_v28 = vld [vmem:[#allocation6 + $0x24c] ss:$16 sps:$4 sm:$0xff]  }
  0x58   :  { %1067 = vmatpush1.bf16.msra.mxu0 %v8949_v31  ;;  %1453 = vmatpush1.bf16.msra.mxu1 %v8950_v32  ;;  %v9010_v27 = vld [vmem:[#allocation6 + $0x264] ss:$16 sps:$4 sm:$0xff]   ;;  %v95_v30 = vld [vmem:[#allocation3 + $0xc8] sm:$0xff]  ;;  %v9008_v32 = vld [vmem:[#allocation6 + $0x260] ss:$16 sps:$4 sm:$0xff]  }
  0x59   :  { %1068 = vmatprep.subr.bf16.mxu0 %v8951_v33  ;;  %1454 = vmatprep.subr.bf16.mxu1 %v8953_v34  ;;  %v90_v29 = vld [vmem:[#allocation3 + $0xa0] sm:$0xff]  ;;  %v99_v31 = vld [vmem:[#allocation3 + $0xe8] sm:$0xff] }
  0x5a   :  { %v9035_v33 = vld [vmem:[#allocation6 + $0x248] ss:$16 sps:$4 sm:$0xff]   ;;  %v9013_v34 = vld [vmem:[#allocation6 + $0x284] ss:$16 sps:$4 sm:$0xff]   ;;  %v9049_v49 = vld [vmem:[#allocation6 + $0x2ac] ss:$16 sps:$4 sm:$0xff]  }
  0x5b   :  { %v9044_v47 = vld [vmem:[#allocation6 + $0x288] ss:$16 sps:$4 sm:$0xff]   ;;  %v9034_v4 = vld [vmem:[#allocation6 + $0x324] ss:$16 sps:$4 sm:$0xff]   ;;  %v9064_v5 = vld [vmem:[#allocation6 + $0x30c] ss:$16 sps:$4 sm:$0xff]  }
  0x5c   :  { %1069 = vmatpush1.bf16.msra.mxu0 %v8955_v35  ;;  %1455 = vmatpush1.bf16.msra.mxu1 %v8956_v36  ;;  %v9040_v35 = vld [vmem:[#allocation6 + $0x26c] ss:$16 sps:$4 sm:$0xff]   ;;  %v335_v36 = vpack.c.bf16 %v90_v29, %v86_v26  ;;  %v114_v7 = vld [vmem:[#allocation3 + $0x160] sm:$0xff] }
  0x5d   :  { %1070 = vmatprep.subr.bf16.mxu0 %v8957_v37  ;;  %1456 = vmatprep.subr.bf16.mxu1 %v8959_v38  ;;  %v340_v37 = vpack.c.bf16 %v99_v31, %v95_v30  ;;  %v9011_v38 = vld [vmem:[#allocation6 + $0x280] ss:$16 sps:$4 sm:$0xff]   ;;  %v119_v8 = vld [vmem:[#allocation3 + $0x188] sm:$0xff]  ;;  %v9052_v18 = vld [vmem:[#allocation6 + $0x364] ss:$16 sps:$4 sm:$0xff]  }
  0x5e   :  { %v9067_v13 = vld [vmem:[#allocation6 + $0x32c] ss:$16 sps:$4 sm:$0xff]   ;;  %v9061_v26 = vld [vmem:[#allocation6 + $0x384] ss:$16 sps:$4 sm:$0xff]   ;;  %v9059_v30 = vld [vmem:[#allocation6 + $0x380] ss:$16 sps:$4 sm:$0xff]  }
  0x5f   :  { %v9073_v19 = vld [vmem:[#allocation6 + $0x34c] ss:$16 sps:$4 sm:$0xff]   ;;  %v9074_v31 = vld [vmem:[#allocation6 + $0x368] ss:$16 sps:$4 sm:$0xff]  }
  0x60   :  { %1071 = vmatpush1.bf16.msra.mxu0 %v8961_v39  ;;  %1457 = vmatpush1.bf16.msra.mxu1 %v8962_v40  ;;  %v9038_v39 = vld [vmem:[#allocation6 + $0x268] ss:$16 sps:$4 sm:$0xff]   ;;  %v9016_v40 = vld [vmem:[#allocation6 + $0x2a4] ss:$16 sps:$4 sm:$0xff]  }
  0x61   :  { %1072 = vmatprep.subr.bf16.mxu0 %v8963_v41  ;;  %1458 = vmatprep.subr.bf16.mxu1 %v8965_v42  ;;  %v9046_v41 = vld [vmem:[#allocation6 + $0x28c] ss:$16 sps:$4 sm:$0xff]   ;;  %v94_v42 = vld [vmem:[#allocation3 + $0xc0] sm:$0xff] }
  0x64   :  { %1073 = vmatpush1.bf16.msra.mxu0 %v8967_v43  ;;  %1459 = vmatpush1.bf16.msra.mxu1 %v8968_v44  ;;  %v98_v43 = vld [vmem:[#allocation3 + $0xe0] sm:$0xff]  ;;  %v103_v44 = vld [vmem:[#allocation3 + $0x108] sm:$0xff] }
  0x65   :  { %1074 = vmatprep.subr.bf16.mxu0 %v8969_v45  ;;  %1460 = vmatprep.subr.bf16.mxu1 %v8971_v46  ;;  %v107_v45 = vld [vmem:[#allocation3 + $0x128] sm:$0xff]  ;;  %v9014_v46 = vld [vmem:[#allocation6 + $0x2a0] ss:$16 sps:$4 sm:$0xff]  }
  0x66   :  { %v344_v51 = vpack.c.bf16 %v107_v45, %v103_v44  ;;  %v9083_v44 = vld [vmem:[#allocation6 + $0x3a8] ss:$16 sps:$4 sm:$0xff]  }
  0x68   :  { %1075 = vmatpush1.bf16.msra.mxu0 %v8973_v48  ;;  %1461 = vmatpush1.bf16.msra.mxu1 %v8974_v50  ;;  %v9019_v48 = vld [vmem:[#allocation6 + $0x2c4] ss:$16 sps:$4 sm:$0xff]   ;;  %v339_v50 = vpack.c.bf16 %v98_v43, %v94_v42  ;;  %v9077_v43 = vld [vmem:[#allocation6 + $0x3c0] ss:$16 sps:$4 sm:$0xff]  }
  0x69   :  { %1076 = vmatprep.subr.bf16.mxu0 %v8975_v52  ;;  %1462 = vmatprep.subr.bf16.mxu1 %v8977_v53  ;;  %v9017_v52 = vld [vmem:[#allocation6 + $0x2c0] ss:$16 sps:$4 sm:$0xff]   ;;  %v9047_v53 = vld [vmem:[#allocation6 + $0x2a8] ss:$16 sps:$4 sm:$0xff]  }
  0x6c   :  { %1077 = vmatpush1.bf16.msra.mxu0 %v8979_v54  ;;  %1463 = vmatpush1.bf16.msra.mxu1 %v8980_v55  ;;  %v102_v54 = vld [vmem:[#allocation3 + $0x100] sm:$0xff] }
  0x6d   :  { %1078 = vmatprep.subr.bf16.mxu0 %v8981_v56  ;;  %1464 = vmatprep.subr.bf16.mxu1 %v8983_v57  ;;  %v9022_v55 = vld [vmem:[#allocation6 + $0x2e4] ss:$16 sps:$4 sm:$0xff]   ;;  %v9055_v56 = vld [vmem:[#allocation6 + $0x2cc] ss:$16 sps:$4 sm:$0xff]  }
  0x6e   :  { %v106_v57 = vld [vmem:[#allocation3 + $0x120] sm:$0xff] }
  0x70   :  { %1079 = vmatpush1.bf16.msra.mxu0 %v8985_v58  ;;  %1465 = vmatpush1.bf16.msra.mxu1 %v8986_v59  ;;  %v111_v58 = vld [vmem:[#allocation3 + $0x148] sm:$0xff] }
  0x71   :  { %1080 = vmatprep.subr.bf16.mxu0 %v8987_v60  ;;  %1466 = vmatprep.subr.bf16.mxu1 %v8989_v61  ;;  %v115_v59 = vld [vmem:[#allocation3 + $0x168] sm:$0xff]  ;;  %v9020_v60 = vld [vmem:[#allocation6 + $0x2e0] ss:$16 sps:$4 sm:$0xff]  }
  0x72   :  { %v9053_v61 = vld [vmem:[#allocation6 + $0x2c8] ss:$16 sps:$4 sm:$0xff]  }
  0x74   :  { %1081 = vmatpush1.bf16.msra.mxu0 %v8991_v62  ;;  %1467 = vmatpush1.bf16.msra.mxu1 %v8992_v63  ;;  %v9025_v62 = vld [vmem:[#allocation6 + $0x304] ss:$16 sps:$4 sm:$0xff]   ;;  %v9058_v63 = vld [vmem:[#allocation6 + $0x2ec] ss:$16 sps:$4 sm:$0xff]  }
  0x75   :  { %1082 = vmatprep.subr.bf16.mxu0 %v8993_v0  ;;  %1468 = vmatprep.subr.bf16.mxu1 %v8995_v1  ;;  %v343_v0 = vpack.c.bf16 %v106_v57, %v102_v54  ;;  %v348_v1 = vpack.c.bf16 %v115_v59, %v111_v58  ;;  %v9094_v54 = vld [vmem:[#allocation6 + $0x3ec] ss:$16 sps:$4 sm:$0xff]   ;;  %v142_v58 = vld [vmem:[#allocation3 + $0x240] sm:$0xff] }
  0x76   :  { %v146_v59 = vld [vmem:[#allocation3 + $0x260] sm:$0xff] }
  0x78   :  { %1083 = vmatpush1.bf16.msra.mxu0 %v8997_v2  ;;  %1469 = vmatpush1.bf16.msra.mxu1 %v8998_v3  ;;  %v9023_v2 = vld [vmem:[#allocation6 + $0x300] ss:$16 sps:$4 sm:$0xff]   ;;  %v9056_v3 = vld [vmem:[#allocation6 + $0x2e8] ss:$16 sps:$4 sm:$0xff]  }
  0x79   :  { %1245 = vmatprep.subr.bf16.mxu0 %v9001_v6  ;;  %1631 = vmatprep.subr.bf16.mxu1 %v9028_v17  ;;  %v110_v6 = vld [vmem:[#allocation3 + $0x140] sm:$0xff]  ;;  %v9065_v17 = vld [vmem:[#allocation6 + $0x328] ss:$16 sps:$4 sm:$0xff]  }
  0x7a   :  { %v347_v14 = vpack.c.bf16 %v114_v7, %v110_v6  ;;  %v158_v6 = vld [vmem:[#allocation3 + $0x2c0] sm:$0xff] }
  0x7b   :  { %1085 = vmatmul.mubr.bf16.vlgmr.msra.gmra.mrb[0].mxu0 %v327_v9  ;;  %1471 = vmatmul.mubr.bf16.vlgmr.msra.gmra.mrb[0].mxu1 %v327_v9  ;;  %v123_v9 = vld [vmem:[#allocation3 + $0x1a8] sm:$0xff]  ;;  %v162_v7 = vld [vmem:[#allocation3 + $0x2e0] sm:$0xff] }
  0x7c   :  { %1246 = vmatpush1.bf16.msra.mxu0 %v8999_v10  ;;  %1094 = vmatprep.mubr.bf16.mxu0 %v332_v11  ;;  %v9032_v10 = vld [vmem:[#allocation6 + $0x320] ss:$16 sps:$4 sm:$0xff]  }
  0x7d   :  { %1480 = vmatprep.mubr.bf16.mxu1 %v332_v11  ;;  %1247 = vmatprep.subr.bf16.mxu0 %v9004_v12  ;;  %v9062_v11 = vld [vmem:[#allocation6 + $0x308] ss:$16 sps:$4 sm:$0xff]   ;;  %v9043_v12 = vld [vmem:[#allocation6 + $0x344] ss:$16 sps:$4 sm:$0xff]  }
  0x7e   :  { %1632 = vmatpush1.bf16.msra.mxu1 %v9026_v16  ;;  %v9041_v16 = vld [vmem:[#allocation6 + $0x340] ss:$16 sps:$4 sm:$0xff]  }
  0x7f   :  { %1633 = vmatprep.subr.bf16.mxu1 %v9031_v21  ;;  %v122_v21 = vld [vmem:[#allocation3 + $0x1a0] sm:$0xff] }
  0x80   :  { %1248 = vmatpush1.bf16.msra.mxu0 %v9002_v15  ;;  %v352_v15 = vpack.c.bf16 %v123_v9, %v119_v8  ;;  %v167_v8 = vld [vmem:[#allocation3 + $0x308] sm:$0xff] }
  0x81   :  { %1249 = vmatprep.subr.bf16.mxu0 %v9007_v20  ;;  %v118_v20 = vld [vmem:[#allocation3 + $0x180] sm:$0xff]  ;;  %v171_v9 = vld [vmem:[#allocation3 + $0x328] sm:$0xff] }
  0x82   :  { %1634 = vmatpush1.bf16.msra.mxu1 %v9029_v25  ;;  %v9071_v25 = vld [vmem:[#allocation6 + $0x348] ss:$16 sps:$4 sm:$0xff]  }
  0x83   :  { %1095 = vmatmul.mubr.bf16.gmra.mrb[4].mxu0 %v331_v22  ;;  %1481 = vmatmul.mubr.bf16.gmra.mrb[4].mxu1 %v331_v22  ;;  %v127_v22 = vld [vmem:[#allocation3 + $0x1c8] sm:$0xff] }
  0x84   :  { %1104 = vmatprep.mubr.bf16.mxu0 %v336_v23  ;;  %1490 = vmatprep.mubr.bf16.mxu1 %v336_v23  ;;  %v131_v23 = vld [vmem:[#allocation3 + $0x1e8] sm:$0xff] }
  0x85   :  { %1250 = vmatpush1.bf16.msra.mxu0 %v9005_v24  ;;  %1635 = vmatprep.subr.bf16.mxu1 %v9037_v28  ;;  %v9050_v24 = vld [vmem:[#allocation6 + $0x360] ss:$16 sps:$4 sm:$0xff]   ;;  %v351_v28 = vpack.c.bf16 %v122_v21, %v118_v20  ;;  %v356_v29 = vpack.c.bf16 %v131_v23, %v127_v22  ;;  %v183_v22 = vld [vmem:[#allocation3 + $0x388] sm:$0xff] }
  0x86   :  { %1251 = vmatprep.subr.bf16.mxu0 %v9010_v27  ;;  %1636 = vmatpush1.bf16.msra.mxu1 %v9035_v33  ;;  %v9076_v27 = vld [vmem:[#allocation6 + $0x36c] ss:$16 sps:$4 sm:$0xff]   ;;  %v9070_v33 = vld [vmem:[#allocation6 + $0x3a4] ss:$16 sps:$4 sm:$0xff]  }
  0x87   :  { %1637 = vmatprep.subr.bf16.mxu1 %v9040_v35  ;;  %v130_v35 = vld [vmem:[#allocation3 + $0x1e0] sm:$0xff]  ;;  %v187_v23 = vld [vmem:[#allocation3 + $0x3a8] sm:$0xff] }
  0x88   :  { %v174_v20 = vld [vmem:[#allocation3 + $0x340] sm:$0xff] }
  0x89   :  { %1252 = vmatpush1.bf16.msra.mxu0 %v9008_v32  ;;  %v126_v32 = vld [vmem:[#allocation3 + $0x1c0] sm:$0xff] }
  0x8a   :  { %1253 = vmatprep.subr.bf16.mxu0 %v9013_v34  ;;  %1638 = vmatpush1.bf16.msra.mxu1 %v9038_v39  ;;  %v9082_v34 = vld [vmem:[#allocation6 + $0x38c] ss:$16 sps:$4 sm:$0xff]   ;;  %v9079_v39 = vld [vmem:[#allocation6 + $0x3c4] ss:$16 sps:$4 sm:$0xff]   ;;  %v355_v42 = vpack.c.bf16 %v130_v35, %v126_v32 }
  0x8b   :  { %1105 = vmatmul.mubr.bf16.gmra.mrb[8].mxu0 %v335_v36  ;;  %1491 = vmatmul.mubr.bf16.gmra.mrb[8].mxu1 %v335_v36  ;;  %v135_v36 = vld [vmem:[#allocation3 + $0x208] sm:$0xff]  ;;  %v178_v21 = vld [vmem:[#allocation3 + $0x360] sm:$0xff]  ;;  %v77_v35 = vld [vmem:[#allocation3 + $0x38] sm:$0xff] }
  0x8c   :  { %1114 = vmatprep.mubr.bf16.mxu0 %v340_v37  ;;  %1500 = vmatprep.mubr.bf16.mxu1 %v340_v37  ;;  %v139_v37 = vld [vmem:[#allocation3 + $0x228] sm:$0xff]  ;;  %v190_v32 = vld [vmem:[#allocation3 + $0x3c0] sm:$0xff] }
  0x8d   :  { %1254 = vmatpush1.bf16.msra.mxu0 %v9011_v38  ;;  %1639 = vmatprep.subr.bf16.mxu1 %v9046_v41  ;;  %v9068_v38 = vld [vmem:[#allocation6 + $0x3a0] ss:$16 sps:$4 sm:$0xff]   ;;  %v9085_v41 = vld [vmem:[#allocation6 + $0x3ac] ss:$16 sps:$4 sm:$0xff]   ;;  %v360_v45 = vpack.c.bf16 %v139_v37, %v135_v36 }
  0x8e   :  { %1255 = vmatprep.subr.bf16.mxu0 %v9016_v40  ;;  %1640 = vmatpush1.bf16.msra.mxu1 %v9044_v47  ;;  %v9080_v40 = vld [vmem:[#allocation6 + $0x388] ss:$16 sps:$4 sm:$0xff]   ;;  %v9091_v47 = vld [vmem:[#allocation6 + $0x3cc] ss:$16 sps:$4 sm:$0xff]  }
  0x8f   :  { %1641 = vmatprep.subr.bf16.mxu1 %v9049_v49  ;;  %v138_v49 = vld [vmem:[#allocation3 + $0x220] sm:$0xff] }
  0x91   :  { %1256 = vmatpush1.bf16.msra.mxu0 %v9014_v46  ;;  %v9088_v46 = vld [vmem:[#allocation6 + $0x3e4] ss:$16 sps:$4 sm:$0xff]  }
  0x92   :  { %1257 = vmatprep.subr.bf16.mxu0 %v9019_v48  ;;  %1642 = vmatpush1.bf16.msra.mxu1 %v9047_v53  ;;  %v134_v48 = vld [vmem:[#allocation3 + $0x200] sm:$0xff]  ;;  %v9089_v53 = vld [vmem:[#allocation6 + $0x3c8] ss:$16 sps:$4 sm:$0xff]  }
  0x93   :  { %1115 = vmatmul.mubr.bf16.gmra.mrb[12].mxu0 %v339_v50  ;;  %1501 = vmatmul.mubr.bf16.gmra.mrb[12].mxu1 %v339_v50  ;;  %v143_v50 = vld [vmem:[#allocation3 + $0x248] sm:$0xff] }
  0x94   :  { %1124 = vmatprep.mubr.bf16.mxu0 %v344_v51  ;;  %1510 = vmatprep.mubr.bf16.mxu1 %v344_v51  ;;  %v147_v51 = vld [vmem:[#allocation3 + $0x268] sm:$0xff] }
  0x95   :  { %1258 = vmatpush1.bf16.msra.mxu0 %v9017_v52  ;;  %1643 = vmatprep.subr.bf16.mxu1 %v9055_v56  ;;  %v9086_v52 = vld [vmem:[#allocation6 + $0x3e0] ss:$16 sps:$4 sm:$0xff]   ;;  %v9092_v56 = vld [vmem:[#allocation6 + $0x3e8] ss:$16 sps:$4 sm:$0xff]   ;;  %v364_v57 = vpack.c.bf16 %v147_v51, %v143_v50 }
  0x96   :  { %1259 = vmatprep.subr.bf16.mxu0 %v9022_v55  ;;  %1644 = vmatpush1.bf16.msra.mxu1 %v9053_v61  ;;  %v359_v55 = vpack.c.bf16 %v138_v49, %v134_v48  ;;  %v155_v61 = vld [vmem:[#allocation3 + $0x2a8] sm:$0xff]  ;;  %v80_v48 = vld [vmem:[#allocation3 + $0x50] sm:$0xff]  ;;  %v89_v50 = vld [vmem:[#allocation3 + $0x98] sm:$0xff] }
  0x97   :  { %1645 = vmatprep.subr.bf16.mxu1 %v9058_v63  ;;  %v84_v49 = vld [vmem:[#allocation3 + $0x70] sm:$0xff]  ;;  %v93_v51 = vld [vmem:[#allocation3 + $0xb8] sm:$0xff] }
  0x99   :  { %1260 = vmatpush1.bf16.msra.mxu0 %v9020_v60  ;;  %v151_v60 = vld [vmem:[#allocation3 + $0x288] sm:$0xff] }
  0x9a   :  { %1261 = vmatprep.subr.bf16.mxu0 %v9025_v62  ;;  %1646 = vmatpush1.bf16.msra.mxu1 %v9056_v3  ;;  %v363_v62 = vpack.c.bf16 %v146_v59, %v142_v58  ;;  %v368_v63 = vpack.c.bf16 %v155_v61, %v151_v60  ;;  %v163_v3 = vld [vmem:[#allocation3 + $0x2e8] sm:$0xff]  ;;  %v9107_v58 = vld [vmem:[#allocation8 + $0x40] ss:$16 sps:$4 sm:$0xff]   ;;  %v9115_v60 = vld [vmem:[#allocation8 + $0x64] ss:$16 sps:$4 sm:$0xff]  }
  0x9b   :  { %1125 = vmatmul.mubr.bf16.gmra.mrb[16].mxu0 %v343_v0  ;;  %1511 = vmatmul.mubr.bf16.gmra.mrb[16].mxu1 %v343_v0  ;;  %v150_v0 = vld [vmem:[#allocation3 + $0x280] sm:$0xff]  ;;  %v9110_v59 = vld [vmem:[#allocation8 + $0x48] ss:$16 sps:$4 sm:$0xff]   ;;  %v9118_v61 = vld [vmem:[#allocation8 + $0x6c] ss:$16 sps:$4 sm:$0xff]  }
  0x9c   :  { %1134 = vmatprep.mubr.bf16.mxu0 %v348_v1  ;;  %1520 = vmatprep.mubr.bf16.mxu1 %v348_v1  ;;  %v154_v1 = vld [vmem:[#allocation3 + $0x2a0] sm:$0xff] }
  0x9d   :  { %1262 = vmatpush1.bf16.msra.mxu0 %v9023_v2  ;;  %1647 = vmatprep.subr.bf16.mxu1 %v9064_v5  ;;  %v159_v2 = vld [vmem:[#allocation3 + $0x2c8] sm:$0xff] }
  0x9e   :  { %1263 = vmatprep.subr.bf16.mxu0 %v9034_v4  ;;  %1648 = vmatpush1.bf16.msra.mxu1 %v9062_v11  ;;  %v367_v4 = vpack.c.bf16 %v154_v1, %v150_v0  ;;  %v372_v5 = vpack.c.bf16 %v163_v3, %v159_v2  ;;  %v376_v11 = vpack.c.bf16 %v171_v9, %v167_v8  ;;  %v97_v0 = vld [vmem:[#allocation3 + $0xd8] sm:$0xff]  ;;  %v9113_v2 = vld [vmem:[#allocation8 + $0x60] ss:$16 sps:$4 sm:$0xff]  }
  0x9f   :  { %1649 = vmatprep.subr.bf16.mxu1 %v9067_v13  ;;  %v170_v13 = vld [vmem:[#allocation3 + $0x320] sm:$0xff]  ;;  %v101_v1 = vld [vmem:[#allocation3 + $0xf8] sm:$0xff] }
  0xa0   :  { %v9116_v3 = vld [vmem:[#allocation8 + $0x68] ss:$16 sps:$4 sm:$0xff]   ;;  %v9119_v8 = vld [vmem:[#allocation8 + $0x80] ss:$16 sps:$4 sm:$0xff]  }
  0xa1   :  { %1264 = vmatpush1.bf16.msra.mxu0 %v9032_v10  ;;  %v371_v10 = vpack.c.bf16 %v162_v7, %v158_v6  ;;  %v342_v7 = vpack.c.bf16 %v101_v1, %v97_v0  ;;  %v9122_v9 = vld [vmem:[#allocation8 + $0x88] ss:$16 sps:$4 sm:$0xff]   ;;  %v9167_v0 = vld [vmem:[#allocation8 + $0x180] ss:$16 sps:$4 sm:$0xff]  }
  0xa2   :  { %1265 = vmatprep.subr.bf16.mxu0 %v9043_v12  ;;  %1650 = vmatpush1.bf16.msra.mxu1 %v9065_v17  ;;  %v166_v12 = vld [vmem:[#allocation3 + $0x300] sm:$0xff]  ;;  %v9170_v1 = vld [vmem:[#allocation8 + $0x188] ss:$16 sps:$4 sm:$0xff]  }
  0xa3   :  { %1135 = vmatmul.mubr.bf16.gmra.mrb[20].mxu0 %v347_v14  ;;  %1521 = vmatmul.mubr.bf16.gmra.mrb[20].mxu1 %v347_v14  ;;  %v175_v14 = vld [vmem:[#allocation3 + $0x348] sm:$0xff]  ;;  %v375_v17 = vpack.c.bf16 %v170_v13, %v166_v12  ;;  %v96_v12 = vld [vmem:[#allocation3 + $0xd0] sm:$0xff] }
  0xa4   :  { %1144 = vmatprep.mubr.bf16.mxu0 %v352_v15  ;;  %1530 = vmatprep.mubr.bf16.mxu1 %v352_v15  ;;  %v9097_v15 = vld [vmem:[#allocation8 + $0x4] ss:$16 sps:$4 sm:$0xff]  }
  0xa5   :  { %1266 = vmatpush1.bf16.msra.mxu0 %v9041_v16  ;;  %1651 = vmatprep.subr.bf16.mxu1 %v9073_v19  ;;  %v179_v16 = vld [vmem:[#allocation3 + $0x368] sm:$0xff]  ;;  %v100_v13 = vld [vmem:[#allocation3 + $0xf0] sm:$0xff] }
  0xa6   :  { %1267 = vmatprep.subr.bf16.mxu0 %v9052_v18  ;;  %1652 = vmatpush1.bf16.msra.mxu1 %v9071_v25  ;;  %v380_v18 = vpack.c.bf16 %v179_v16, %v175_v14  ;;  %v9100_v19 = vld [vmem:[#allocation8 + $0xc] ss:$16 sps:$4 sm:$0xff]   ;;  %v384_v25 = vpack.c.bf16 %v187_v23, %v183_v22  ;;  %v9125_v16 = vld [vmem:[#allocation8 + $0xa0] ss:$16 sps:$4 sm:$0xff]   ;;  %v9134_v23 = vld [vmem:[#allocation8 + $0xc8] ss:$16 sps:$4 sm:$0xff]  }
  0xa7   :  { %1653 = vmatprep.subr.bf16.mxu1 %v9076_v27  ;;  %v186_v27 = vld [vmem:[#allocation3 + $0x3a0] sm:$0xff]  ;;  %v105_v14 = vld [vmem:[#allocation3 + $0x118] sm:$0xff] }
  0xa8   :  { %v9131_v22 = vld [vmem:[#allocation8 + $0xc0] ss:$16 sps:$4 sm:$0xff]  }
  0xa9   :  { %1268 = vmatpush1.bf16.msra.mxu0 %v9050_v24  ;;  %v379_v24 = vpack.c.bf16 %v178_v21, %v174_v20  ;;  %v341_v20 = vpack.c.bf16 %v100_v13, %v96_v12 }
  0xaa   :  { %1269 = vmatprep.subr.bf16.mxu0 %v9061_v26  ;;  %1654 = vmatpush1.bf16.msra.mxu1 %v9074_v31  ;;  %v182_v26 = vld [vmem:[#allocation3 + $0x380] sm:$0xff] }
  0xab   :  { %1145 = vmatmul.mubr.bf16.gmra.mrb[24].mxu0 %v351_v28  ;;  %1531 = vmatmul.mubr.bf16.gmra.mrb[24].mxu1 %v351_v28  ;;  %v191_v28 = vld [vmem:[#allocation3 + $0x3c8] sm:$0xff] }
  0xac   :  { %1154 = vmatprep.mubr.bf16.mxu0 %v356_v29  ;;  %1540 = vmatprep.mubr.bf16.mxu1 %v356_v29  ;;  %v195_v29 = vld [vmem:[#allocation3 + $0x3e8] sm:$0xff] }
  0xad   :  { %1270 = vmatpush1.bf16.msra.mxu0 %v9059_v30  ;;  %1655 = vmatprep.subr.bf16.mxu1 %v9082_v34  ;;  %v383_v30 = vpack.c.bf16 %v186_v27, %v182_v26  ;;  %v388_v31 = vpack.c.bf16 %v195_v29, %v191_v28  ;;  %v73_v34 = vld [vmem:[#allocation3 + $0x18] sm:$0xff]  ;;  %v104_v26 = vld [vmem:[#allocation3 + $0x110] sm:$0xff] }
  0xae   :  { %1271 = vmatprep.subr.bf16.mxu0 %v9070_v33  ;;  %1656 = vmatpush1.bf16.msra.mxu1 %v9080_v40  ;;  %v194_v33 = vld [vmem:[#allocation3 + $0x3e0] sm:$0xff]  ;;  %v330_v37 = vpack.c.bf16 %v77_v35, %v73_v34  ;;  %v81_v40 = vld [vmem:[#allocation3 + $0x58] sm:$0xff]  ;;  %v108_v27 = vld [vmem:[#allocation3 + $0x130] sm:$0xff] }
  0xaf   :  { %1657 = vmatprep.subr.bf16.mxu1 %v9085_v41  ;;  %v387_v36 = vpack.c.bf16 %v194_v33, %v190_v32  ;;  %v85_v41 = vld [vmem:[#allocation3 + $0x78] sm:$0xff]  ;;  %v9145_v32 = vld [vmem:[#allocation8 + $0x104] ss:$16 sps:$4 sm:$0xff]   ;;  %v345_v34 = vpack.c.bf16 %v108_v27, %v104_v26 }
  0xb0   :  { %v113_v28 = vld [vmem:[#allocation3 + $0x158] sm:$0xff] }
  0xb1   :  { %1272 = vmatpush1.bf16.msra.mxu0 %v9068_v38  ;;  %v72_v38 = vld [vmem:[#allocation3 + $0x10] sm:$0xff]  ;;  %v117_v29 = vld [vmem:[#allocation3 + $0x178] sm:$0xff] }
  0xb2   :  { %1273 = vmatprep.subr.bf16.mxu0 %v9079_v39  ;;  %1658 = vmatpush1.bf16.msra.mxu1 %v9083_v44  ;;  %v76_v39 = vld [vmem:[#allocation3 + $0x30] sm:$0xff]  ;;  %v9148_v33 = vld [vmem:[#allocation8 + $0x10c] ss:$16 sps:$4 sm:$0xff]   ;;  %v350_v35 = vpack.c.bf16 %v117_v29, %v113_v28 }
  0xb3   :  { %1155 = vmatmul.mubr.bf16.gmra.mrb[28].mxu0 %v355_v42  ;;  %1541 = vmatmul.mubr.bf16.gmra.mrb[28].mxu1 %v355_v42  ;;  %v329_v42 = vpack.c.bf16 %v76_v39, %v72_v38  ;;  %v9095_v44 = vld [vmem:[#allocation8] ss:$16 sps:$4 sm:$0xff]   ;;  %v9151_v38 = vld [vmem:[#allocation8 + $0x124] ss:$16 sps:$4 sm:$0xff]   ;;  %v9154_v39 = vld [vmem:[#allocation8 + $0x12c] ss:$16 sps:$4 sm:$0xff]  }
  0xb4   :  { %1164 = vmatprep.mubr.bf16.mxu0 %v360_v45  ;;  %1550 = vmatprep.mubr.bf16.mxu1 %v360_v45  ;;  %v9098_v45 = vld [vmem:[#allocation8 + $0x8] ss:$16 sps:$4 sm:$0xff]   ;;  %v152_v28 = vld [vmem:[#allocation3 + $0x290] sm:$0xff] }
  0xb5   :  { %1274 = vmatpush1.bf16.msra.mxu0 %v9077_v43  ;;  %1659 = vmatprep.subr.bf16.mxu1 %v9091_v47  ;;  %v334_v43 = vpack.c.bf16 %v85_v41, %v81_v40  ;;  %v9106_v47 = vld [vmem:[#allocation8 + $0x2c] ss:$16 sps:$4 sm:$0xff]   ;;  %v112_v40 = vld [vmem:[#allocation3 + $0x150] sm:$0xff] }
  0xb6   :  { %1275 = vmatprep.subr.bf16.mxu0 %v9088_v46  ;;  %1660 = vmatpush1.bf16.msra.mxu1 %v9089_v53  ;;  %v9103_v46 = vld [vmem:[#allocation8 + $0x24] ss:$16 sps:$4 sm:$0xff]   ;;  %v9104_v53 = vld [vmem:[#allocation8 + $0x28] ss:$16 sps:$4 sm:$0xff]  }
  0xb7   :  { %1661 = vmatprep.subr.bf16.mxu1 %v9094_v54  ;;  %v9109_v54 = vld [vmem:[#allocation8 + $0x44] ss:$16 sps:$4 sm:$0xff]  }
  0xb8   :  { %v116_v41 = vld [vmem:[#allocation3 + $0x170] sm:$0xff] }
  0xb9   :  { %1276 = vmatpush1.bf16.msra.mxu0 %v9086_v52  ;;  %v9101_v52 = vld [vmem:[#allocation8 + $0x20] ss:$16 sps:$4 sm:$0xff]  }
  0xba   :  { %1662 = vmatpush1.bf16.msra.mxu1 %v9092_v56  ;;  %3062 = vmatprep.subr.bf16.mxu0 %v9097_v15  ;;  %v333_v56 = vpack.c.bf16 %v84_v49, %v80_v48  ;;  %v109_v15 = vld [vmem:[#allocation3 + $0x138] sm:$0xff]  ;;  %v349_v48 = vpack.c.bf16 %v116_v41, %v112_v40  ;;  %v156_v29 = vld [vmem:[#allocation3 + $0x2b0] sm:$0xff] }
  0xbb   :  { %1165 = vmatmul.mubr.bf16.gmra.mrb[32].mxu0 %v359_v55  ;;  %1551 = vmatmul.mubr.bf16.gmra.mrb[32].mxu1 %v359_v55  ;;  %v9112_v55 = vld [vmem:[#allocation8 + $0x4c] ss:$16 sps:$4 sm:$0xff]   ;;  %v346_v21 = vpack.c.bf16 %v109_v15, %v105_v14  ;;  %v9179_v14 = vld [vmem:[#allocation8 + $0x1c0] ss:$16 sps:$4 sm:$0xff]   ;;  %v9182_v15 = vld [vmem:[#allocation8 + $0x1c8] ss:$16 sps:$4 sm:$0xff]  }
  0xbc   :  { %1174 = vmatprep.mubr.bf16.mxu0 %v364_v57  ;;  %1560 = vmatprep.mubr.bf16.mxu1 %v364_v57  ;;  %v338_v57 = vpack.c.bf16 %v93_v51, %v89_v50  ;;  %v9155_v50 = vld [vmem:[#allocation8 + $0x140] ss:$16 sps:$4 sm:$0xff]   ;;  %v9158_v51 = vld [vmem:[#allocation8 + $0x148] ss:$16 sps:$4 sm:$0xff]  }
  0xbd   :  { %3448 = vmatprep.subr.bf16.mxu1 %v9100_v19  ;;  %v9136_v19 = vld [vmem:[#allocation8 + $0xcc] ss:$16 sps:$4 sm:$0xff]   ;;  %v168_v40 = vld [vmem:[#allocation3 + $0x310] sm:$0xff] }
  0xbe   :  { %v172_v41 = vld [vmem:[#allocation3 + $0x330] sm:$0xff] }
  0xc3   :  { %1175 = vmatmul.mubr.bf16.gmra.mrb[36].mxu0 %v363_v62  ;;  %1561 = vmatmul.mubr.bf16.gmra.mrb[36].mxu1 %v363_v62  ;;  %v88_v62 = vld [vmem:[#allocation3 + $0x90] sm:$0xff] }
  0xc4   :  { %1184 = vmatprep.mubr.bf16.mxu0 %v368_v63  ;;  %1570 = vmatprep.mubr.bf16.mxu1 %v368_v63  ;;  %v92_v63 = vld [vmem:[#allocation3 + $0xb0] sm:$0xff] }
  0xc5   :  { %v337_v6 = vpack.c.bf16 %v92_v63, %v88_v62 }
  0xcb   :  { %1185 = vmatmul.mubr.bf16.gmra.mrb[40].mxu0 %v367_v4  ;;  %1571 = vmatmul.mubr.bf16.gmra.mrb[40].mxu1 %v367_v4  ;;  %v9121_v4 = vld [vmem:[#allocation8 + $0x84] ss:$16 sps:$4 sm:$0xff]  }
  0xcc   :  { %1194 = vmatprep.mubr.bf16.mxu0 %v372_v5  ;;  %1580 = vmatprep.mubr.bf16.mxu1 %v372_v5  ;;  %v9124_v5 = vld [vmem:[#allocation8 + $0x8c] ss:$16 sps:$4 sm:$0xff]  }
  0xd3   :  { %1195 = vmatmul.mubr.bf16.gmra.mrb[44].mxu0 %v371_v10  ;;  %1581 = vmatmul.mubr.bf16.gmra.mrb[44].mxu1 %v371_v10  ;;  %v9127_v10 = vld [vmem:[#allocation8 + $0xa4] ss:$16 sps:$4 sm:$0xff]  }
  0xd4   :  { %1204 = vmatprep.mubr.bf16.mxu0 %v376_v11  ;;  %1590 = vmatprep.mubr.bf16.mxu1 %v376_v11  ;;  %v9130_v11 = vld [vmem:[#allocation8 + $0xac] ss:$16 sps:$4 sm:$0xff]  }
  0xdb   :  { %1205 = vmatmul.mubr.bf16.gmra.mrb[48].mxu0 %v375_v17  ;;  %1591 = vmatmul.mubr.bf16.gmra.mrb[48].mxu1 %v375_v17  ;;  %v9128_v17 = vld [vmem:[#allocation8 + $0xa8] ss:$16 sps:$4 sm:$0xff]  }
  0xdc   :  { %1214 = vmatprep.mubr.bf16.mxu0 %v380_v18  ;;  %1600 = vmatprep.mubr.bf16.mxu1 %v380_v18  ;;  %v9133_v18 = vld [vmem:[#allocation8 + $0xc4] ss:$16 sps:$4 sm:$0xff]  }
  0xe3   :  { %1215 = vmatmul.mubr.bf16.gmra.mrb[52].mxu0 %v379_v24  ;;  %1601 = vmatmul.mubr.bf16.gmra.mrb[52].mxu1 %v379_v24  ;;  %v9139_v24 = vld [vmem:[#allocation8 + $0xe4] ss:$16 sps:$4 sm:$0xff]  }
  0xe4   :  { %1224 = vmatprep.mubr.bf16.mxu0 %v384_v25  ;;  %1610 = vmatprep.mubr.bf16.mxu1 %v384_v25  ;;  %v9142_v25 = vld [vmem:[#allocation8 + $0xec] ss:$16 sps:$4 sm:$0xff]  }
  0xeb   :  { %1225 = vmatmul.mubr.bf16.gmra.mrb[56].mxu0 %v383_v30  ;;  %1611 = vmatmul.mubr.bf16.gmra.mrb[56].mxu1 %v383_v30  ;;  %v9137_v30 = vld [vmem:[#allocation8 + $0xe0] ss:$16 sps:$4 sm:$0xff]  }
  0xec   :  { %1234 = vmatprep.mubr.bf16.mxu0 %v388_v31  ;;  %1620 = vmatprep.mubr.bf16.mxu1 %v388_v31  ;;  %v9140_v31 = vld [vmem:[#allocation8 + $0xe8] ss:$16 sps:$4 sm:$0xff]  }
  0xf3   :  { %1235 = vmatmul.mubr.bf16.gmra.mrb[60].mxu0 %v387_v36  ;;  %1621 = vmatmul.mubr.bf16.gmra.mrb[60].mxu1 %v387_v36  ;;  %v9143_v36 = vld [vmem:[#allocation8 + $0x100] ss:$16 sps:$4 sm:$0xff]  }
  0xf4   :  { %1277 = vmatprep.mubr.bf16.mxu0 %v330_v37  ;;  %1663 = vmatprep.mubr.bf16.mxu1 %v330_v37  ;;  %v9146_v37 = vld [vmem:[#allocation8 + $0x108] ss:$16 sps:$4 sm:$0xff]  }
  0xfb   :  { %1278 = vmatmul.mubr.bf16.vlgmr.msra.gmra.mrb[0].mxu0 %v329_v42  ;;  %1664 = vmatmul.mubr.bf16.vlgmr.msra.gmra.mrb[0].mxu1 %v329_v42  ;;  %v121_v42 = vld [vmem:[#allocation3 + $0x198] sm:$0xff] }
  0xfc   :  { %1287 = vmatprep.mubr.bf16.mxu0 %v334_v43  ;;  %1673 = vmatprep.mubr.bf16.mxu1 %v334_v43  ;;  %v125_v43 = vld [vmem:[#allocation3 + $0x1b8] sm:$0xff] }
  0xfd   :  { %3063 = vmatpush1.bf16.msra.mxu0 %v9095_v44  ;;  %3449 = vmatpush1.bf16.msra.mxu1 %v9098_v45  ;;  %v9149_v44 = vld [vmem:[#allocation8 + $0x120] ss:$16 sps:$4 sm:$0xff]   ;;  %v9152_v45 = vld [vmem:[#allocation8 + $0x128] ss:$16 sps:$4 sm:$0xff]   ;;  %v354_v49 = vpack.c.bf16 %v125_v43, %v121_v42 }
  0xfe   :  { %3064 = vmatprep.subr.bf16.mxu0 %v9103_v46  ;;  %3450 = vmatprep.subr.bf16.mxu1 %v9106_v47  ;;  %v9157_v46 = vld [vmem:[#allocation8 + $0x144] ss:$16 sps:$4 sm:$0xff]   ;;  %v9160_v47 = vld [vmem:[#allocation8 + $0x14c] ss:$16 sps:$4 sm:$0xff]  }
  0xff   :  { %v177_v42 = vld [vmem:[#allocation3 + $0x358] sm:$0xff] }
 0x100   :  { %v181_v43 = vld [vmem:[#allocation3 + $0x378] sm:$0xff] }
 0x101   :  { %3065 = vmatpush1.bf16.msra.mxu0 %v9101_v52  ;;  %3451 = vmatpush1.bf16.msra.mxu1 %v9104_v53  ;;  %v9163_v52 = vld [vmem:[#allocation8 + $0x164] ss:$16 sps:$4 sm:$0xff]   ;;  %v9166_v53 = vld [vmem:[#allocation8 + $0x16c] ss:$16 sps:$4 sm:$0xff]  }
 0x102   :  { %3066 = vmatprep.subr.bf16.mxu0 %v9109_v54  ;;  %3452 = vmatprep.subr.bf16.mxu1 %v9112_v55  ;;  %v120_v54 = vld [vmem:[#allocation3 + $0x190] sm:$0xff] }
 0x103   :  { %1288 = vmatmul.mubr.bf16.gmra.mrb[4].mxu0 %v333_v56  ;;  %1674 = vmatmul.mubr.bf16.gmra.mrb[4].mxu1 %v333_v56  ;;  %v124_v55 = vld [vmem:[#allocation3 + $0x1b0] sm:$0xff]  ;;  %v129_v56 = vld [vmem:[#allocation3 + $0x1d8] sm:$0xff] }
 0x104   :  { %1297 = vmatprep.mubr.bf16.mxu0 %v338_v57  ;;  %1683 = vmatprep.mubr.bf16.mxu1 %v338_v57  ;;  %v133_v57 = vld [vmem:[#allocation3 + $0x1f8] sm:$0xff]  ;;  %v353_v62 = vpack.c.bf16 %v124_v55, %v120_v54  ;;  %v9193_v55 = vld [vmem:[#allocation8 + $0x204] ss:$16 sps:$4 sm:$0xff]  }
 0x105   :  { %3067 = vmatpush1.bf16.msra.mxu0 %v9107_v58  ;;  %3453 = vmatpush1.bf16.msra.mxu1 %v9110_v59  ;;  %v9161_v58 = vld [vmem:[#allocation8 + $0x160] ss:$16 sps:$4 sm:$0xff]   ;;  %v9164_v59 = vld [vmem:[#allocation8 + $0x168] ss:$16 sps:$4 sm:$0xff]   ;;  %v358_v63 = vpack.c.bf16 %v133_v57, %v129_v56  ;;  %v9196_v57 = vld [vmem:[#allocation8 + $0x20c] ss:$16 sps:$4 sm:$0xff]  }
 0x106   :  { %3068 = vmatprep.subr.bf16.mxu0 %v9115_v60  ;;  %3454 = vmatprep.subr.bf16.mxu1 %v9118_v61  ;;  %v9169_v60 = vld [vmem:[#allocation8 + $0x184] ss:$16 sps:$4 sm:$0xff]   ;;  %v9172_v61 = vld [vmem:[#allocation8 + $0x18c] ss:$16 sps:$4 sm:$0xff]  }
 0x109   :  { %3069 = vmatpush1.bf16.msra.mxu0 %v9113_v2  ;;  %3455 = vmatpush1.bf16.msra.mxu1 %v9116_v3  ;;  %v9175_v2 = vld [vmem:[#allocation8 + $0x1a4] ss:$16 sps:$4 sm:$0xff]   ;;  %v9178_v3 = vld [vmem:[#allocation8 + $0x1ac] ss:$16 sps:$4 sm:$0xff]  }
 0x10a   :  { %3070 = vmatprep.subr.bf16.mxu0 %v9121_v4  ;;  %3456 = vmatprep.subr.bf16.mxu1 %v9124_v5  ;;  %v128_v4 = vld [vmem:[#allocation3 + $0x1d0] sm:$0xff] }
 0x10b   :  { %1298 = vmatmul.mubr.bf16.gmra.mrb[8].mxu0 %v337_v6  ;;  %1684 = vmatmul.mubr.bf16.gmra.mrb[8].mxu1 %v337_v6  ;;  %v132_v5 = vld [vmem:[#allocation3 + $0x1f0] sm:$0xff]  ;;  %v137_v6 = vld [vmem:[#allocation3 + $0x218] sm:$0xff] }
 0x10c   :  { %1307 = vmatprep.mubr.bf16.mxu0 %v342_v7  ;;  %1693 = vmatprep.mubr.bf16.mxu1 %v342_v7  ;;  %v141_v7 = vld [vmem:[#allocation3 + $0x238] sm:$0xff]  ;;  %v357_v12 = vpack.c.bf16 %v132_v5, %v128_v4 }
 0x10d   :  { %3071 = vmatpush1.bf16.msra.mxu0 %v9119_v8  ;;  %3457 = vmatpush1.bf16.msra.mxu1 %v9122_v9  ;;  %v9173_v8 = vld [vmem:[#allocation8 + $0x1a0] ss:$16 sps:$4 sm:$0xff]   ;;  %v9176_v9 = vld [vmem:[#allocation8 + $0x1a8] ss:$16 sps:$4 sm:$0xff]   ;;  %v362_v13 = vpack.c.bf16 %v141_v7, %v137_v6 }
 0x10e   :  { %3072 = vmatprep.subr.bf16.mxu0 %v9127_v10  ;;  %3458 = vmatprep.subr.bf16.mxu1 %v9130_v11  ;;  %v9181_v10 = vld [vmem:[#allocation8 + $0x1c4] ss:$16 sps:$4 sm:$0xff]   ;;  %v9184_v11 = vld [vmem:[#allocation8 + $0x1cc] ss:$16 sps:$4 sm:$0xff]  }
 0x10f   :  { %v326_v7 = vld [vmem:[%s12566_s2] sm:$0xf] }
 0x111   :  { %3073 = vmatpush1.bf16.msra.mxu0 %v9125_v16  ;;  %3459 = vmatpush1.bf16.msra.mxu1 %v9128_v17  ;;  %v136_v16 = vld [vmem:[#allocation3 + $0x210] sm:$0xff] }
 0x112   :  { %3074 = vmatprep.subr.bf16.mxu0 %v9133_v18  ;;  %3460 = vmatprep.subr.bf16.mxu1 %v9136_v19  ;;  %v140_v17 = vld [vmem:[#allocation3 + $0x230] sm:$0xff]  ;;  %v145_v18 = vld [vmem:[#allocation3 + $0x258] sm:$0xff] }
 0x113   :  { %1308 = vmatmul.mubr.bf16.gmra.mrb[12].mxu0 %v341_v20  ;;  %1694 = vmatmul.mubr.bf16.gmra.mrb[12].mxu1 %v341_v20  ;;  %v149_v19 = vld [vmem:[#allocation3 + $0x278] sm:$0xff]  ;;  %v361_v20 = vpack.c.bf16 %v140_v17, %v136_v16 }
 0x114   :  { %1317 = vmatprep.mubr.bf16.mxu0 %v346_v21  ;;  %1703 = vmatprep.mubr.bf16.mxu1 %v346_v21  ;;  %v366_v21 = vpack.c.bf16 %v149_v19, %v145_v18 }
 0x115   :  { %3075 = vmatpush1.bf16.msra.mxu0 %v9131_v22  ;;  %3461 = vmatpush1.bf16.msra.mxu1 %v9134_v23  ;;  %v144_v22 = vld [vmem:[#allocation3 + $0x250] sm:$0xff] }
 0x116   :  { %3076 = vmatprep.subr.bf16.mxu0 %v9139_v24  ;;  %3462 = vmatprep.subr.bf16.mxu1 %v9142_v25  ;;  %v148_v23 = vld [vmem:[#allocation3 + $0x270] sm:$0xff]  ;;  %v153_v24 = vld [vmem:[#allocation3 + $0x298] sm:$0xff] }
 0x117   :  { %v157_v25 = vld [vmem:[#allocation3 + $0x2b8] sm:$0xff]  ;;  %v365_v26 = vpack.c.bf16 %v148_v23, %v144_v22 }
 0x118   :  { %v370_v27 = vpack.c.bf16 %v157_v25, %v153_v24 }
 0x119   :  { %3077 = vmatpush1.bf16.msra.mxu0 %v9137_v30  ;;  %3463 = vmatpush1.bf16.msra.mxu1 %v9140_v31  ;;  %v161_v30 = vld [vmem:[#allocation3 + $0x2d8] sm:$0xff] }
 0x11a   :  { %3078 = vmatprep.subr.bf16.mxu0 %v9145_v32  ;;  %3464 = vmatprep.subr.bf16.mxu1 %v9148_v33  ;;  %v165_v31 = vld [vmem:[#allocation3 + $0x2f8] sm:$0xff]  ;;  %v369_v32 = vpack.c.bf16 %v156_v29, %v152_v28 }
 0x11b   :  { %1318 = vmatmul.mubr.bf16.gmra.mrb[16].mxu0 %v345_v34  ;;  %1704 = vmatmul.mubr.bf16.gmra.mrb[16].mxu1 %v345_v34  ;;  %v374_v33 = vpack.c.bf16 %v165_v31, %v161_v30  ;;  %v160_v34 = vld [vmem:[#allocation3 + $0x2d0] sm:$0xff] }
 0x11c   :  { %1327 = vmatprep.mubr.bf16.mxu0 %v350_v35  ;;  %1713 = vmatprep.mubr.bf16.mxu1 %v350_v35  ;;  %v164_v35 = vld [vmem:[#allocation3 + $0x2f0] sm:$0xff] }
 0x11d   :  { %3079 = vmatpush1.bf16.msra.mxu0 %v9143_v36  ;;  %3465 = vmatpush1.bf16.msra.mxu1 %v9146_v37  ;;  %v169_v36 = vld [vmem:[#allocation3 + $0x318] sm:$0xff] }
 0x11e   :  { %3080 = vmatprep.subr.bf16.mxu0 %v9151_v38  ;;  %3466 = vmatprep.subr.bf16.mxu1 %v9154_v39  ;;  %v173_v37 = vld [vmem:[#allocation3 + $0x338] sm:$0xff]  ;;  %v373_v38 = vpack.c.bf16 %v164_v35, %v160_v34 }
 0x11f   :  { %v378_v39 = vpack.c.bf16 %v173_v37, %v169_v36 }
 0x121   :  { %3081 = vmatpush1.bf16.msra.mxu0 %v9149_v44  ;;  %3467 = vmatpush1.bf16.msra.mxu1 %v9152_v45  ;;  %v9187_v44 = vld [vmem:[#allocation8 + $0x1e4] ss:$16 sps:$4 sm:$0xff]   ;;  %v9190_v45 = vld [vmem:[#allocation8 + $0x1ec] ss:$16 sps:$4 sm:$0xff]  }
 0x122   :  { %3082 = vmatprep.subr.bf16.mxu0 %v9157_v46  ;;  %3468 = vmatprep.subr.bf16.mxu1 %v9160_v47  ;;  %v377_v46 = vpack.c.bf16 %v172_v41, %v168_v40  ;;  %v9185_v47 = vld [vmem:[#allocation8 + $0x1e0] ss:$16 sps:$4 sm:$0xff]  }
 0x123   :  { %1328 = vmatmul.mubr.bf16.gmra.mrb[20].mxu0 %v349_v48  ;;  %1714 = vmatmul.mubr.bf16.gmra.mrb[20].mxu1 %v349_v48  ;;  %v9188_v48 = vld [vmem:[#allocation8 + $0x1e8] ss:$16 sps:$4 sm:$0xff]  }
 0x124   :  { %1337 = vmatprep.mubr.bf16.mxu0 %v354_v49  ;;  %1723 = vmatprep.mubr.bf16.mxu1 %v354_v49  ;;  %v382_v49 = vpack.c.bf16 %v181_v43, %v177_v42 }
 0x125   :  { %3083 = vmatpush1.bf16.msra.mxu0 %v9155_v50  ;;  %3469 = vmatpush1.bf16.msra.mxu1 %v9158_v51  ;;  %v176_v50 = vld [vmem:[#allocation3 + $0x350] sm:$0xff] }
 0x126   :  { %3084 = vmatprep.subr.bf16.mxu0 %v9163_v52  ;;  %3470 = vmatprep.subr.bf16.mxu1 %v9166_v53  ;;  %v180_v51 = vld [vmem:[#allocation3 + $0x370] sm:$0xff]  ;;  %v185_v52 = vld [vmem:[#allocation3 + $0x398] sm:$0xff] }
 0x127   :  { %v189_v53 = vld [vmem:[#allocation3 + $0x3b8] sm:$0xff]  ;;  %v381_v54 = vpack.c.bf16 %v180_v51, %v176_v50 }
 0x128   :  { %v386_v56 = vpack.c.bf16 %v189_v53, %v185_v52 }
 0x129   :  { %3085 = vmatpush1.bf16.msra.mxu0 %v9161_v58  ;;  %3471 = vmatpush1.bf16.msra.mxu1 %v9164_v59  ;;  %v184_v58 = vld [vmem:[#allocation3 + $0x390] sm:$0xff] }
 0x12a   :  { %3086 = vmatprep.subr.bf16.mxu0 %v9169_v60  ;;  %3472 = vmatprep.subr.bf16.mxu1 %v9172_v61  ;;  %v188_v59 = vld [vmem:[#allocation3 + $0x3b0] sm:$0xff]  ;;  %v193_v60 = vld [vmem:[#allocation3 + $0x3d8] sm:$0xff] }
 0x12b   :  { %1338 = vmatmul.mubr.bf16.gmra.mrb[24].mxu0 %v353_v62  ;;  %1724 = vmatmul.mubr.bf16.gmra.mrb[24].mxu1 %v353_v62  ;;  %v197_v61 = vld [vmem:[#allocation3 + $0x3f8] sm:$0xff]  ;;  %v385_v62 = vpack.c.bf16 %v188_v59, %v184_v58 }
 0x12c   :  { %1347 = vmatprep.mubr.bf16.mxu0 %v358_v63  ;;  %1733 = vmatprep.mubr.bf16.mxu1 %v358_v63  ;;  %v390_v63 = vpack.c.bf16 %v197_v61, %v193_v60  ;;  %v9194_v61 = vld [vmem:[#allocation8 + $0x208] ss:$16 sps:$4 sm:$0xff]  }
 0x12d   :  { %3087 = vmatpush1.bf16.msra.mxu0 %v9167_v0  ;;  %3473 = vmatpush1.bf16.msra.mxu1 %v9170_v1  ;;  %v192_v0 = vld [vmem:[#allocation3 + $0x3d0] sm:$0xff] }
 0x12e   :  { %3088 = vmatprep.subr.bf16.mxu0 %v9175_v2  ;;  %3474 = vmatprep.subr.bf16.mxu1 %v9178_v3  ;;  %v196_v1 = vld [vmem:[#allocation3 + $0x3f0] sm:$0xff]  ;;  %v12572_v3 = vlaneseq }
 0x12f   :  { %v389_v2 = vpack.c.bf16 %v196_v1, %v192_v0  ;;  %v9199_v1 = vld [vmem:[#allocation8 + $0x224] ss:$16 sps:$4 sm:$0xff]  }
 0x130   :  { %v9478_v4 = vshrl.u32 %v12572_v3, 7 }
 0x131   :  { %3089 = vmatpush1.bf16.msra.mxu0 %v9173_v8  ;;  %3475 = vmatpush1.bf16.msra.mxu1 %v9176_v9 }
 0x132   :  { %3090 = vmatprep.subr.bf16.mxu0 %v9181_v10  ;;  %3476 = vmatprep.subr.bf16.mxu1 %v9184_v11  ;;  %12615 = vst [vmem:[#allocation13_spill] sm:$0xff] %v9478_v4  ;;  %v9481_v5 = vsub.s32 0, %v9478_v4  ;;  %v9484_v6 = vsub.s32 2, %v9478_v4  ;;  %v9490_v8 = vsub.s32 1, %v9478_v4  ;;  %v9493_v9 = vsub.s32 3, %v9478_v4 }
 0x133   :  { %1348 = vmatmul.mubr.bf16.gmra.mrb[28].mxu0 %v357_v12  ;;  %1734 = vmatmul.mubr.bf16.gmra.mrb[28].mxu1 %v357_v12 }
 0x134   :  { %1357 = vmatprep.mubr.bf16.mxu0 %v362_v13  ;;  %1743 = vmatprep.mubr.bf16.mxu1 %v362_v13  ;;  %12616 = vst [vmem:[#allocation14_spill] sm:$0xff] %v9481_v5  ;;  %12617 = vst [vmem:[#allocation15_spill] sm:$0xff] %v9484_v6  ;;  %v9496_v10 = vrot.slane %v326_v7, %v9481_v5  ;;  %v9499_v11 = vrot.slane %v326_v7, %v9484_v6  ;;  %v9268_v6 = vld [vmem:[#allocation8 + $0x38c] ss:$16 sps:$4 sm:$0xff]  }
 0x135   :  { %3091 = vmatpush1.bf16.msra.mxu0 %v9179_v14  ;;  %3477 = vmatpush1.bf16.msra.mxu1 %v9182_v15  ;;  %12618 = vst [vmem:[#allocation16_spill] sm:$0xff] %v9490_v8  ;;  %12619 = vst [vmem:[#allocation17_spill] sm:$0xff] %v9493_v9  ;;  %v9502_v12 = vrot.slane %v326_v7, %v9490_v8  ;;  %v9505_v15 = vrot.slane %v326_v7, %v9493_v9 }
 0x136   :  { %3092 = vmatprep.subr.bf16.mxu0 %v9187_v44  ;;  %3478 = vmatprep.subr.bf16.mxu1 %v9190_v45 }
 0x139   :  { %3093 = vmatpush1.bf16.msra.mxu0 %v9185_v47  ;;  %3479 = vmatpush1.bf16.msra.mxu1 %v9188_v48 }
 0x13a   :  { %3255 = vmatprep.subr.bf16.mxu0 %v9193_v55  ;;  %3641 = vmatprep.subr.bf16.mxu1 %v9196_v57  ;;  %v9191_v55 = vld [vmem:[#allocation8 + $0x200] ss:$16 sps:$4 sm:$0xff]  }
 0x13b   :  { %1358 = vmatmul.mubr.bf16.gmra.mrb[32].mxu0 %v361_v20  ;;  %1744 = vmatmul.mubr.bf16.gmra.mrb[32].mxu1 %v361_v20 }
 0x13c   :  { %1367 = vmatprep.mubr.bf16.mxu0 %v366_v21  ;;  %1753 = vmatprep.mubr.bf16.mxu1 %v366_v21 }
 0x143   :  { %1368 = vmatmul.mubr.bf16.gmra.mrb[36].mxu0 %v365_v26  ;;  %1754 = vmatmul.mubr.bf16.gmra.mrb[36].mxu1 %v365_v26 }
 0x144   :  { %1377 = vmatprep.mubr.bf16.mxu0 %v370_v27  ;;  %1763 = vmatprep.mubr.bf16.mxu1 %v370_v27 }
 0x14b   :  { %1378 = vmatmul.mubr.bf16.gmra.mrb[40].mxu0 %v369_v32  ;;  %1764 = vmatmul.mubr.bf16.gmra.mrb[40].mxu1 %v369_v32 }
 0x14c   :  { %1387 = vmatprep.mubr.bf16.mxu0 %v374_v33  ;;  %1773 = vmatprep.mubr.bf16.mxu1 %v374_v33 }
 0x153   :  { %1388 = vmatmul.mubr.bf16.gmra.mrb[44].mxu0 %v373_v38  ;;  %1774 = vmatmul.mubr.bf16.gmra.mrb[44].mxu1 %v373_v38 }
 0x154   :  { %1397 = vmatprep.mubr.bf16.mxu0 %v378_v39  ;;  %1783 = vmatprep.mubr.bf16.mxu1 %v378_v39 }
 0x15b   :  { %1398 = vmatmul.mubr.bf16.gmra.mrb[48].mxu0 %v377_v46  ;;  %1784 = vmatmul.mubr.bf16.gmra.mrb[48].mxu1 %v377_v46 }
 0x15c   :  { %1407 = vmatprep.mubr.bf16.mxu0 %v382_v49  ;;  %1793 = vmatprep.mubr.bf16.mxu1 %v382_v49 }
 0x163   :  { %1408 = vmatmul.mubr.bf16.gmra.mrb[52].mxu0 %v381_v54  ;;  %1794 = vmatmul.mubr.bf16.gmra.mrb[52].mxu1 %v381_v54 }
 0x164   :  { %1417 = vmatprep.mubr.bf16.mxu0 %v386_v56  ;;  %1803 = vmatprep.mubr.bf16.mxu1 %v386_v56 }
 0x16b   :  { %1418 = vmatmul.mubr.bf16.gmra.mrb[56].mxu0 %v385_v62  ;;  %1804 = vmatmul.mubr.bf16.gmra.mrb[56].mxu1 %v385_v62 }
 0x16c   :  { %1427 = vmatprep.mubr.bf16.mxu0 %v390_v63  ;;  %1813 = vmatprep.mubr.bf16.mxu1 %v390_v63 }
 0x173   :  { %1428 = vmatmul.mubr.bf16.gmra.mrb[60].mxu0 %v389_v2  ;;  %1814 = vmatmul.mubr.bf16.gmra.mrb[60].mxu1 %v389_v2 }
 0x1ce   :  { %v1279_v13 = vpop.f32.mrb[0].mxu0  ;;  %v1665_v14 = vpop.f32.mrb[0].mxu1 }
 0x1cf   :  { %v8379_v16 = vadd.f32 %v1279_v13, %v9496_v10  ;;  %v8443_v17 = vadd.f32 %v1665_v14, %v9499_v11  ;;  %v1281_v18 = vpop.f32.mrb[1].mxu0  ;;  %v1667_v19 = vpop.f32.mrb[1].mxu1  ;;  %v9202_v13 = vld [vmem:[#allocation8 + $0x22c] ss:$16 sps:$4 sm:$0xff]  }
 0x1d0   :  { %v8380_v20 = vadd.f32 %v1281_v18, %v9502_v12  ;;  %v1283_v21 = vpop.f32.mrb[2].mxu0  ;;  %v1669_v22 = vpop.f32.mrb[2].mxu1  ;;  %v8444_v24 = vadd.f32 %v1667_v19, %v9505_v15 }
 0x1d1   :  { %vm1824_vm0 = vcmp.ge.f32.partialorder %v8379_v16, 0.0  ;;  %v1952_v23 = vmul.f32 0.2, %v8379_v16  ;;  %vm1826_vm1 = vcmp.ge.f32.partialorder %v8443_v17, 0.0  ;;  %v1954_v25 = vmul.f32 0.2, %v8443_v17 }
 0x1d2   :  { %v8381_v26 = vadd.f32 %v1283_v21, %v9496_v10  ;;  %v8445_v27 = vadd.f32 %v1669_v22, %v9499_v11  ;;  %v1285_v28 = vpop.f32.mrb[3].mxu0  ;;  %v1671_v29 = vpop.f32.mrb[3].mxu1  ;;  %vm1825_vm2 = vcmp.ge.f32.partialorder %v8380_v20, 0.0  ;;  %v1953_v30 = vmul.f32 0.2, %v8380_v20 }
 0x1d3   :  { %v8382_v31 = vadd.f32 %v1285_v28, %v9502_v12  ;;  %v8446_v32 = vadd.f32 %v1671_v29, %v9505_v15  ;;  %v2080_v35 = vsel %vm1824_vm0, %v8379_v16, %v1952_v23  ;;  %v2082_v38 = vsel %vm1826_vm1, %v8443_v17, %v1954_v25 }
 0x1d4   :  { %vm1828_vm3 = vcmp.ge.f32.partialorder %v8381_v26, 0.0  ;;  %v1956_v33 = vmul.f32 0.2, %v8381_v26  ;;  %vm1830_vm4 = vcmp.ge.f32.partialorder %v8445_v27, 0.0  ;;  %v1958_v34 = vmul.f32 0.2, %v8445_v27 }
 0x1d5   :  { %vm1829_vm5 = vcmp.ge.f32.partialorder %v8382_v31, 0.0  ;;  %v1957_v36 = vmul.f32 0.2, %v8382_v31  ;;  %v1959_v37 = vmul.f32 0.2, %v8446_v32  ;;  %vm1831_vm6 = vcmp.ge.f32.partialorder %v8446_v32, 0.0 }
 0x1d6   :  { %v2084_v39 = vsel %vm1828_vm3, %v8381_v26, %v1956_v33  ;;  %v2086_v40 = vsel %vm1830_vm4, %v8445_v27, %v1958_v34  ;;  %v1289_v41 = vpop.f32.mrb[4].mxu0  ;;  %v9517_v42 = vpop.f32.mrb[4].mxu1  ;;  %v1955_v43 = vmul.f32 0.2, %v8444_v24  ;;  %vm1827_vm7 = vcmp.ge.f32.partialorder %v8444_v24, 0.0 }
 0x1d7   :  { %v2337_v44 = vpack.c.bf16 %v2084_v39, %v2080_v35  ;;  %v9519_v45 = vpack.c.bf16 %v2086_v40, %v2082_v38  ;;  %v8383_v46 = vadd.f32 %v1289_v41, %v9496_v10  ;;  %v1291_v47 = vpop.f32.mrb[5].mxu0  ;;  %v9522_v48 = vpop.f32.mrb[5].mxu1  ;;  %v2085_v52 = vsel %vm1829_vm5, %v8382_v31, %v1957_v36  ;;  %v9197_v26 = vld [vmem:[#allocation8 + $0x220] ss:$16 sps:$4 sm:$0xff]   ;;  %v9200_v27 = vld [vmem:[#allocation8 + $0x228] ss:$16 sps:$4 sm:$0xff]  }
 0x1d8   :  { %v8384_v49 = vadd.f32 %v1291_v47, %v9502_v12  ;;  %v1293_v50 = vpop.f32.mrb[6].mxu0  ;;  %v9525_v51 = vpop.f32.mrb[6].mxu1  ;;  %v2087_v53 = vsel %vm1831_vm6, %v8446_v32, %v1959_v37  ;;  %v2081_v54 = vsel %vm1825_vm2, %v8380_v20, %v1953_v30  ;;  %v2083_v62 = vsel %vm1827_vm7, %v8444_v24, %v1955_v43  ;;  %v9205_v31 = vld [vmem:[#allocation8 + $0x244] ss:$16 sps:$4 sm:$0xff]   ;;  %v9208_v32 = vld [vmem:[#allocation8 + $0x24c] ss:$16 sps:$4 sm:$0xff]  }
 0x1d9   :  { %12620 = vst [vmem:[#allocation18_spill] sm:$0xff] %v9519_v45  ;;  %v1960_v56 = vmul.f32 0.2, %v8383_v46  ;;  %v8385_v57 = vadd.f32 %v1293_v50, %v9496_v10  ;;  %v1295_v58 = vpop.f32.mrb[7].mxu0  ;;  %v9530_v59 = vpop.f32.mrb[7].mxu1  ;;  %v2338_v60 = vpack.c.bf16 %v2085_v52, %v2081_v54  ;;  %vm1832_vm8 = vcmp.ge.f32.partialorder %v8383_v46, 0.0 }
 0x1da   :  { %v1961_v63 = vmul.f32 0.2, %v8384_v49  ;;  %v8386_v0 = vadd.f32 %v1295_v58, %v9502_v12  ;;  %v9533_v2 = vpack.c.bf16 %v2087_v53, %v2083_v62  ;;  %vm1833_vm9 = vcmp.ge.f32.partialorder %v8384_v49, 0.0  ;;  %v9203_v34 = vld [vmem:[#allocation8 + $0x240] ss:$16 sps:$4 sm:$0xff]  }
 0x1db   :  { %vm1836_vm10 = vcmp.ge.f32.partialorder %v8385_v57, 0.0  ;;  %v1964_v7 = vmul.f32 0.2, %v8385_v57  ;;  %3094 = vmatprep.mubr.bf16.mxu0 %v2338_v60  ;;  %3480 = vmatprep.mubr.bf16.mxu1 %v2338_v60  ;;  %v2088_v18 = vsel %vm1832_vm8, %v8383_v46, %v1960_v56  ;;  %v9206_v39 = vld [vmem:[#allocation8 + $0x248] ss:$16 sps:$4 sm:$0xff]  }
 0x1dc   :  { %12621 = vst [vmem:[#allocation19_spill] sm:$0xff] %v9533_v2  ;;  %vm1837_vm11 = vcmp.ge.f32.partialorder %v8386_v0, 0.0  ;;  %v1965_v14 = vmul.f32 0.2, %v8386_v0  ;;  %3095 = vmatmul.mubr.bf16.vlgmr.msra.gmra.mrb[64].mxu0 %v2337_v44  ;;  %3481 = vmatmul.mubr.bf16.vlgmr.msra.gmra.mrb[64].mxu1 %v2337_v44  ;;  %v2089_v23 = vsel %vm1833_vm9, %v8384_v49, %v1961_v63  ;;  %v9211_v44 = vld [vmem:[#allocation8 + $0x264] ss:$16 sps:$4 sm:$0xff]  }
 0x1dd   :  { %3256 = vmatpush1.bf16.msra.mxu0 %v9191_v55  ;;  %3642 = vmatpush1.bf16.msra.mxu1 %v9194_v61  ;;  %v2092_v19 = vsel %vm1836_vm10, %v8385_v57, %v1964_v7  ;;  %v9214_v47 = vld [vmem:[#allocation8 + $0x26c] ss:$16 sps:$4 sm:$0xff]   ;;  %v9209_v57 = vld [vmem:[#allocation8 + $0x260] ss:$16 sps:$4 sm:$0xff]   ;;  %v9212_v63 = vld [vmem:[#allocation8 + $0x268] ss:$16 sps:$4 sm:$0xff]  }
 0x1de   :  { %v1299_v16 = vpop.f32.mrb[8].mxu0  ;;  %v9535_v17 = vpop.f32.mrb[8].mxu1  ;;  %v2093_v24 = vsel %vm1837_vm11, %v8386_v0, %v1965_v14  ;;  %v2341_v25 = vpack.c.bf16 %v2092_v19, %v2088_v18  ;;  %3257 = vmatprep.subr.bf16.mxu0 %v9199_v1  ;;  %3643 = vmatprep.subr.bf16.mxu1 %v9202_v13  ;;  %v9217_v0 = vld [vmem:[#allocation8 + $0x284] ss:$16 sps:$4 sm:$0xff]   ;;  %v9215_v13 = vld [vmem:[#allocation8 + $0x280] ss:$16 sps:$4 sm:$0xff]  }
 0x1df   :  { %v8387_v20 = vadd.f32 %v1299_v16, %v9496_v10  ;;  %v1301_v21 = vpop.f32.mrb[9].mxu0  ;;  %v9539_v22 = vpop.f32.mrb[9].mxu1  ;;  %v2342_v30 = vpack.c.bf16 %v2093_v24, %v2089_v23  ;;  %v9218_v14 = vld [vmem:[#allocation8 + $0x288] ss:$16 sps:$4 sm:$0xff]   ;;  %v9220_v23 = vld [vmem:[#allocation8 + $0x28c] ss:$16 sps:$4 sm:$0xff]  }
 0x1e0   :  { %v1303_v28 = vpop.f32.mrb[10].mxu0  ;;  %v9542_v29 = vpop.f32.mrb[10].mxu1  ;;  %v8388_v33 = vadd.f32 %v1301_v21, %v9502_v12  ;;  %v9277_v2 = vld [vmem:[#allocation8 + $0x3c4] ss:$16 sps:$4 sm:$0xff]  }
 0x1e1   :  { %3104 = vmatprep.mubr.bf16.mxu0 %v2342_v30  ;;  %3490 = vmatprep.mubr.bf16.mxu1 %v2342_v30  ;;  %v1968_v35 = vmul.f32 0.2, %v8387_v20  ;;  %v8389_v36 = vadd.f32 %v1303_v28, %v9496_v10  ;;  %v1305_v37 = vpop.f32.mrb[11].mxu0  ;;  %v9546_v38 = vpop.f32.mrb[11].mxu1  ;;  %vm1840_vm12 = vcmp.ge.f32.partialorder %v8387_v20, 0.0 }
 0x1e2   :  { %3258 = vmatpush1.bf16.msra.mxu0 %v9197_v26  ;;  %3644 = vmatpush1.bf16.msra.mxu1 %v9200_v27  ;;  %v8390_v40 = vadd.f32 %v1305_v37, %v9502_v12  ;;  %v1969_v49 = vmul.f32 0.2, %v8388_v33  ;;  %vm1841_vm15 = vcmp.ge.f32.partialorder %v8388_v33, 0.0  ;;  %v9223_v27 = vld [vmem:[#allocation8 + $0x2a4] ss:$16 sps:$4 sm:$0xff]  }
 0x1e3   :  { %3259 = vmatprep.subr.bf16.mxu0 %v9205_v31  ;;  %3645 = vmatprep.subr.bf16.mxu1 %v9208_v32  ;;  %vm1844_vm13 = vcmp.ge.f32.partialorder %v8389_v36, 0.0  ;;  %v1972_v46 = vmul.f32 0.2, %v8389_v36  ;;  %v2096_v55 = vsel %vm1840_vm12, %v8387_v20, %v1968_v35  ;;  %v9226_v30 = vld [vmem:[#allocation8 + $0x2ac] ss:$16 sps:$4 sm:$0xff]  }
 0x1e4   :  { %3105 = vmatmul.mubr.bf16.gmra.mrb[68].mxu0 %v2341_v25  ;;  %3491 = vmatmul.mubr.bf16.gmra.mrb[68].mxu1 %v2341_v25  ;;  %vm1845_vm14 = vcmp.ge.f32.partialorder %v8390_v40, 0.0  ;;  %v1973_v50 = vmul.f32 0.2, %v8390_v40  ;;  %v2097_v7 = vsel %vm1841_vm15, %v8388_v33, %v1969_v49  ;;  %v9229_v49 = vld [vmem:[#allocation8 + $0x2c4] ss:$16 sps:$4 sm:$0xff]  }
 0x1e5   :  { %v2100_v56 = vsel %vm1844_vm13, %v8389_v36, %v1972_v46 }
 0x1e6   :  { %v1309_v41 = vpop.f32.mrb[12].mxu0  ;;  %v9549_v43 = vpop.f32.mrb[12].mxu1  ;;  %3260 = vmatpush1.bf16.msra.mxu0 %v9203_v34  ;;  %3646 = vmatpush1.bf16.msra.mxu1 %v9206_v39  ;;  %v2101_v61 = vsel %vm1845_vm14, %v8390_v40, %v1973_v50  ;;  %v2345_v62 = vpack.c.bf16 %v2100_v56, %v2096_v55  ;;  %v9221_v39 = vld [vmem:[#allocation8 + $0x2a0] ss:$16 sps:$4 sm:$0xff]  }
 0x1e7   :  { %v8391_v52 = vadd.f32 %v1309_v41, %v9496_v10  ;;  %v1311_v53 = vpop.f32.mrb[13].mxu0  ;;  %v9552_v54 = vpop.f32.mrb[13].mxu1  ;;  %3261 = vmatprep.subr.bf16.mxu0 %v9211_v44  ;;  %3647 = vmatprep.subr.bf16.mxu1 %v9214_v47  ;;  %v2346_v21 = vpack.c.bf16 %v2101_v61, %v2097_v7  ;;  %v9224_v47 = vld [vmem:[#allocation8 + $0x2a8] ss:$16 sps:$4 sm:$0xff]   ;;  %v9227_v55 = vld [vmem:[#allocation8 + $0x2c0] ss:$16 sps:$4 sm:$0xff]  }
 0x1e8   :  { %v1313_v58 = vpop.f32.mrb[14].mxu0  ;;  %v9555_v60 = vpop.f32.mrb[14].mxu1  ;;  %v8392_v1 = vadd.f32 %v1311_v53, %v9502_v12 }
 0x1e9   :  { %v1976_v16 = vmul.f32 0.2, %v8391_v52  ;;  %v8393_v18 = vadd.f32 %v1313_v58, %v9496_v10  ;;  %v1315_v19 = vpop.f32.mrb[15].mxu0  ;;  %v9560_v20 = vpop.f32.mrb[15].mxu1  ;;  %vm1848_vm0 = vcmp.ge.f32.partialorder %v8391_v52, 0.0  ;;  %3114 = vmatprep.mubr.bf16.mxu0 %v2346_v21  ;;  %3500 = vmatprep.mubr.bf16.mxu1 %v2346_v21 }
 0x1ea   :  { %3262 = vmatpush1.bf16.msra.mxu0 %v9209_v57  ;;  %v8394_v24 = vadd.f32 %v1315_v19, %v9502_v12  ;;  %3648 = vmatpush1.bf16.msra.mxu1 %v9212_v63  ;;  %v1977_v31 = vmul.f32 0.2, %v8392_v1  ;;  %vm1849_vm3 = vcmp.ge.f32.partialorder %v8392_v1, 0.0  ;;  %v9232_v63 = vld [vmem:[#allocation8 + $0x2cc] ss:$16 sps:$4 sm:$0xff]  }
 0x1eb   :  { %3263 = vmatprep.subr.bf16.mxu0 %v9217_v0  ;;  %vm1852_vm1 = vcmp.ge.f32.partialorder %v8393_v18, 0.0  ;;  %v1980_v28 = vmul.f32 0.2, %v8393_v18  ;;  %v2104_v36 = vsel %vm1848_vm0, %v8391_v52, %v1976_v16  ;;  %3649 = vmatprep.subr.bf16.mxu1 %v9220_v23  ;;  %v9230_v52 = vld [vmem:[#allocation8 + $0x2c8] ss:$16 sps:$4 sm:$0xff]  }
 0x1ec   :  { %vm1853_vm2 = vcmp.ge.f32.partialorder %v8394_v24, 0.0  ;;  %v1981_v32 = vmul.f32 0.2, %v8394_v24  ;;  %3115 = vmatmul.mubr.bf16.gmra.mrb[72].mxu0 %v2345_v62  ;;  %3501 = vmatmul.mubr.bf16.gmra.mrb[72].mxu1 %v2345_v62  ;;  %v2105_v53 = vsel %vm1849_vm3, %v8392_v1, %v1977_v31  ;;  %v9235_v1 = vld [vmem:[#allocation8 + $0x2e4] ss:$16 sps:$4 sm:$0xff]  }
 0x1ed   :  { %v2108_v37 = vsel %vm1852_vm1, %v8393_v18, %v1980_v28  ;;  %v9238_v16 = vld [vmem:[#allocation8 + $0x2ec] ss:$16 sps:$4 sm:$0xff]   ;;  %v9233_v28 = vld [vmem:[#allocation8 + $0x2e0] ss:$16 sps:$4 sm:$0xff]  }
 0x1ee   :  { %v1319_v25 = vpop.f32.mrb[16].mxu0  ;;  %v9563_v26 = vpop.f32.mrb[16].mxu1  ;;  %3264 = vmatpush1.bf16.msra.mxu0 %v9215_v13  ;;  %v2109_v44 = vsel %vm1853_vm2, %v8394_v24, %v1981_v32  ;;  %v2349_v46 = vpack.c.bf16 %v2108_v37, %v2104_v36  ;;  %3650 = vmatpush1.bf16.msra.mxu1 %v9218_v14  ;;  %v9236_v36 = vld [vmem:[#allocation8 + $0x2e8] ss:$16 sps:$4 sm:$0xff]   ;;  %v9241_v37 = vld [vmem:[#allocation8 + $0x304] ss:$16 sps:$4 sm:$0xff]  }
 0x1ef   :  { %v8395_v33 = vadd.f32 %v1319_v25, %v9496_v10  ;;  %v1321_v34 = vpop.f32.mrb[17].mxu0  ;;  %v9566_v35 = vpop.f32.mrb[17].mxu1  ;;  %3265 = vmatprep.subr.bf16.mxu0 %v9223_v27  ;;  %3651 = vmatprep.subr.bf16.mxu1 %v9226_v30  ;;  %v2350_v62 = vpack.c.bf16 %v2109_v44, %v2105_v53  ;;  %v9239_v44 = vld [vmem:[#allocation8 + $0x300] ss:$16 sps:$4 sm:$0xff]  }
 0x1f0   :  { %v1323_v40 = vpop.f32.mrb[18].mxu0  ;;  %v9569_v41 = vpop.f32.mrb[18].mxu1  ;;  %v8396_v50 = vadd.f32 %v1321_v34, %v9502_v12 }
 0x1f1   :  { %v1984_v56 = vmul.f32 0.2, %v8395_v33  ;;  %v8397_v57 = vadd.f32 %v1323_v40, %v9496_v10  ;;  %v1325_v58 = vpop.f32.mrb[19].mxu0  ;;  %v9574_v61 = vpop.f32.mrb[19].mxu1  ;;  %vm1856_vm4 = vcmp.ge.f32.partialorder %v8395_v33, 0.0  ;;  %3124 = vmatprep.mubr.bf16.mxu0 %v2350_v62  ;;  %3510 = vmatprep.mubr.bf16.mxu1 %v2350_v62  ;;  %v9595_v62 = vadd.f32 %v9517_v42, %v9499_v11 }
 0x1f2   :  { %3266 = vmatpush1.bf16.msra.mxu0 %v9221_v39  ;;  %v8398_v0 = vadd.f32 %v1325_v58, %v9502_v12  ;;  %3652 = vmatpush1.bf16.msra.mxu1 %v9224_v47  ;;  %v1985_v18 = vmul.f32 0.2, %v8396_v50  ;;  %vm1857_vm7 = vcmp.ge.f32.partialorder %v8396_v50, 0.0 }
 0x1f3   :  { %3267 = vmatprep.subr.bf16.mxu0 %v9229_v49  ;;  %vm1860_vm5 = vcmp.ge.f32.partialorder %v8397_v57, 0.0  ;;  %v1988_v14 = vmul.f32 0.2, %v8397_v57  ;;  %v2112_v25 = vsel %vm1856_vm4, %v8395_v33, %v1984_v56  ;;  %3653 = vmatprep.subr.bf16.mxu1 %v9232_v63  ;;  %v9242_v33 = vld [vmem:[#allocation8 + $0x308] ss:$16 sps:$4 sm:$0xff]   ;;  %v9599_v63 = vadd.f32 %v9522_v48, %v9505_v15 }
 0x1f4   :  { %vm1861_vm6 = vcmp.ge.f32.partialorder %v8398_v0, 0.0  ;;  %v1989_v19 = vmul.f32 0.2, %v8398_v0  ;;  %3125 = vmatmul.mubr.bf16.gmra.mrb[76].mxu0 %v2349_v46  ;;  %3511 = vmatmul.mubr.bf16.gmra.mrb[76].mxu1 %v2349_v46  ;;  %v2113_v40 = vsel %vm1857_vm7, %v8396_v50, %v1985_v18  ;;  %v9244_v56 = vld [vmem:[#allocation8 + $0x30c] ss:$16 sps:$4 sm:$0xff]   ;;  %vm1834_vm15 = vcmp.ge.f32.partialorder %v9595_v62, 0.0 }
 0x1f5   :  { %v2116_v27 = vsel %vm1860_vm5, %v8397_v57, %v1988_v14  ;;  %v9247_v50 = vld [vmem:[#allocation8 + $0x324] ss:$16 sps:$4 sm:$0xff]   ;;  %vm1835_vm12 = vcmp.ge.f32.partialorder %v9599_v63, 0.0 }
 0x1f6   :  { %v1329_v7 = vpop.f32.mrb[20].mxu0  ;;  %v9577_v13 = vpop.f32.mrb[20].mxu1  ;;  %3268 = vmatpush1.bf16.msra.mxu0 %v9227_v55  ;;  %v2117_v32 = vsel %vm1861_vm6, %v8398_v0, %v1989_v19  ;;  %v2353_v34 = vpack.c.bf16 %v2116_v27, %v2112_v25  ;;  %3654 = vmatpush1.bf16.msra.mxu1 %v9230_v52 }
 0x1f7   :  { %v8399_v21 = vadd.f32 %v1329_v7, %v9496_v10  ;;  %v1331_v23 = vpop.f32.mrb[21].mxu0  ;;  %v9580_v24 = vpop.f32.mrb[21].mxu1  ;;  %3269 = vmatprep.subr.bf16.mxu0 %v9235_v1  ;;  %3655 = vmatprep.subr.bf16.mxu1 %v9238_v16  ;;  %v2354_v55 = vpack.c.bf16 %v2117_v32, %v2113_v40  ;;  %v9250_v7 = vld [vmem:[#allocation8 + $0x32c] ss:$16 sps:$4 sm:$0xff]   ;;  %v9603_v1 = vadd.f32 %v9525_v51, %v9499_v11  ;;  %v9245_v51 = vld [vmem:[#allocation8 + $0x320] ss:$16 sps:$4 sm:$0xff]  }
 0x1f8   :  { %v1333_v30 = vpop.f32.mrb[22].mxu0  ;;  %v9583_v31 = vpop.f32.mrb[22].mxu1  ;;  %v8400_v39 = vadd.f32 %v1331_v23, %v9502_v12  ;;  %v9248_v32 = vld [vmem:[#allocation8 + $0x328] ss:$16 sps:$4 sm:$0xff]   ;;  %v9621_v40 = vadd.f32 %v9530_v59, %v9505_v15  ;;  %v9634_v59 = vadd.f32 %v9535_v17, %v9499_v11  ;;  %v9650_v17 = vadd.f32 %v9546_v38, %v9505_v15 }
 0x1f9   :  { %v1992_v46 = vmul.f32 0.2, %v8399_v21  ;;  %v8401_v47 = vadd.f32 %v1333_v30, %v9496_v10  ;;  %v1335_v49 = vpop.f32.mrb[23].mxu0  ;;  %v9588_v53 = vpop.f32.mrb[23].mxu1  ;;  %vm1864_vm8 = vcmp.ge.f32.partialorder %v8399_v21, 0.0  ;;  %3134 = vmatprep.mubr.bf16.mxu0 %v2354_v55  ;;  %3520 = vmatprep.mubr.bf16.mxu1 %v2354_v55 }
 0x1fa   :  { %3270 = vmatpush1.bf16.msra.mxu0 %v9233_v28  ;;  %v8402_v52 = vadd.f32 %v1335_v49, %v9502_v12  ;;  %3656 = vmatpush1.bf16.msra.mxu1 %v9236_v36  ;;  %v1993_v14 = vmul.f32 0.2, %v8400_v39  ;;  %vm1865_vm11 = vcmp.ge.f32.partialorder %v8400_v39, 0.0  ;;  %v9615_v36 = vmul.f32 0.2, %v9595_v62 }
 0x1fb   :  { %3271 = vmatprep.subr.bf16.mxu0 %v9241_v37  ;;  %vm1868_vm9 = vcmp.ge.f32.partialorder %v8401_v47, 0.0  ;;  %v1996_v0 = vmul.f32 0.2, %v8401_v47  ;;  %v2120_v19 = vsel %vm1864_vm8, %v8399_v21, %v1992_v46  ;;  %3657 = vmatprep.subr.bf16.mxu1 %v9244_v56  ;;  %v9251_v21 = vld [vmem:[#allocation8 + $0x340] ss:$16 sps:$4 sm:$0xff]   ;;  %vm1839_vm4 = vcmp.ge.f32.partialorder %v9621_v40, 0.0 }
 0x1fc   :  { %vm1869_vm10 = vcmp.ge.f32.partialorder %v8402_v52, 0.0  ;;  %v1997_v16 = vmul.f32 0.2, %v8402_v52  ;;  %3135 = vmatmul.mubr.bf16.gmra.mrb[80].mxu0 %v2353_v34  ;;  %3521 = vmatmul.mubr.bf16.gmra.mrb[80].mxu1 %v2353_v34  ;;  %v9253_v34 = vld [vmem:[#allocation8 + $0x344] ss:$16 sps:$4 sm:$0xff]  }
 0x1fd   :  { %v2124_v23 = vsel %vm1868_vm9, %v8401_v47, %v1996_v0  ;;  %v1963_v37 = vmul.f32 0.2, %v9599_v63  ;;  %v9254_v46 = vld [vmem:[#allocation8 + $0x348] ss:$16 sps:$4 sm:$0xff]   ;;  %v9256_v47 = vld [vmem:[#allocation8 + $0x34c] ss:$16 sps:$4 sm:$0xff]  }
 0x1fe   :  { %v1339_v57 = vpop.f32.mrb[24].mxu0  ;;  %v9591_v58 = vpop.f32.mrb[24].mxu1  ;;  %3272 = vmatpush1.bf16.msra.mxu0 %v9239_v44  ;;  %v2125_v28 = vsel %vm1869_vm10, %v8402_v52, %v1997_v16  ;;  %v2357_v30 = vpack.c.bf16 %v2124_v23, %v2120_v19  ;;  %3658 = vmatpush1.bf16.msra.mxu1 %v9242_v33  ;;  %v2121_v33 = vsel %vm1865_vm11, %v8400_v39, %v1993_v14  ;;  %v9626_v49 = vmul.f32 0.2, %v9603_v1  ;;  %v9259_v16 = vld [vmem:[#allocation8 + $0x364] ss:$16 sps:$4 sm:$0xff]  }
 0x1ff   :  { %v9606_v42 = vadd.f32 %v1339_v57, %v9496_v10  ;;  %v1341_v48 = vpop.f32.mrb[25].mxu0  ;;  %v9608_v18 = vpop.f32.mrb[25].mxu1  ;;  %3273 = vmatprep.subr.bf16.mxu0 %v9247_v50  ;;  %3659 = vmatprep.subr.bf16.mxu1 %v9250_v7  ;;  %v2358_v50 = vpack.c.bf16 %v2125_v28, %v2121_v33  ;;  %v9638_v39 = vadd.f32 %v9539_v22, %v9505_v15  ;;  %v9257_v19 = vld [vmem:[#allocation8 + $0x360] ss:$16 sps:$4 sm:$0xff]   ;;  %v9262_v23 = vld [vmem:[#allocation8 + $0x36c] ss:$16 sps:$4 sm:$0xff]  }
 0x200   :  { %v1343_v25 = vpop.f32.mrb[26].mxu0  ;;  %v9612_v27 = vpop.f32.mrb[26].mxu1  ;;  %v8404_v44 = vadd.f32 %v1341_v48, %v9502_v12  ;;  %v9646_v48 = vadd.f32 %v9542_v29, %v9499_v11  ;;  %v9260_v28 = vld [vmem:[#allocation8 + $0x368] ss:$16 sps:$4 sm:$0xff]   ;;  %vm1838_vm9 = vcmp.ge.f32.partialorder %v9603_v1, 0.0 }
 0x201   :  { %v2000_v55 = vmul.f32 0.2, %v9606_v42  ;;  %v8405_v56 = vadd.f32 %v1343_v25, %v9496_v10  ;;  %v1345_v52 = vpop.f32.mrb[27].mxu0  ;;  %v9630_v57 = vpop.f32.mrb[27].mxu1  ;;  %vm1872_vm13 = vcmp.ge.f32.partialorder %v9606_v42, 0.0  ;;  %3144 = vmatprep.mubr.bf16.mxu0 %v2358_v50  ;;  %3530 = vmatprep.mubr.bf16.mxu1 %v2358_v50 }
 0x202   :  { %3274 = vmatpush1.bf16.msra.mxu0 %v9245_v51  ;;  %v8406_v0 = vadd.f32 %v1345_v52, %v9502_v12  ;;  %3660 = vmatpush1.bf16.msra.mxu1 %v9248_v32  ;;  %v9655_v51 = vadd.f32 %v9549_v43, %v9499_v11  ;;  %v2001_v25 = vmul.f32 0.2, %v8404_v44  ;;  %vm1873_vm1 = vcmp.ge.f32.partialorder %v8404_v44, 0.0  ;;  %v9265_v52 = vld [vmem:[#allocation8 + $0x384] ss:$16 sps:$4 sm:$0xff]  }
 0x203   :  { %3275 = vmatprep.subr.bf16.mxu0 %v9253_v34  ;;  %vm1876_vm14 = vcmp.ge.f32.partialorder %v8405_v56, 0.0  ;;  %v2004_v22 = vmul.f32 0.2, %v8405_v56  ;;  %v2128_v33 = vsel %vm1872_vm13, %v9606_v42, %v2000_v55  ;;  %3661 = vmatprep.subr.bf16.mxu1 %v9256_v47  ;;  %v9667_v50 = vmul.f32 0.2, %v9621_v40 }
 0x204   :  { %12622 = vst [vmem:[#allocation20_spill] sm:$0xff] %v9655_v51  ;;  %vm1877_vm0 = vcmp.ge.f32.partialorder %v8406_v0, 0.0  ;;  %v2005_v29 = vmul.f32 0.2, %v8406_v0  ;;  %3145 = vmatmul.mubr.bf16.gmra.mrb[84].mxu0 %v2357_v30  ;;  %3531 = vmatmul.mubr.bf16.gmra.mrb[84].mxu1 %v2357_v30  ;;  %v9670_v30 = vmul.f32 0.2, %v9634_v59  ;;  %v9687_v55 = vsel %vm1835_vm12, %v9599_v63, %v1963_v37 }
 0x205   :  { %v2132_v43 = vsel %vm1876_vm14, %v8405_v56, %v2004_v22  ;;  %v9676_v42 = vmul.f32 0.2, %v9638_v39  ;;  %v9682_v47 = vmul.f32 0.2, %v9650_v17  ;;  %v9690_v56 = vmul.f32 0.2, %v9655_v51 }
 0x206   :  { %v1349_v7 = vpop.f32.mrb[28].mxu0  ;;  %v9642_v14 = vpop.f32.mrb[28].mxu1  ;;  %3276 = vmatpush1.bf16.msra.mxu0 %v9251_v21  ;;  %12623 = vst [vmem:[#allocation21_spill] sm:$0xff] %v9670_v30  ;;  %v2133_v4 = vsel %vm1877_vm0, %v8406_v0, %v2005_v29  ;;  %v2361_v9 = vpack.c.bf16 %v2132_v43, %v2128_v33  ;;  %3662 = vmatpush1.bf16.msra.mxu1 %v9254_v46  ;;  %v9679_v21 = vmul.f32 0.2, %v9646_v48  ;;  %vm1843_vm0 = vcmp.ge.f32.partialorder %v9638_v39, 0.0 }
 0x207   :  { %v9658_v38 = vadd.f32 %v1349_v7, %v9496_v10  ;;  %v1351_v32 = vpop.f32.mrb[29].mxu0  ;;  %v9660_v34 = vpop.f32.mrb[29].mxu1  ;;  %3277 = vmatprep.subr.bf16.mxu0 %v9259_v16  ;;  %3663 = vmatprep.subr.bf16.mxu1 %v9262_v23  ;;  %12625 = vst [vmem:[#allocation23_spill] sm:$0xff] %v9690_v56  ;;  %v9694_v46 = vadd.f32 %v9552_v54, %v9505_v15  ;;  %v9263_v29 = vld [vmem:[#allocation8 + $0x380] ss:$16 sps:$4 sm:$0xff]  }
 0x208   :  { %v1353_v7 = vpop.f32.mrb[30].mxu0  ;;  %v9672_v3 = vpop.f32.mrb[30].mxu1  ;;  %12624 = vst [vmem:[#allocation22_spill] sm:$0xff] %v9679_v21  ;;  %v9697_v0 = vadd.f32 %v1351_v32, %v9502_v12  ;;  %v2129_v22 = vsel %vm1873_vm1, %v8404_v44, %v2001_v25  ;;  %v9266_v16 = vld [vmem:[#allocation8 + $0x388] ss:$16 sps:$4 sm:$0xff]   ;;  %v9702_v23 = vadd.f32 %v9555_v60, %v9499_v11  ;;  %v9710_v32 = vadd.f32 %v9560_v20, %v9505_v15 }
 0x209   :  { %v2008_v63 = vmul.f32 0.2, %v9658_v38  ;;  %v8409_v37 = vadd.f32 %v1353_v7, %v9496_v10  ;;  %v1355_v33 = vpop.f32.mrb[31].mxu0  ;;  %v9706_v43 = vpop.f32.mrb[31].mxu1  ;;  %v2362_v54 = vpack.c.bf16 %v2133_v4, %v2129_v22  ;;  %v9714_v44 = vadd.f32 %v9563_v26, %v9499_v11  ;;  %v9271_v4 = vld [vmem:[#allocation8 + $0x3a4] ss:$16 sps:$4 sm:$0xff]  }
 0x20a   :  { %3278 = vmatpush1.bf16.msra.mxu0 %v9257_v19  ;;  %vm1880_vm2 = vcmp.ge.f32.partialorder %v9658_v38, 0.0  ;;  %v8410_v60 = vadd.f32 %v1355_v33, %v9502_v12  ;;  %3664 = vmatpush1.bf16.msra.mxu1 %v9260_v28  ;;  %v9722_v19 = vadd.f32 %v9566_v35, %v9505_v15  ;;  %v9726_v20 = vadd.f32 %v9569_v41, %v9499_v11  ;;  %v9269_v22 = vld [vmem:[#allocation8 + $0x3a0] ss:$16 sps:$4 sm:$0xff]   ;;  %v9274_v33 = vld [vmem:[#allocation8 + $0x3ac] ss:$16 sps:$4 sm:$0xff]  }
 0x20b   :  { %12626 = vst [vmem:[#allocation24_spill] sm:$0xff] %v9714_v44  ;;  %3279 = vmatprep.subr.bf16.mxu0 %v9265_v52  ;;  %vm1884_vm3 = vcmp.ge.f32.partialorder %v8409_v37, 0.0  ;;  %v2012_v26 = vmul.f32 0.2, %v8409_v37  ;;  %3154 = vmatprep.mubr.bf16.mxu0 %v2362_v54  ;;  %v9731_v28 = vadd.f32 %v9574_v61, %v9505_v15  ;;  %v2009_v52 = vmul.f32 0.2, %v9697_v0 }
 0x20c   :  { %12627 = vst [vmem:[#allocation25_spill] sm:$0xff] %v9726_v20  ;;  %3540 = vmatprep.mubr.bf16.mxu1 %v2362_v54  ;;  %vm1885_vm5 = vcmp.ge.f32.partialorder %v8410_v60, 0.0  ;;  %v2013_v35 = vmul.f32 0.2, %v8410_v60  ;;  %3155 = vmatmul.mubr.bf16.gmra.mrb[88].mxu0 %v2361_v9  ;;  %v9272_v41 = vld [vmem:[#allocation8 + $0x3a8] ss:$16 sps:$4 sm:$0xff]   ;;  %v2136_v61 = vsel %vm1880_vm2, %v9658_v38, %v2008_v63 }
 0x20d   :  { %3541 = vmatmul.mubr.bf16.gmra.mrb[88].mxu1 %v2361_v9  ;;  %vm1881_vm6 = vcmp.ge.f32.partialorder %v9697_v0, 0.0  ;;  %v2140_v45 = vsel %vm1884_vm3, %v8409_v37, %v2012_v26  ;;  %3665 = vmatprep.subr.bf16.mxu1 %v9268_v6  ;;  %v9745_v9 = vmul.f32 0.2, %v9694_v46  ;;  %v9748_v56 = vmul.f32 0.2, %v9702_v23 }
 0x20e   :  { %v1359_v25 = vpop.f32.mrb[32].mxu0  ;;  %v9718_v7 = vpop.f32.mrb[32].mxu1  ;;  %3280 = vmatpush1.bf16.msra.mxu0 %v9263_v29  ;;  %v2141_v30 = vsel %vm1885_vm5, %v8410_v60, %v2013_v35  ;;  %v2365_v21 = vpack.c.bf16 %v2140_v45, %v2136_v61  ;;  %3666 = vmatpush1.bf16.msra.mxu1 %v9266_v16  ;;  %v9754_v38 = vmul.f32 0.2, %v9710_v32  ;;  %v9757_v29 = vmul.f32 0.2, %v9714_v44 }
 0x20f   :  { %v9736_v8 = vadd.f32 %v1359_v25, %v9496_v10  ;;  %v1361_v54 = vpop.f32.mrb[33].mxu0  ;;  %v9738_v5 = vpop.f32.mrb[33].mxu1  ;;  %12628 = vst [vmem:[#allocation26_spill] sm:$0xff] %v9745_v9  ;;  %12629 = vst [vmem:[#allocation27_spill] sm:$0xff] %v9748_v56  ;;  %v9760_v6 = vmul.f32 0.2, %v9722_v19  ;;  %3281 = vmatprep.subr.bf16.mxu0 %v9271_v4  ;;  %3667 = vmatprep.subr.bf16.mxu1 %v9274_v33  ;;  %v9766_v37 = vsel %vm1834_vm15, %v9595_v62, %v9615_v36 }
 0x210   :  { %v1363_v25 = vpop.f32.mrb[34].mxu0  ;;  %v9750_v51 = vpop.f32.mrb[34].mxu1  ;;  %12630 = vst [vmem:[#allocation28_spill] sm:$0xff] %v9754_v38  ;;  %12631 = vst [vmem:[#allocation29_spill] sm:$0xff] %v9757_v29  ;;  %v9275_v63 = vld [vmem:[#allocation8 + $0x3c0] ss:$16 sps:$4 sm:$0xff]   ;;  %v8412_v60 = vadd.f32 %v1361_v54, %v9502_v12  ;;  %v2137_v4 = vsel %vm1881_vm6, %v9697_v0, %v2009_v52  ;;  %v9780_v33 = vadd.f32 %v9577_v13, %v9499_v11 }
 0x211   :  { %12632 = vst [vmem:[#allocation30_spill] sm:$0xff] %v9760_v6  ;;  %v9769_v45 = vmul.f32 0.2, %v9726_v20  ;;  %v9772_v16 = vmul.f32 0.2, %v9731_v28  ;;  %v8413_v36 = vadd.f32 %v1363_v25, %v9496_v10  ;;  %v1365_v35 = vpop.f32.mrb[35].mxu0  ;;  %v9788_v54 = vadd.f32 %v9580_v24, %v9505_v15 }
 0x212   :  { %v9278_v26 = vld [vmem:[#allocation8 + $0x3c8] ss:$16 sps:$4 sm:$0xff]   ;;  %v2016_v62 = vmul.f32 0.2, %v9736_v8  ;;  %v9784_v61 = vpop.f32.mrb[35].mxu1  ;;  %3282 = vmatpush1.bf16.msra.mxu0 %v9269_v22  ;;  %v9792_v0 = vadd.f32 %v9583_v31, %v9499_v11  ;;  %vm1888_vm7 = vcmp.ge.f32.partialorder %v9736_v8, 0.0  ;;  %v8414_v13 = vadd.f32 %v1365_v35, %v9502_v12  ;;  %3668 = vmatpush1.bf16.msra.mxu1 %v9272_v41 }
 0x213   :  { %12633 = vst [vmem:[#allocation31_spill] sm:$0xff] %v9769_v45  ;;  %12634 = vst [vmem:[#allocation32_spill] sm:$0xff] %v9772_v16  ;;  %v2366_v45 = vpack.c.bf16 %v2141_v30, %v2137_v4  ;;  %v9280_v29 = vld [vmem:[#allocation8 + $0x3cc] ss:$16 sps:$4 sm:$0xff]   ;;  %3283 = vmatprep.subr.bf16.mxu0 %v9277_v2  ;;  %v9283_v30 = vld [vmem:[#allocation8 + $0x3e4] ss:$16 sps:$4 sm:$0xff]   ;;  %v9800_v22 = vadd.f32 %v9588_v53, %v9505_v15  ;;  %v9804_v24 = vadd.f32 %v9591_v58, %v9499_v11 }
 0x214   :  { %vm1892_vm8 = vcmp.ge.f32.partialorder %v8413_v36, 0.0  ;;  %v2020_v31 = vmul.f32 0.2, %v8413_v36  ;;  %v9281_v4 = vld [vmem:[#allocation8 + $0x3e0] ss:$16 sps:$4 sm:$0xff]   ;;  %v9809_v2 = vadd.f32 %v9608_v18, %v9505_v15  ;;  %vm1893_vm10 = vcmp.ge.f32.partialorder %v8414_v13, 0.0  ;;  %3669 = vmatprep.subr.bf16.mxu1 %v9280_v29 }
 0x215   :  { %3164 = vmatprep.mubr.bf16.mxu0 %v2366_v45  ;;  %3550 = vmatprep.mubr.bf16.mxu1 %v2366_v45  ;;  %v9286_v35 = vld [vmem:[#allocation8 + $0x3ec] ss:$16 sps:$4 sm:$0xff]   ;;  %v2017_v41 = vmul.f32 0.2, %v8412_v60  ;;  %v2021_v53 = vmul.f32 0.2, %v8414_v13  ;;  %v2144_v45 = vsel %vm1888_vm7, %v9736_v8, %v2016_v62  ;;  %v2095_v62 = vsel %vm1839_vm4, %v9621_v40, %v9667_v50 }
 0x216   :  { %v1369_v52 = vpop.f32.mrb[36].mxu0  ;;  %v9796_v25 = vpop.f32.mrb[36].mxu1  ;;  %3165 = vmatmul.mubr.bf16.gmra.mrb[92].mxu0 %v2365_v21  ;;  %3551 = vmatmul.mubr.bf16.gmra.mrb[92].mxu1 %v2365_v21  ;;  %vm1889_vm11 = vcmp.ge.f32.partialorder %v8412_v60, 0.0  ;;  %v2148_v56 = vsel %vm1892_vm8, %v8413_v36, %v2020_v31  ;;  %v9284_v18 = vld [vmem:[#allocation8 + $0x3e8] ss:$16 sps:$4 sm:$0xff]   ;;  %vm1847_vm3 = vcmp.ge.f32.partialorder %v9650_v17, 0.0 }
 0x217   :  { %v8415_v58 = vadd.f32 %v1369_v52, %v9496_v10  ;;  %v1371_v16 = vpop.f32.mrb[37].mxu0  ;;  %v9812_v6 = vpop.f32.mrb[37].mxu1  ;;  %3284 = vmatpush1.bf16.msra.mxu0 %v9275_v63  ;;  %v9819_v20 = vmul.f32 0.2, %v9780_v33  ;;  %v9822_v21 = vmul.f32 0.2, %v9788_v54  ;;  %v2149_v38 = vsel %vm1893_vm10, %v8414_v13, %v2021_v53  ;;  %3670 = vmatpush1.bf16.msra.mxu1 %v9278_v26 }
 0x218   :  { %v1373_v44 = vpop.f32.mrb[38].mxu0  ;;  %v9824_v52 = vpop.f32.mrb[38].mxu1  ;;  %v2369_v9 = vpack.c.bf16 %v2148_v56, %v2144_v45  ;;  %v9828_v8 = vmul.f32 0.2, %v9792_v0  ;;  %v9831_v63 = vmul.f32 0.2, %v9800_v22  ;;  %3285 = vmatprep.subr.bf16.mxu0 %v9283_v30  ;;  %3671 = vmatprep.subr.bf16.mxu1 %v9286_v35  ;;  %v9845_v56 = vadd.f32 %v9612_v27, %v9499_v11 }
 0x219   :  { %12635 = vst [vmem:[#allocation33_spill] sm:$0xff] %v9819_v20  ;;  %12636 = vst [vmem:[#allocation34_spill] sm:$0xff] %v9822_v21  ;;  %v9834_v29 = vmul.f32 0.2, %v9804_v24  ;;  %v9841_v36 = vmul.f32 0.2, %v9809_v2  ;;  %v8416_v26 = vadd.f32 %v1371_v16, %v9502_v12  ;;  %v2145_v13 = vsel %vm1889_vm11, %v8412_v60, %v2017_v41 }
 0x21a   :  { %12637 = vst [vmem:[#allocation35_spill] sm:$0xff] %v9828_v8  ;;  %12638 = vst [vmem:[#allocation36_spill] sm:$0xff] %v9831_v63  ;;  %v9851_v30 = vadd.f32 %v9630_v57, %v9505_v15  ;;  %v2024_v31 = vmul.f32 0.2, %v8415_v58  ;;  %v8417_v35 = vadd.f32 %v1373_v44, %v9496_v10  ;;  %v1375_v53 = vpop.f32.mrb[39].mxu0  ;;  %v9854_v40 = vpop.f32.mrb[39].mxu1  ;;  %v2370_v50 = vpack.c.bf16 %v2149_v38, %v2145_v13 }
 0x21b   :  { %12639 = vst [vmem:[#allocation37_spill] sm:$0xff] %v9834_v29  ;;  %12640 = vst [vmem:[#allocation38_spill] sm:$0xff] %v9841_v36  ;;  %3286 = vmatpush1.bf16.msra.mxu0 %v9281_v4  ;;  %v9858_v27 = vadd.f32 %v9642_v14, %v9499_v11  ;;  %vm1896_vm12 = vcmp.ge.f32.partialorder %v8415_v58, 0.0  ;;  %v8418_v16 = vadd.f32 %v1375_v53, %v9502_v12  ;;  %3672 = vmatpush1.bf16.msra.mxu1 %v9284_v18 }
 0x21c   :  { %v9864_v57 = vpack.c.bf16 %v2095_v62, %v9687_v55  ;;  %v9868_v44 = vadd.f32 %v9660_v34, %v9505_v15  ;;  %v9872_v38 = vadd.f32 %v9672_v3, %v9499_v11  ;;  %vm1900_vm13 = vcmp.ge.f32.partialorder %v8417_v35, 0.0  ;;  %3174 = vmatprep.mubr.bf16.mxu0 %v2370_v50  ;;  %3560 = vmatprep.mubr.bf16.mxu1 %v2370_v50 }
 0x21d   :  { %v2028_v14 = vmul.f32 0.2, %v8417_v35  ;;  %v9876_v4 = vadd.f32 %v9706_v43, %v9505_v15  ;;  %v2025_v45 = vmul.f32 0.2, %v8416_v26  ;;  %vm1901_vm14 = vcmp.ge.f32.partialorder %v8418_v16, 0.0 }
 0x21e   :  { %v1379_v60 = vpop.f32.mrb[40].mxu0  ;;  %v9861_v41 = vpop.f32.mrb[40].mxu1  ;;  %12641 = vst [vmem:[#allocation39_spill] sm:$0xff] %v9864_v57  ;;  %v2029_v55 = vmul.f32 0.2, %v8418_v16  ;;  %3175 = vmatmul.mubr.bf16.gmra.mrb[96].mxu0 %v2369_v9  ;;  %3561 = vmatmul.mubr.bf16.gmra.mrb[96].mxu1 %v2369_v9  ;;  %vm1897_vm15 = vcmp.ge.f32.partialorder %v8416_v26, 0.0  ;;  %v2152_v3 = vsel %vm1896_vm12, %v8415_v58, %v2024_v31  ;;  %v9896_v58 = vadd.f32 %v9718_v7, %v9499_v11 }
 0x21f   :  { %v8419_v34 = vadd.f32 %v1379_v60, %v9496_v10  ;;  %v1381_v18 = vpop.f32.mrb[41].mxu0  ;;  %v9879_v62 = vpop.f32.mrb[41].mxu1  ;;  %v2156_v13 = vsel %vm1900_vm13, %v8417_v35, %v2028_v14  ;;  %v9883_v53 = vmul.f32 0.2, %v9845_v56  ;;  %v9886_v43 = vmul.f32 0.2, %v9851_v30 }
 0x220   :  { %v1383_v50 = vpop.f32.mrb[42].mxu0  ;;  %v1769_v57 = vpop.f32.mrb[42].mxu1  ;;  %v2157_v29 = vsel %vm1901_vm14, %v8418_v16, %v2029_v55  ;;  %v2373_v36 = vpack.c.bf16 %v2156_v13, %v2152_v3  ;;  %v9889_v9 = vmul.f32 0.2, %v9858_v27  ;;  %v9892_v60 = vmul.f32 0.2, %v9868_v44 }
 0x221   :  { %12642 = vst [vmem:[#allocation40_spill] sm:$0xff] %v9883_v53  ;;  %12643 = vst [vmem:[#allocation41_spill] sm:$0xff] %v9886_v43  ;;  %v2094_v31 = vsel %vm1838_vm9, %v9603_v1, %v9626_v49  ;;  %v9904_v35 = vmul.f32 0.2, %v9872_v38  ;;  %v9907_v16 = vmul.f32 0.2, %v9876_v4  ;;  %v8420_v14 = vadd.f32 %v1381_v18, %v9502_v12 }
 0x222   :  { %12644 = vst [vmem:[#allocation42_spill] sm:$0xff] %v9889_v9  ;;  %12645 = vst [vmem:[#allocation43_spill] sm:$0xff] %v9892_v60  ;;  %v2153_v55 = vsel %vm1897_vm15, %v8416_v26, %v2025_v45  ;;  %v9913_v7 = vadd.f32 %v9738_v5, %v9505_v15  ;;  %v2032_v3 = vmul.f32 0.2, %v8419_v34  ;;  %v8421_v13 = vadd.f32 %v1383_v50, %v9496_v10  ;;  %v1385_v1 = vpop.f32.mrb[43].mxu0  ;;  %v1771_v49 = vpop.f32.mrb[43].mxu1 }
 0x223   :  { %12646 = vst [vmem:[#allocation44_spill] sm:$0xff] %v9904_v35  ;;  %12647 = vst [vmem:[#allocation45_spill] sm:$0xff] %v9907_v16  ;;  %v2374_v9 = vpack.c.bf16 %v2157_v29, %v2153_v55  ;;  %v9918_v35 = vadd.f32 %v9750_v51, %v9499_v11  ;;  %vm1904_vm1 = vcmp.ge.f32.partialorder %v8419_v34, 0.0  ;;  %v8422_v16 = vadd.f32 %v1385_v1, %v9502_v12 }
 0x224   :  { %v9924_v26 = vpack.c.bf16 %v2094_v31, %v9766_v37  ;;  %v9927_v5 = vmul.f32 0.2, %v9896_v58  ;;  %v9931_v45 = vadd.f32 %v9784_v61, %v9505_v15  ;;  %vm1908_vm2 = vcmp.ge.f32.partialorder %v8421_v13, 0.0 }
 0x225   :  { %v2036_v29 = vmul.f32 0.2, %v8421_v13  ;;  %3184 = vmatprep.mubr.bf16.mxu0 %v2374_v9  ;;  %3570 = vmatprep.mubr.bf16.mxu1 %v2374_v9  ;;  %v2033_v51 = vmul.f32 0.2, %v8420_v14  ;;  %vm1909_vm4 = vcmp.ge.f32.partialorder %v8422_v16, 0.0  ;;  %vm1905_vm5 = vcmp.ge.f32.partialorder %v8420_v14, 0.0 }
 0x226   :  { %v1389_v18 = vpop.f32.mrb[44].mxu0  ;;  %v9921_v60 = vpop.f32.mrb[44].mxu1  ;;  %12648 = vst [vmem:[#allocation46_spill] sm:$0xff] %v9924_v26  ;;  %12649 = vst [vmem:[#allocation47_spill] sm:$0xff] %v9927_v5  ;;  %v2037_v50 = vmul.f32 0.2, %v8422_v16  ;;  %3185 = vmatmul.mubr.bf16.gmra.mrb[100].mxu0 %v2373_v36  ;;  %3571 = vmatmul.mubr.bf16.gmra.mrb[100].mxu1 %v2373_v36  ;;  %v2160_v61 = vsel %vm1904_vm1, %v8419_v34, %v2032_v3  ;;  %v9955_v34 = vadd.f32 %v9812_v6, %v9505_v15 }
 0x227   :  { %v8423_v37 = vadd.f32 %v1389_v18, %v9496_v10  ;;  %v1391_v31 = vpop.f32.mrb[45].mxu0  ;;  %v9935_v55 = vpop.f32.mrb[45].mxu1  ;;  %v2164_v1 = vsel %vm1908_vm2, %v8421_v13, %v2036_v29  ;;  %v9939_v26 = vmul.f32 0.2, %v9913_v7  ;;  %v9942_v9 = vmul.f32 0.2, %v9918_v35 }
 0x228   :  { %v1393_v5 = vpop.f32.mrb[46].mxu0  ;;  %v9944_v53 = vpop.f32.mrb[46].mxu1  ;;  %v2165_v43 = vsel %vm1909_vm4, %v8422_v16, %v2037_v50  ;;  %v2377_v36 = vpack.c.bf16 %v2164_v1, %v2160_v61  ;;  %v9947_v8 = vmul.f32 0.2, %v9931_v45  ;;  %v9951_v18 = vadd.f32 %v9796_v25, %v9499_v11 }
 0x229   :  { %12650 = vst [vmem:[#allocation48_spill] sm:$0xff] %v9939_v26  ;;  %12651 = vst [vmem:[#allocation49_spill] sm:$0xff] %v9942_v9  ;;  %v9959_v3 = vadd.f32 %v9824_v52, %v9499_v11  ;;  %v9963_v13 = vadd.f32 %v9854_v40, %v9505_v15  ;;  %v9967_v16 = vadd.f32 %v9861_v41, %v9499_v11  ;;  %v2040_v50 = vmul.f32 0.2, %v8423_v37  ;;  %v1395_v61 = vpop.f32.mrb[47].mxu0  ;;  %v1781_v1 = vpop.f32.mrb[47].mxu1 }
 0x22a   :  { %12652 = vst [vmem:[#allocation50_spill] sm:$0xff] %v9947_v8  ;;  %v8424_v29 = vadd.f32 %v1391_v31, %v9502_v12  ;;  %v2161_v25 = vsel %vm1905_vm5, %v8420_v14, %v2033_v51  ;;  %v9973_v6 = vadd.f32 %v9879_v62, %v9505_v15  ;;  %v8425_v52 = vadd.f32 %v1393_v5, %v9496_v10 }
 0x22b   :  { %v2378_v9 = vpack.c.bf16 %v2165_v43, %v2161_v25  ;;  %v9977_v40 = vadd.f32 %v1769_v57, %v9499_v11  ;;  %vm1912_vm6 = vcmp.ge.f32.partialorder %v8423_v37, 0.0  ;;  %v8426_v41 = vadd.f32 %v1395_v61, %v9502_v12 }
 0x22c   :  { %v2103_v62 = vsel %vm1847_vm3, %v9650_v17, %v9682_v47  ;;  %v9985_v14 = vadd.f32 %v1771_v49, %v9505_v15  ;;  %vm1916_vm7 = vcmp.ge.f32.partialorder %v8425_v52, 0.0  ;;  %v2044_v5 = vmul.f32 0.2, %v8425_v52 }
 0x22d   :  { %12653 = vst [vmem:[#allocation51_spill] sm:$0xff] %v9977_v40  ;;  %3194 = vmatprep.mubr.bf16.mxu0 %v2378_v9  ;;  %3580 = vmatprep.mubr.bf16.mxu1 %v2378_v9  ;;  %v2099_v57 = vsel %vm1843_vm0, %v9638_v39, %v9676_v42  ;;  %vm1846_vm8 = vcmp.ge.f32.partialorder %v9646_v48, 0.0  ;;  %vm1913_vm9 = vcmp.ge.f32.partialorder %v8424_v29, 0.0  ;;  %v2041_v43 = vmul.f32 0.2, %v8424_v29 }
 0x22e   :  { %v1399_v8 = vpop.f32.mrb[48].mxu0  ;;  %v1785_v31 = vpop.f32.mrb[48].mxu1  ;;  %vm1917_vm10 = vcmp.ge.f32.partialorder %v8426_v41, 0.0  ;;  %v2045_v51 = vmul.f32 0.2, %v8426_v41  ;;  %3195 = vmatmul.mubr.bf16.gmra.mrb[104].mxu0 %v2377_v36  ;;  %3581 = vmatmul.mubr.bf16.gmra.mrb[104].mxu1 %v2377_v36  ;;  %v2168_v25 = vsel %vm1912_vm6, %v8423_v37, %v2040_v50  ;;  %v2172_v9 = vsel %vm1916_vm7, %v8425_v52, %v2044_v5 }
 0x22f   :  { %v8427_v17 = vadd.f32 %v1399_v8, %v9496_v10  ;;  %v1401_v47 = vpop.f32.mrb[49].mxu0  ;;  %v1787_v49 = vpop.f32.mrb[49].mxu1  ;;  %v9995_v61 = vpack.c.bf16 %v2103_v62, %v2099_v57  ;;  %vm1842_vm11 = vcmp.ge.f32.partialorder %v9634_v59, 0.0  ;;  %v9999_v39 = vmul.f32 0.2, %v9951_v18 }
 0x230   :  { %v10002_v42 = vmul.f32 0.2, %v9955_v34  ;;  %v1403_v26 = vpop.f32.mrb[50].mxu0  ;;  %v1789_v36 = vpop.f32.mrb[50].mxu1  ;;  %v2173_v20 = vsel %vm1917_vm10, %v8426_v41, %v2045_v51  ;;  %v2381_v8 = vpack.c.bf16 %v2172_v9, %v2168_v25  ;;  %v10005_v63 = vmul.f32 0.2, %v9959_v3 }
 0x231   :  { %12654 = vst [vmem:[#allocation52_spill] sm:$0xff] %v9995_v61  ;;  %12655 = vst [vmem:[#allocation53_spill] sm:$0xff] %v9999_v39  ;;  %v10008_v37 = vmul.f32 0.2, %v9963_v13  ;;  %v10011_v50 = vmul.f32 0.2, %v9967_v16  ;;  %v8428_v5 = vadd.f32 %v1401_v47, %v9502_v12  ;;  %v2169_v41 = vsel %vm1913_vm9, %v8424_v29, %v2041_v43 }
 0x232   :  { %12656 = vst [vmem:[#allocation54_spill] sm:$0xff] %v10002_v42  ;;  %12657 = vst [vmem:[#allocation55_spill] sm:$0xff] %v10005_v63  ;;  %v10014_v52 = vmul.f32 0.2, %v9973_v6  ;;  %v10017_v62 = vmul.f32 0.2, %v9977_v40  ;;  %v8429_v25 = vadd.f32 %v1403_v26, %v9496_v10  ;;  %v2382_v63 = vpack.c.bf16 %v2173_v20, %v2169_v41 }
 0x233   :  { %12658 = vst [vmem:[#allocation56_spill] sm:$0xff] %v10008_v37  ;;  %12659 = vst [vmem:[#allocation57_spill] sm:$0xff] %v10011_v50  ;;  %v10022_v57 = vmul.f32 0.2, %v9985_v14  ;;  %v2048_v51 = vmul.f32 0.2, %v8427_v17  ;;  %v10027_v50 = vadd.f32 %v9921_v60, %v9499_v11  ;;  %v10039_v26 = vadd.f32 %v1781_v1, %v9505_v15 }
 0x234   :  { %12660 = vst [vmem:[#allocation58_spill] sm:$0xff] %v10014_v52  ;;  %12661 = vst [vmem:[#allocation59_spill] sm:$0xff] %v10017_v62  ;;  %v1405_v9 = vpop.f32.mrb[51].mxu0  ;;  %v1791_v61 = vpop.f32.mrb[51].mxu1  ;;  %v10031_v62 = vadd.f32 %v9935_v55, %v9505_v15  ;;  %vm1920_vm12 = vcmp.ge.f32.partialorder %v8427_v17, 0.0  ;;  %vm1924_vm13 = vcmp.ge.f32.partialorder %v8429_v25, 0.0  ;;  %3204 = vmatprep.mubr.bf16.mxu0 %v2382_v63  ;;  %3590 = vmatprep.mubr.bf16.mxu1 %v2382_v63 }
 0x235   :  { %12662 = vst [vmem:[#allocation60_spill] sm:$0xff] %v10022_v57  ;;  %12663 = vst [vmem:[#allocation61_spill] sm:$0xff] %v10027_v50  ;;  %v8430_v29 = vadd.f32 %v1405_v9, %v9502_v12  ;;  %v10036_v57 = vadd.f32 %v9944_v53, %v9499_v11  ;;  %v2052_v20 = vmul.f32 0.2, %v8429_v25  ;;  %v10042_v60 = vadd.f32 %v1785_v31, %v9499_v11 }
 0x236   :  { %v1409_v43 = vpop.f32.mrb[52].mxu0  ;;  %v1795_v47 = vpop.f32.mrb[52].mxu1  ;;  %v2049_v55 = vmul.f32 0.2, %v8428_v5  ;;  %3205 = vmatmul.mubr.bf16.gmra.mrb[108].mxu0 %v2381_v8  ;;  %3591 = vmatmul.mubr.bf16.gmra.mrb[108].mxu1 %v2381_v8  ;;  %vm1921_vm15 = vcmp.ge.f32.partialorder %v8428_v5, 0.0  ;;  %v2176_v1 = vsel %vm1920_vm12, %v8427_v17, %v2048_v51  ;;  %vm1851_vm0 = vcmp.ge.f32.partialorder %v9694_v46, 0.0 }
 0x237   :  { %12664 = vst [vmem:[#allocation62_spill] sm:$0xff] %v10036_v57  ;;  %12665 = vst [vmem:[#allocation63_spill] sm:$0xff] %v10042_v60  ;;  %vm1925_vm14 = vcmp.ge.f32.partialorder %v8430_v29, 0.0  ;;  %v2053_v41 = vmul.f32 0.2, %v8430_v29  ;;  %v8431_v9 = vadd.f32 %v1409_v43, %v9496_v10  ;;  %v1411_v53 = vpop.f32.mrb[53].mxu0  ;;  %v2180_v39 = vsel %vm1924_vm13, %v8429_v25, %v2052_v20 }
 0x238   :  { %v1797_v52 = vpop.f32.mrb[53].mxu1  ;;  %v10047_v37 = vmul.f32 0.2, %v10027_v50  ;;  %v10050_v63 = vmul.f32 0.2, %v10031_v62  ;;  %v1413_v31 = vpop.f32.mrb[54].mxu0  ;;  %v2385_v40 = vpack.c.bf16 %v2180_v39, %v2176_v1  ;;  %v10061_v51 = vadd.f32 %v1787_v49, %v9505_v15 }
 0x239   :  { %v1799_v42 = vpop.f32.mrb[54].mxu1  ;;  %v2181_v21 = vsel %vm1925_vm14, %v8430_v29, %v2053_v41  ;;  %vm1855_vm1 = vcmp.ge.f32.partialorder %v9710_v32, 0.0  ;;  %v10055_v8 = vmul.f32 0.2, %v10036_v57  ;;  %v10058_v17 = vmul.f32 0.2, %v10039_v26 }
 0x23a   :  { %12666 = vst [vmem:[#allocation64_spill] sm:$0xff] %v10047_v37  ;;  %12667 = vst [vmem:[#allocation65_spill] sm:$0xff] %v10050_v63  ;;  %v12670_v25 = vld [vmem:[#allocation22_spill] sm:$0xff]  ;;  %v10068_v39 = vmul.f32 0.2, %v10042_v60  ;;  %v10071_v29 = vadd.f32 %v1789_v36, %v9499_v11  ;;  %v8432_v20 = vadd.f32 %v1411_v53, %v9502_v12  ;;  %v2177_v41 = vsel %vm1921_vm15, %v8428_v5, %v2049_v55  ;;  %v1415_v49 = vpop.f32.mrb[55].mxu0 }
 0x23b   :  { %12668 = vst [vmem:[#allocation66_spill] sm:$0xff] %v10055_v8  ;;  %12669 = vst [vmem:[#allocation67_spill] sm:$0xff] %v10058_v17  ;;  %v2102_v43 = vsel %vm1846_vm8, %v9646_v48, %v12670_v25  ;;  %v2056_v1 = vmul.f32 0.2, %v8431_v9  ;;  %v8433_v8 = vadd.f32 %v1413_v31, %v9496_v10  ;;  %v1801_v37 = vpop.f32.mrb[55].mxu1  ;;  %v2386_v17 = vpack.c.bf16 %v2181_v21, %v2177_v41  ;;  %v12673_v63 = vld [vmem:[#allocation21_spill] sm:$0xff] }
 0x23c   :  { %12671 = vst [vmem:[#allocation22_spill] sm:$0xff] %v10068_v39  ;;  %12672 = vst [vmem:[#allocation68_spill] sm:$0xff] %v10071_v29  ;;  %v2098_v48 = vsel %vm1842_vm11, %v9634_v59, %v12673_v63  ;;  %v10081_v25 = vadd.f32 %v1791_v61, %v9505_v15  ;;  %vm1928_vm2 = vcmp.ge.f32.partialorder %v8431_v9, 0.0  ;;  %v8434_v36 = vadd.f32 %v1415_v49, %v9502_v12 }
 0x23d   :  { %v10084_v5 = vpack.c.bf16 %v2102_v43, %v2098_v48  ;;  %v10087_v55 = vadd.f32 %v1795_v47, %v9499_v11  ;;  %v10090_v21 = vadd.f32 %v1797_v52, %v9505_v15  ;;  %vm1932_vm3 = vcmp.ge.f32.partialorder %v8433_v8, 0.0  ;;  %3214 = vmatprep.mubr.bf16.mxu0 %v2386_v17  ;;  %3600 = vmatprep.mubr.bf16.mxu1 %v2386_v17 }
 0x23e   :  { %v1419_v53 = vpop.f32.mrb[56].mxu0  ;;  %v1805_v39 = vpop.f32.mrb[56].mxu1  ;;  %v2060_v31 = vmul.f32 0.2, %v8433_v8  ;;  %v2057_v59 = vmul.f32 0.2, %v8432_v20  ;;  %v10093_v61 = vadd.f32 %v1799_v42, %v9499_v11  ;;  %3215 = vmatmul.mubr.bf16.gmra.mrb[112].mxu0 %v2385_v40  ;;  %3601 = vmatmul.mubr.bf16.gmra.mrb[112].mxu1 %v2385_v40  ;;  %v2184_v52 = vsel %vm1928_vm2, %v8431_v9, %v2056_v1 }
 0x23f   :  { %12674 = vst [vmem:[#allocation21_spill] sm:$0xff] %v10084_v5  ;;  %12675 = vst [vmem:[#allocation69_spill] sm:$0xff] %v10087_v55  ;;  %vm1933_vm4 = vcmp.ge.f32.partialorder %v8434_v36, 0.0  ;;  %v2061_v63 = vmul.f32 0.2, %v8434_v36  ;;  %vm1929_vm5 = vcmp.ge.f32.partialorder %v8432_v20, 0.0  ;;  %v8435_v43 = vadd.f32 %v1419_v53, %v9496_v10 }
 0x240   :  { %12676 = vst [vmem:[#allocation70_spill] sm:$0xff] %v10090_v21  ;;  %12677 = vst [vmem:[#allocation71_spill] sm:$0xff] %v10093_v61  ;;  %v1421_v47 = vpop.f32.mrb[57].mxu0  ;;  %v1807_v41 = vpop.f32.mrb[57].mxu1  ;;  %v2188_v49 = vsel %vm1932_vm3, %v8433_v8, %v2060_v31  ;;  %v10098_v48 = vmul.f32 0.2, %v10061_v51  ;;  %v10119_v1 = vadd.f32 %v1801_v37, %v9505_v15  ;;  %v2185_v31 = vsel %vm1929_vm5, %v8432_v20, %v2057_v59 }
 0x241   :  { %v10101_v17 = vmul.f32 0.2, %v10071_v29  ;;  %v1423_v42 = vpop.f32.mrb[58].mxu0  ;;  %v1809_v5 = vpop.f32.mrb[58].mxu1  ;;  %v2189_v60 = vsel %vm1933_vm4, %v8434_v36, %v2061_v63  ;;  %v2389_v57 = vpack.c.bf16 %v2188_v49, %v2184_v52  ;;  %v10104_v40 = vmul.f32 0.2, %v10081_v25 }
 0x242   :  { %12678 = vst [vmem:[#allocation72_spill] sm:$0xff] %v10098_v48  ;;  %v10107_v53 = vmul.f32 0.2, %v10087_v55  ;;  %v10110_v50 = vmul.f32 0.2, %v10090_v21  ;;  %v10113_v9 = vadd.f32 %v1421_v47, %v9502_v12  ;;  %v12684_v63 = vld [vmem:[#allocation20_spill] sm:$0xff]  ;;  %v10124_v52 = vadd.f32 %v1805_v39, %v9499_v11 }
 0x243   :  { %12679 = vst [vmem:[#allocation73_spill] sm:$0xff] %v10101_v17  ;;  %12680 = vst [vmem:[#allocation74_spill] sm:$0xff] %v10104_v40  ;;  %v10116_v8 = vmul.f32 0.2, %v10093_v61  ;;  %v2064_v36 = vmul.f32 0.2, %v8435_v43  ;;  %v8437_v49 = vadd.f32 %v1423_v42, %v9496_v10  ;;  %v10131_v37 = vadd.f32 %v1807_v41, %v9505_v15 }
 0x244   :  { %12681 = vst [vmem:[#allocation75_spill] sm:$0xff] %v10107_v53  ;;  %12682 = vst [vmem:[#allocation76_spill] sm:$0xff] %v10110_v50  ;;  %vm1850_vm6 = vcmp.ge.f32.partialorder %v12684_v63, 0.0  ;;  %vm1936_vm7 = vcmp.ge.f32.partialorder %v8435_v43, 0.0  ;;  %v1425_v53 = vpop.f32.mrb[59].mxu0  ;;  %v1811_v47 = vpop.f32.mrb[59].mxu1  ;;  %v2390_v50 = vpack.c.bf16 %v2189_v60, %v2185_v31 }
 0x245   :  { %12683 = vst [vmem:[#allocation77_spill] sm:$0xff] %v10116_v8  ;;  %vm1854_vm8 = vcmp.ge.f32.partialorder %v9702_v23, 0.0  ;;  %vm1859_vm9 = vcmp.ge.f32.partialorder %v9722_v19, 0.0  ;;  %vm1863_vm10 = vcmp.ge.f32.partialorder %v9731_v28, 0.0  ;;  %v8438_v20 = vadd.f32 %v1425_v53, %v9502_v12  ;;  %v12685_v39 = vld [vmem:[#allocation26_spill] sm:$0xff]  ;;  %v12686_v17 = vld [vmem:[#allocation28_spill] sm:$0xff] }
 0x246   :  { %v1429_v59 = vpop.f32.mrb[60].mxu0  ;;  %v1815_v8 = vpop.f32.mrb[60].mxu1  ;;  %v2107_v42 = vsel %vm1851_vm0, %v9694_v46, %v12685_v39  ;;  %v2111_v60 = vsel %vm1855_vm1, %v9710_v32, %v12686_v17  ;;  %vm1937_vm11 = vcmp.ge.f32.partialorder %v10113_v9, 0.0  ;;  %v2065_v31 = vmul.f32 0.2, %v10113_v9  ;;  %3224 = vmatprep.mubr.bf16.mxu0 %v2390_v50  ;;  %3610 = vmatprep.mubr.bf16.mxu1 %v2390_v50  ;;  %v12687_v53 = vld [vmem:[#allocation24_spill] sm:$0xff] }
 0x247   :  { %vm1940_vm12 = vcmp.ge.f32.partialorder %v8437_v49, 0.0  ;;  %v2068_v41 = vmul.f32 0.2, %v8437_v49  ;;  %vm1858_vm13 = vcmp.ge.f32.partialorder %v12687_v53, 0.0  ;;  %v12688_v40 = vld [vmem:[#allocation25_spill] sm:$0xff]  ;;  %vm1867_vm15 = vcmp.ge.f32.partialorder %v9788_v54, 0.0  ;;  %3225 = vmatmul.mubr.bf16.gmra.mrb[116].mxu0 %v2389_v57  ;;  %3611 = vmatmul.mubr.bf16.gmra.mrb[116].mxu1 %v2389_v57 }
 0x248   :  { %vm1862_vm14 = vcmp.ge.f32.partialorder %v12688_v40, 0.0  ;;  %v10148_v46 = vadd.f32 %v1809_v5, %v9499_v11  ;;  %vm1941_vm0 = vcmp.ge.f32.partialorder %v8438_v20, 0.0  ;;  %v2069_v39 = vmul.f32 0.2, %v8438_v20  ;;  %v1431_v48 = vpop.f32.mrb[61].mxu0  ;;  %v1817_v5 = vpop.f32.mrb[61].mxu1 }
 0x249   :  { %v2192_v32 = vsel %vm1936_vm7, %v8435_v43, %v2064_v36  ;;  %v10155_v50 = vadd.f32 %v1811_v47, %v9505_v15  ;;  %v8439_v17 = vadd.f32 %v1429_v59, %v9496_v10  ;;  %v2196_v61 = vsel %vm1940_vm12, %v8437_v49, %v2068_v41  ;;  %v1433_v36 = vpop.f32.mrb[62].mxu0  ;;  %v1819_v21 = vpop.f32.mrb[62].mxu1 }
 0x24a   :  { %v10159_v55 = vpack.c.bf16 %v2111_v60, %v2107_v42  ;;  %v10163_v57 = vmul.f32 0.2, %v10119_v1  ;;  %v8440_v43 = vadd.f32 %v1431_v48, %v9502_v12  ;;  %v2197_v47 = vsel %vm1941_vm0, %v8438_v20, %v2069_v39  ;;  %v1435_v39 = vpop.f32.mrb[63].mxu0 }
 0x24b   :  { %v2393_v29 = vpack.c.bf16 %v2196_v61, %v2192_v32  ;;  %v10172_v49 = vmul.f32 0.2, %v10124_v52  ;;  %v10175_v59 = vmul.f32 0.2, %v10131_v37  ;;  %v2072_v48 = vmul.f32 0.2, %v8439_v17 }
 0x24c   :  { %12689 = vst [vmem:[#allocation20_spill] sm:$0xff] %v10159_v55  ;;  %v10180_v61 = vmul.f32 0.2, %v10148_v46  ;;  %vm1944_vm5 = vcmp.ge.f32.partialorder %v8439_v17, 0.0  ;;  %v2073_v20 = vmul.f32 0.2, %v8440_v43  ;;  %v2193_v42 = vsel %vm1937_vm11, %v10113_v9, %v2065_v31 }
 0x24d   :  { %12690 = vst [vmem:[#allocation26_spill] sm:$0xff] %v10172_v49  ;;  %v10188_v60 = vmul.f32 0.2, %v10155_v50  ;;  %vm1945_vm12 = vcmp.ge.f32.partialorder %v8440_v43, 0.0  ;;  %v8441_v41 = vadd.f32 %v1433_v36, %v9496_v10  ;;  %v1821_v32 = vpop.f32.mrb[63].mxu1  ;;  %v2394_v55 = vpack.c.bf16 %v2197_v47, %v2193_v42  ;;  %v12695_v47 = vld [vmem:[#allocation32_spill] sm:$0xff] }
 0x24e   :  { %12691 = vst [vmem:[#allocation28_spill] sm:$0xff] %v10180_v61  ;;  %v10194_v61 = vadd.f32 %v1815_v8, %v9499_v11  ;;  %v10197_v9 = vadd.f32 %v1817_v5, %v9505_v15  ;;  %v10200_v31 = vadd.f32 %v1819_v21, %v9499_v11  ;;  %v8442_v49 = vadd.f32 %v1435_v39, %v9502_v12  ;;  %v12692_v21 = vld [vmem:[#allocation23_spill] sm:$0xff]  ;;  %v12694_v5 = vld [vmem:[#allocation30_spill] sm:$0xff]  ;;  %v12697_v39 = vld [vmem:[#allocation61_spill] sm:$0xff] }
 0x24f   :  { %vm1894_vm11 = vcmp.ge.f32.partialorder %v9918_v35, 0.0  ;;  %vm1948_vm4 = vcmp.ge.f32.partialorder %v8441_v41, 0.0  ;;  %v2076_v10 = vmul.f32 0.2, %v8441_v41  ;;  %v10207_v36 = vadd.f32 %v1821_v32, %v9505_v15  ;;  %3234 = vmatprep.mubr.bf16.mxu0 %v2394_v55  ;;  %3620 = vmatprep.mubr.bf16.mxu1 %v2394_v55 }
 0x250   :  { %v2200_v8 = vsel %vm1944_vm5, %v8439_v17, %v2072_v48  ;;  %vm1898_vm0 = vcmp.ge.f32.partialorder %v9951_v18, 0.0  ;;  %vm1902_vm1 = vcmp.ge.f32.partialorder %v9959_v3, 0.0  ;;  %vm1949_vm3 = vcmp.ge.f32.partialorder %v8442_v49, 0.0  ;;  %3235 = vmatmul.mubr.bf16.gmra.mrb[120].mxu0 %v2393_v29  ;;  %3621 = vmatmul.mubr.bf16.gmra.mrb[120].mxu1 %v2393_v29  ;;  %v12693_v17 = vld [vmem:[#allocation27_spill] sm:$0xff] }
 0x251   :  { %v2077_v11 = vmul.f32 0.2, %v8442_v49  ;;  %v2201_v12 = vsel %vm1945_vm12, %v8440_v43, %v2073_v20  ;;  %v2106_v15 = vsel %vm1850_vm6, %v12684_v63, %v12692_v21  ;;  %vm1906_vm2 = vcmp.ge.f32.partialorder %v9967_v16, 0.0  ;;  %v12696_v48 = vld [vmem:[#allocation51_spill] sm:$0xff] }
 0x252   :  { %vm1907_vm7 = vcmp.ge.f32.partialorder %v9973_v6, 0.0  ;;  %vm1911_vm5 = vcmp.ge.f32.partialorder %v9985_v14, 0.0  ;;  %v2204_v55 = vsel %vm1948_vm4, %v8441_v41, %v2076_v10  ;;  %v2110_v29 = vsel %vm1854_vm8, %v9702_v23, %v12693_v17  ;;  %v12699_v10 = vld [vmem:[#allocation29_spill] sm:$0xff]  ;;  %v12700_v21 = vld [vmem:[#allocation31_spill] sm:$0xff] }
 0x253   :  { %v2115_v43 = vsel %vm1859_vm9, %v9722_v19, %v12694_v5  ;;  %v2119_v63 = vsel %vm1863_vm10, %v9731_v28, %v12695_v47  ;;  %vm1910_vm6 = vcmp.ge.f32.partialorder %v12696_v48, 0.0  ;;  %vm1915_vm12 = vcmp.ge.f32.partialorder %v10031_v62, 0.0  ;;  %v12698_v19 = vld [vmem:[#allocation62_spill] sm:$0xff]  ;;  %v12705_v17 = vld [vmem:[#allocation33_spill] sm:$0xff]  ;;  %v12709_v5 = vld [vmem:[#allocation68_spill] sm:$0xff] }
 0x254   :  { %vm1919_vm4 = vcmp.ge.f32.partialorder %v10039_v26, 0.0  ;;  %v2205_v20 = vsel %vm1949_vm3, %v8442_v49, %v2077_v11  ;;  %v2397_v42 = vpack.c.bf16 %v2204_v55, %v2200_v8  ;;  %v10237_v23 = vpack.c.bf16 %v2110_v29, %v2106_v15  ;;  %v12701_v8 = vld [vmem:[#allocation34_spill] sm:$0xff]  ;;  %v12702_v15 = vld [vmem:[#allocation63_spill] sm:$0xff]  ;;  %v12703_v55 = vld [vmem:[#allocation36_spill] sm:$0xff] }
 0x255   :  { %v10239_v41 = vpack.c.bf16 %v2119_v63, %v2115_v43  ;;  %vm1914_vm8 = vcmp.ge.f32.partialorder %v12697_v39, 0.0  ;;  %v2398_v32 = vpack.c.bf16 %v2205_v20, %v2201_v12  ;;  %v2114_v28 = vsel %vm1858_vm13, %v12687_v53, %v12699_v10  ;;  %v12707_v29 = vld [vmem:[#allocation35_spill] sm:$0xff]  ;;  %v12710_v43 = vld [vmem:[#allocation70_spill] sm:$0xff]  ;;  %v12713_v10 = vld [vmem:[#allocation69_spill] sm:$0xff] }
 0x256   :  { %v2118_v49 = vsel %vm1862_vm14, %v12688_v40, %v12700_v21  ;;  %v2123_v11 = vsel %vm1867_vm15, %v9788_v54, %v12701_v8  ;;  %vm12704_vm13 = vcmp.ge.f32.partialorder %v9800_v22, 0.0  ;;  %vm12706_vm14 = vcmp.ge.f32.partialorder %v9780_v33, 0.0  ;;  %v12711_v20 = vld [vmem:[#allocation38_spill] sm:$0xff]  ;;  %v12716_v21 = vld [vmem:[#allocation37_spill] sm:$0xff] }
 0x257   :  { %v10258_v12 = vpack.c.bf16 %v2118_v49, %v2114_v28  ;;  %v2127_v53 = vsel %vm12704_vm13, %v9800_v22, %v12703_v55  ;;  %v2122_v40 = vsel %vm12706_vm14, %v9780_v33, %v12705_v17  ;;  %vm12708_vm15 = vcmp.ge.f32.partialorder %v9792_v0, 0.0  ;;  %3244 = vmatprep.mubr.bf16.mxu0 %v2398_v32  ;;  %3630 = vmatprep.mubr.bf16.mxu1 %v2398_v32  ;;  %v12718_v49 = vld [vmem:[#allocation40_spill] sm:$0xff]  ;;  %v12722_v55 = vld [vmem:[#allocation71_spill] sm:$0xff]  ;;  %v12725_v17 = vld [vmem:[#allocation42_spill] sm:$0xff] }
 0x258   :  { %v2126_v54 = vsel %vm12708_vm15, %v9792_v0, %v12707_v29  ;;  %v10275_v47 = vmul.f32 0.2, %v10194_v61  ;;  %v10277_v22 = vpack.c.bf16 %v2127_v53, %v2123_v11  ;;  %vm12712_vm13 = vcmp.ge.f32.partialorder %v9809_v2, 0.0  ;;  %v12714_v0 = vld [vmem:[#allocation41_spill] sm:$0xff]  ;;  %3245 = vmatmul.mubr.bf16.gmra.mrb[124].mxu0 %v2397_v42  ;;  %3631 = vmatmul.mubr.bf16.gmra.mrb[124].mxu1 %v2397_v42 }
 0x259   :  { %v10279_v63 = vpack.c.bf16 %v2126_v54, %v2122_v40  ;;  %v2131_v33 = vsel %vm12712_vm13, %v9809_v2, %v12711_v20  ;;  %vm12715_vm9 = vcmp.ge.f32.partialorder %v9851_v30, 0.0  ;;  %vm12717_vm10 = vcmp.ge.f32.partialorder %v9804_v24, 0.0  ;;  %v12720_v2 = vld [vmem:[#allocation43_spill] sm:$0xff]  ;;  %v12727_v54 = vld [vmem:[#allocation44_spill] sm:$0xff] }
 0x25a   :  { %v2135_v28 = vsel %vm12715_vm9, %v9851_v30, %v12714_v0  ;;  %v2130_v32 = vsel %vm12717_vm10, %v9804_v24, %v12716_v21  ;;  %vm12719_vm3 = vcmp.ge.f32.partialorder %v9845_v56, 0.0  ;;  %vm12721_vm13 = vcmp.ge.f32.partialorder %v9868_v44, 0.0  ;;  %v12723_v24 = vld [vmem:[#allocation45_spill] sm:$0xff]  ;;  %v12729_v20 = vld [vmem:[#allocation48_spill] sm:$0xff]  ;;  %v12731_v0 = vld [vmem:[#allocation19_spill] sm:$0xff] }
 0x25b   :  { %v2134_v8 = vsel %vm12719_vm3, %v9845_v56, %v12718_v49  ;;  %v2139_v11 = vsel %vm12721_vm13, %v9868_v44, %v12720_v2  ;;  %vm1934_vm14 = vcmp.ge.f32.partialorder %v12722_v55, 0.0  ;;  %v10306_v30 = vpack.c.bf16 %v2135_v28, %v2131_v33  ;;  %3287 = vmatprep.mubr.bf16.mxu0 %v12731_v0  ;;  %3673 = vmatprep.mubr.bf16.mxu1 %v12731_v0  ;;  %v12732_v28 = vld [vmem:[#allocation50_spill] sm:$0xff]  ;;  %v12734_v21 = vld [vmem:[#allocation47_spill] sm:$0xff]  ;;  %v12736_v49 = vld [vmem:[#allocation49_spill] sm:$0xff] }
 0x25c   :  { %v10308_v53 = vpack.c.bf16 %v2134_v8, %v2130_v32  ;;  %vm12724_vm10 = vcmp.ge.f32.partialorder %v9876_v4, 0.0  ;;  %vm12726_vm3 = vcmp.ge.f32.partialorder %v9858_v27, 0.0  ;;  %vm1938_vm13 = vcmp.ge.f32.partialorder %v10124_v52, 0.0  ;;  %v12737_v2 = vld [vmem:[#allocation54_spill] sm:$0xff]  ;;  %v12745_v0 = vld [vmem:[#allocation57_spill] sm:$0xff] }
 0x25d   :  { %v2143_v56 = vsel %vm12724_vm10, %v9876_v4, %v12723_v24  ;;  %v2138_v44 = vsel %vm12726_vm3, %v9858_v27, %v12725_v17  ;;  %v2075_v40 = vmul.f32 0.2, %v10197_v9  ;;  %vm12728_vm9 = vcmp.ge.f32.partialorder %v9872_v38, 0.0  ;;  %v12741_v17 = vld [vmem:[#allocation53_spill] sm:$0xff] }
 0x25e   :  { %v10321_v29 = vpack.c.bf16 %v2143_v56, %v2139_v11  ;;  %v2142_v4 = vsel %vm12728_vm9, %v9872_v38, %v12727_v54  ;;  %vm12730_vm10 = vcmp.ge.f32.partialorder %v9913_v7, 0.0  ;;  %v2078_v33 = vmul.f32 0.2, %v10200_v31  ;;  %v12739_v11 = vld [vmem:[#allocation56_spill] sm:$0xff] }
 0x25f   :  { %v2147_v27 = vsel %vm12730_vm10, %v9913_v7, %v12729_v20  ;;  %v10335_v42 = vpack.c.bf16 %v2142_v4, %v2138_v44  ;;  %vm12733_vm15 = vcmp.ge.f32.partialorder %v9931_v45, 0.0  ;;  %vm12735_vm9 = vcmp.ge.f32.partialorder %v9896_v58, 0.0  ;;  %v12743_v4 = vld [vmem:[#allocation58_spill] sm:$0xff]  ;;  %v12744_v20 = vld [vmem:[#allocation60_spill] sm:$0xff] }
 0x260   :  { %v2151_v38 = vsel %vm12733_vm15, %v9931_v45, %v12732_v28  ;;  %v2146_v7 = vsel %vm12735_vm9, %v9896_v58, %v12734_v21  ;;  %vm1946_vm10 = vcmp.ge.f32.partialorder %v10194_v61, 0.0  ;;  %vm1950_vm3 = vcmp.ge.f32.partialorder %v10200_v31, 0.0  ;;  %v12747_v21 = vld [vmem:[#allocation65_spill] sm:$0xff] }
 0x261   :  { %v10347_v32 = vpack.c.bf16 %v2151_v38, %v2147_v27  ;;  %v2150_v8 = vsel %vm1894_vm11, %v9918_v35, %v12736_v49  ;;  %vm12738_vm15 = vcmp.ge.f32.partialorder %v9955_v34, 0.0  ;;  %vm12740_vm9 = vcmp.ge.f32.partialorder %v9963_v13, 0.0  ;;  %v12742_v35 = vld [vmem:[#allocation55_spill] sm:$0xff] }
 0x262   :  { %v2155_v45 = vsel %vm12738_vm15, %v9955_v34, %v12737_v2  ;;  %v2159_v58 = vsel %vm12740_vm9, %v9963_v13, %v12739_v11  ;;  %v10361_v24 = vpack.c.bf16 %v2150_v8, %v2146_v7  ;;  %v2154_v44 = vsel %vm1898_vm0, %v9951_v18, %v12741_v17  ;;  %v12748_v7 = vld [vmem:[#allocation67_spill] sm:$0xff]  ;;  %v12749_v8 = vld [vmem:[#allocation64_spill] sm:$0xff] }
 0x263   :  { %v10363_v56 = vpack.c.bf16 %v2159_v58, %v2155_v45  ;;  %v2158_v54 = vsel %vm1902_vm1, %v9959_v3, %v12742_v35  ;;  %v2163_v13 = vsel %vm1907_vm7, %v9973_v6, %v12743_v4  ;;  %v2167_v27 = vsel %vm1911_vm5, %v9985_v14, %v12744_v20  ;;  %v12746_v3 = vld [vmem:[#allocation59_spill] sm:$0xff]  ;;  %v12752_v11 = vld [vmem:[#allocation72_spill] sm:$0xff]  ;;  %v12754_v58 = vld [vmem:[#allocation74_spill] sm:$0xff] }
 0x264   :  { %v10373_v34 = vpack.c.bf16 %v2158_v54, %v2154_v44  ;;  %v2162_v18 = vsel %vm1906_vm2, %v9967_v16, %v12745_v0  ;;  %v10387_v28 = vpack.c.bf16 %v2167_v27, %v2163_v13  ;;  %v2166_v38 = vsel %vm1910_vm6, %v12696_v48, %v12746_v3  ;;  %v12750_v48 = vld [vmem:[#allocation66_spill] sm:$0xff]  ;;  %v12759_v4 = vld [vmem:[#allocation73_spill] sm:$0xff]  ;;  %v12761_v13 = vld [vmem:[#allocation76_spill] sm:$0xff] }
 0x265   :  { %v2171_v6 = vsel %vm1915_vm12, %v10031_v62, %v12747_v21  ;;  %v2175_v14 = vsel %vm1919_vm4, %v10039_v26, %v12748_v7  ;;  %v10401_v49 = vpack.c.bf16 %v2166_v38, %v2162_v18  ;;  %v2170_v2 = vsel %vm1914_vm8, %v12697_v39, %v12749_v8  ;;  %v12756_v44 = vld [vmem:[#allocation22_spill] sm:$0xff]  ;;  %v12765_v0 = vld [vmem:[#allocation75_spill] sm:$0xff]  ;;  %v12767_v3 = vld [vmem:[#allocation77_spill] sm:$0xff] }
 0x266   :  { %v10403_v16 = vpack.c.bf16 %v2175_v14, %v2171_v6  ;;  %vm12751_vm1 = vcmp.ge.f32.partialorder %v12698_v19, 0.0  ;;  %vm12753_vm2 = vcmp.ge.f32.partialorder %v10061_v51, 0.0  ;;  %vm12755_vm7 = vcmp.ge.f32.partialorder %v10081_v25, 0.0  ;;  %v12770_v6 = vld [vmem:[#allocation26_spill] sm:$0xff]  ;;  %v12771_v7 = vld [vmem:[#allocation28_spill] sm:$0xff] }
 0x267   :  { %v2174_v45 = vsel %vm12751_vm1, %v12698_v19, %v12750_v48  ;;  %v2179_v26 = vsel %vm12753_vm2, %v10061_v51, %v12752_v11  ;;  %v2183_v17 = vsel %vm12755_vm7, %v10081_v25, %v12754_v58  ;;  %vm12757_vm0 = vcmp.ge.f32.partialorder %v12702_v15, 0.0  ;;  %v12758_v19 = vld [vmem:[#allocation18_spill] sm:$0xff] }
 0x268   :  { %v10413_v62 = vpack.c.bf16 %v2174_v45, %v2170_v2  ;;  %v2178_v39 = vsel %vm12757_vm0, %v12702_v15, %v12756_v44  ;;  %v2079_v35 = vmul.f32 0.2, %v10207_v36  ;;  %3288 = vmatmul.mubr.bf16.vlgmr.msra.gmra.mrb[64].mxu0 %v12758_v19  ;;  %3674 = vmatmul.mubr.bf16.vlgmr.msra.gmra.mrb[64].mxu1 %v12758_v19  ;;  %v10430_v54 = vpack.c.bf16 %v2183_v17, %v2179_v26  ;;  %v12763_v15 = vld [vmem:[#allocation39_spill] sm:$0xff]  ;;  %v12774_v8 = vld [vmem:[#allocation46_spill] sm:$0xff]  ;;  %v4218_v2 = vld [vmem:[%s12569_s5] sm:$0xf] }
 0x269   :  { %vm12760_vm11 = vcmp.ge.f32.partialorder %v12709_v5, 0.0  ;;  %vm12762_vm5 = vcmp.ge.f32.partialorder %v12710_v43, 0.0  ;;  %vm1951_vm6 = vcmp.ge.f32.partialorder %v10207_v36, 0.0  ;;  %3297 = vmatprep.mubr.bf16.mxu0 %v12763_v15  ;;  %3683 = vmatprep.mubr.bf16.mxu1 %v12763_v15  ;;  %vm12764_vm12 = vcmp.ge.f32.partialorder %v10119_v1, 0.0  ;;  %s9391_s5 = smov [#allocation9]  }
 0x26a   :  { %v2182_v51 = vsel %vm12760_vm11, %v12709_v5, %v12759_v4  ;;  %v2187_v25 = vsel %vm12762_vm5, %v12710_v43, %v12761_v13  ;;  %v2191_v27 = vsel %vm12764_vm12, %v10119_v1, %v10163_v57  ;;  %vm12766_vm4 = vcmp.ge.f32.partialorder %v12713_v10, 0.0  ;;  %s8048_s19 = sshll.u32 %s9391_s5, 4  ;;  %s8049_s19 = int_to_ptr.vmem [resolvable:$true] %s8048_s19 }
 0x26b   :  { %v2387_v20 = vpack.c.bf16 %v2182_v51, %v2178_v39  ;;  %v2186_v5 = vsel %vm12766_vm4, %v12713_v10, %v12765_v0  ;;  %v2392_v18 = vpack.c.bf16 %v2191_v27, %v2187_v25  ;;  %v2190_v43 = vsel %vm1934_vm14, %v12722_v55, %v12767_v3  ;;  %s9354_s20 = scalar_lea.vmem %s8049_s19, 32  ;;  %p9359_p11 = scmp.lt.s32.totalorder %s8049_s19, %s8049_s19 }
 0x26c   :  { %vm12768_vm8 = vcmp.ge.f32.partialorder %v10131_v37, 0.0  ;;  %vm12769_vm15 = vcmp.ge.f32.partialorder %v10155_v50, 0.0  ;;  %v2391_v57 = vpack.c.bf16 %v2190_v43, %v2186_v5  ;;  %v2194_v10 = vsel %vm1938_vm13, %v10124_v52, %v12770_v6  ;;  %p9355_p10 = scmp.ne.s32.totalorder %s8049_s19, %s9354_s20  ;;  %p9360_p12 = scmp.lt.s32.totalorder %s9354_s20, %s9354_s20 }
 0x26d   :  { %v2195_v38 = vsel %vm12768_vm8, %v10131_v37, %v10175_v59  ;;  %v2199_v1 = vsel %vm12769_vm15, %v10155_v50, %v10188_v60  ;;  %vm12772_vm14 = vcmp.ge.f32.partialorder %v10148_v46, 0.0  ;;  %vm12773_vm9 = vcmp.ge.f32.partialorder %v10197_v9, 0.0 }
 0x26e   :  { %v2396_v21 = vpack.c.bf16 %v2199_v1, %v2195_v38  ;;  %v2198_v55 = vsel %vm12772_vm14, %v10148_v46, %v12771_v7  ;;  %v2203_v37 = vsel %vm12773_vm9, %v10197_v9, %v2075_v40  ;;  %v2207_v50 = vsel %vm1951_vm6, %v10207_v36, %v2079_v35  ;;  %v12775_v9 = vld [vmem:[#allocation52_spill] sm:$0xff]  ;;  %v12776_v36 = vld [vmem:[#allocation21_spill] sm:$0xff]  ;;  %p9361_p13 = por %p9360_p12, %p9359_p11 }
 0x26f   :  { %v2395_v14 = vpack.c.bf16 %v2198_v55, %v2194_v10  ;;  %v2400_v59 = vpack.c.bf16 %v2207_v50, %v2203_v37  ;;  %v2202_v52 = vsel %vm1946_vm10, %v10194_v61, %v10275_v47  ;;  %v2206_v60 = vsel %vm1950_vm3, %v10200_v31, %v2078_v33  ;;  %v12777_v40 = vld [vmem:[#allocation20_spill] sm:$0xff]  ;;  %v12778_v31 = vld [vmem:[#allocation14_spill] sm:$0xff]  ;;  %v12781_v33 = vld [vmem:[#allocation17_spill] sm:$0xff] }
 0x270   :  { %v2399_v46 = vpack.c.bf16 %v2206_v60, %v2202_v52  ;;  %3298 = vmatmul.mubr.bf16.gmra.mrb[68].mxu0 %v12774_v8  ;;  %3684 = vmatmul.mubr.bf16.gmra.mrb[68].mxu1 %v12774_v8  ;;  %v2336_v61 = vld [vmem:[%s12568_s4] sm:$0xf]  ;;  %v10553_v58 = vrot.slane %v4218_v2, %v12778_v31  ;;  %p9362_p0 = pnand %p9361_p13, %p9355_p10 }
 0x271   :  { %3307 = vmatprep.mubr.bf16.mxu0 %v12775_v9  ;;  %3693 = vmatprep.mubr.bf16.mxu1 %v12775_v9 }
 0x278   :  { %3308 = vmatmul.mubr.bf16.gmra.mrb[72].mxu0 %v12776_v36  ;;  %3694 = vmatmul.mubr.bf16.gmra.mrb[72].mxu1 %v12776_v36 }
 0x279   :  { %3317 = vmatprep.mubr.bf16.mxu0 %v12777_v40  ;;  %3703 = vmatprep.mubr.bf16.mxu1 %v12777_v40 }
 0x280   :  { %3318 = vmatmul.mubr.bf16.gmra.mrb[76].mxu0 %v10237_v23  ;;  %3704 = vmatmul.mubr.bf16.gmra.mrb[76].mxu1 %v10237_v23  ;;  %v10532_v23 = vrot.slane %v2336_v61, %v12778_v31 }
 0x281   :  { %3327 = vmatprep.mubr.bf16.mxu0 %v10239_v41  ;;  %3713 = vmatprep.mubr.bf16.mxu1 %v10239_v41  ;;  %v12779_v41 = vld [vmem:[#allocation16_spill] sm:$0xff] }
 0x282   :  { %v10556_v17 = vrot.slane %v4218_v2, %v12779_v41 }
 0x288   :  { %3328 = vmatmul.mubr.bf16.gmra.mrb[80].mxu0 %v10258_v12  ;;  %3714 = vmatmul.mubr.bf16.gmra.mrb[80].mxu1 %v10258_v12  ;;  %v10535_v12 = vrot.slane %v2336_v61, %v12779_v41 }
 0x289   :  { %3337 = vmatprep.mubr.bf16.mxu0 %v10277_v22  ;;  %3723 = vmatprep.mubr.bf16.mxu1 %v10277_v22  ;;  %v12780_v22 = vld [vmem:[#allocation15_spill] sm:$0xff] }
 0x28a   :  { %v10565_v43 = vrot.slane %v4218_v2, %v12780_v22 }
 0x290   :  { %3338 = vmatmul.mubr.bf16.gmra.mrb[84].mxu0 %v10279_v63  ;;  %3724 = vmatmul.mubr.bf16.gmra.mrb[84].mxu1 %v10279_v63  ;;  %v10538_v63 = vrot.slane %v2336_v61, %v12780_v22 }
 0x291   :  { %3347 = vmatprep.mubr.bf16.mxu0 %v10306_v30  ;;  %3733 = vmatprep.mubr.bf16.mxu1 %v10306_v30 }
 0x298   :  { %3348 = vmatmul.mubr.bf16.gmra.mrb[88].mxu0 %v10308_v53  ;;  %3734 = vmatmul.mubr.bf16.gmra.mrb[88].mxu1 %v10308_v53 }
 0x299   :  { %3357 = vmatprep.mubr.bf16.mxu0 %v10321_v29  ;;  %3743 = vmatprep.mubr.bf16.mxu1 %v10321_v29 }
 0x2a0   :  { %3358 = vmatmul.mubr.bf16.gmra.mrb[92].mxu0 %v10335_v42  ;;  %3744 = vmatmul.mubr.bf16.gmra.mrb[92].mxu1 %v10335_v42  ;;  %v10542_v42 = vrot.slane %v2336_v61, %v12781_v33 }
 0x2a1   :  { %3367 = vmatprep.mubr.bf16.mxu0 %v10347_v32  ;;  %3753 = vmatprep.mubr.bf16.mxu1 %v10347_v32 }
 0x2a8   :  { %3368 = vmatmul.mubr.bf16.gmra.mrb[96].mxu0 %v10361_v24  ;;  %3754 = vmatmul.mubr.bf16.gmra.mrb[96].mxu1 %v10361_v24 }
 0x2a9   :  { %3377 = vmatprep.mubr.bf16.mxu0 %v10363_v56  ;;  %3763 = vmatprep.mubr.bf16.mxu1 %v10363_v56 }
 0x2b0   :  { %3378 = vmatmul.mubr.bf16.gmra.mrb[100].mxu0 %v10373_v34  ;;  %3764 = vmatmul.mubr.bf16.gmra.mrb[100].mxu1 %v10373_v34 }
 0x2b1   :  { %3387 = vmatprep.mubr.bf16.mxu0 %v10387_v28  ;;  %3773 = vmatprep.mubr.bf16.mxu1 %v10387_v28 }
 0x2b8   :  { %3388 = vmatmul.mubr.bf16.gmra.mrb[104].mxu0 %v10401_v49  ;;  %3774 = vmatmul.mubr.bf16.gmra.mrb[104].mxu1 %v10401_v49 }
 0x2b9   :  { %3397 = vmatprep.mubr.bf16.mxu0 %v10403_v16  ;;  %3783 = vmatprep.mubr.bf16.mxu1 %v10403_v16 }
 0x2c0   :  { %3398 = vmatmul.mubr.bf16.gmra.mrb[108].mxu0 %v10413_v62  ;;  %3784 = vmatmul.mubr.bf16.gmra.mrb[108].mxu1 %v10413_v62 }
 0x2c1   :  { %3407 = vmatprep.mubr.bf16.mxu0 %v10430_v54  ;;  %3793 = vmatprep.mubr.bf16.mxu1 %v10430_v54 }
 0x2c8   :  { %3408 = vmatmul.mubr.bf16.gmra.mrb[112].mxu0 %v2387_v20  ;;  %3794 = vmatmul.mubr.bf16.gmra.mrb[112].mxu1 %v2387_v20 }
 0x2c9   :  { %3417 = vmatprep.mubr.bf16.mxu0 %v2392_v18  ;;  %3803 = vmatprep.mubr.bf16.mxu1 %v2392_v18 }
 0x2d0   :  { %3418 = vmatmul.mubr.bf16.gmra.mrb[116].mxu0 %v2391_v57  ;;  %3804 = vmatmul.mubr.bf16.gmra.mrb[116].mxu1 %v2391_v57  ;;  %v10569_v57 = vrot.slane %v4218_v2, %v12781_v33 }
 0x2d1   :  { %3427 = vmatprep.mubr.bf16.mxu0 %v2396_v21  ;;  %3813 = vmatprep.mubr.bf16.mxu1 %v2396_v21 }
 0x2d8   :  { %3428 = vmatmul.mubr.bf16.gmra.mrb[120].mxu0 %v2395_v14  ;;  %3814 = vmatmul.mubr.bf16.gmra.mrb[120].mxu1 %v2395_v14 }
 0x2d9   :  { %3437 = vmatprep.mubr.bf16.mxu0 %v2400_v59  ;;  %3823 = vmatprep.mubr.bf16.mxu1 %v2400_v59 }
 0x2e0   :  { %3438 = vmatmul.mubr.bf16.gmra.mrb[124].mxu0 %v2399_v46  ;;  %3824 = vmatmul.mubr.bf16.gmra.mrb[124].mxu1 %v2399_v46 }
 0x33b   :  { %v3289_v47 = vpop.f32.mrb[64].mxu0  ;;  %v3675_v30 = vpop.f32.mrb[64].mxu1 }
 0x33c   :  { %v8507_v53 = vadd.f32 %v3289_v47, %v10532_v23  ;;  %v3291_v29 = vpop.f32.mrb[65].mxu0  ;;  %v3677_v32 = vpop.f32.mrb[65].mxu1  ;;  %v8571_v49 = vadd.f32 %v3675_v30, %v10538_v63 }
 0x33d   :  { %v8508_v24 = vadd.f32 %v3291_v29, %v10535_v12  ;;  %v3293_v56 = vpop.f32.mrb[66].mxu0  ;;  %v3679_v34 = vpop.f32.mrb[66].mxu1  ;;  %v8572_v48 = vadd.f32 %v3677_v32, %v10542_v42 }
 0x33e   :  { %v3962_v28 = vmul.f32 0.2, %v8507_v53  ;;  %vm3834_vm13 = vcmp.ge.f32.partialorder %v8507_v53, 0.0  ;;  %v3295_v45 = vpop.f32.mrb[67].mxu0  ;;  %v3681_v62 = vpop.f32.mrb[67].mxu1  ;;  %v8509_v11 = vadd.f32 %v3293_v56, %v10532_v23  ;;  %vm3836_vm10 = vcmp.ge.f32.partialorder %v8571_v49, 0.0 }
 0x33f   :  { %v3963_v16 = vmul.f32 0.2, %v8508_v24  ;;  %vm3835_vm3 = vcmp.ge.f32.partialorder %v8508_v24, 0.0  ;;  %v8510_v26 = vadd.f32 %v3295_v45, %v10535_v12  ;;  %v3964_v35 = vmul.f32 0.2, %v8571_v49 }
 0x340   :  { %v4090_v44 = vsel %vm3834_vm13, %v8507_v53, %v3962_v28  ;;  %v3965_v19 = vmul.f32 0.2, %v8572_v48  ;;  %v8573_v54 = vadd.f32 %v3679_v34, %v10538_v63  ;;  %v3966_v13 = vmul.f32 0.2, %v8509_v11 }
 0x341   :  { %v4091_v39 = vsel %vm3835_vm3, %v8508_v24, %v3963_v16  ;;  %v3967_v25 = vmul.f32 0.2, %v8510_v26  ;;  %v10560_v15 = vadd.f32 %v3681_v62, %v10542_v42  ;;  %vm3838_vm1 = vcmp.ge.f32.partialorder %v8509_v11, 0.0 }
 0x342   :  { %vm3839_vm2 = vcmp.ge.f32.partialorder %v8510_v26, 0.0  ;;  %v4241_v18 = vmul.f32 %v10553_v58, %v4090_v44  ;;  %v4242_v3 = vmul.f32 %v10556_v17, %v4091_v39  ;;  %vm3837_vm7 = vcmp.ge.f32.partialorder %v8572_v48, 0.0 }
 0x343   :  { %v3299_v4 = vpop.f32.mrb[68].mxu0  ;;  %v3685_v51 = vpop.f32.mrb[68].mxu1  ;;  %vm3840_vm0 = vcmp.ge.f32.partialorder %v8573_v54, 0.0  ;;  %v3968_v38 = vmul.f32 0.2, %v8573_v54  ;;  %v4092_v1 = vsel %vm3836_vm10, %v8571_v49, %v3964_v35  ;;  %v4094_v21 = vsel %vm3838_vm1, %v8509_v11, %v3966_v13 }
 0x344   :  { %v3301_v20 = vpop.f32.mrb[69].mxu0  ;;  %v3687_v27 = vpop.f32.mrb[69].mxu1  ;;  %v4095_v6 = vsel %vm3839_vm2, %v8510_v26, %v3967_v25  ;;  %v8511_v10 = vadd.f32 %v3299_v4, %v10532_v23  ;;  %vm3841_vm11 = vcmp.ge.f32.partialorder %v10560_v15, 0.0  ;;  %v10575_v37 = vadd.f32 %v3685_v51, %v10538_v63 }
 0x345   :  { %v3303_v0 = vpop.f32.mrb[70].mxu0  ;;  %v3689_v5 = vpop.f32.mrb[70].mxu1  ;;  %v4093_v50 = vsel %vm3837_vm7, %v8572_v48, %v3965_v19  ;;  %v4369_v59 = vadd.f32 %v4242_v3, %v4241_v18  ;;  %v3969_v52 = vmul.f32 0.2, %v10560_v15  ;;  %v8512_v60 = vadd.f32 %v3301_v20, %v10535_v12 }
 0x346   :  { %v8513_v7 = vadd.f32 %v3303_v0, %v10532_v23  ;;  %v3305_v55 = vpop.f32.mrb[71].mxu0  ;;  %v3691_v14 = vpop.f32.mrb[71].mxu1  ;;  %v4243_v8 = vmul.f32 %v10565_v43, %v4092_v1  ;;  %v10582_v9 = vmul.f32 %v10553_v58, %v4094_v21  ;;  %v4096_v36 = vsel %vm3840_vm0, %v8573_v54, %v3968_v38 }
 0x347   :  { %v8514_v46 = vadd.f32 %v3305_v55, %v10535_v12  ;;  %v4246_v40 = vmul.f32 %v10556_v17, %v4095_v6  ;;  %v8577_v61 = vadd.f32 %v3689_v5, %v10538_v63  ;;  %vm3842_vm5 = vcmp.ge.f32.partialorder %v8511_v10, 0.0 }
 0x348   :  { %v3974_v31 = vmul.f32 0.2, %v8513_v7  ;;  %v4244_v41 = vmul.f32 %v10569_v57, %v4093_v50  ;;  %v4370_v47 = vadd.f32 %v4369_v59, %v4243_v8  ;;  %v3970_v53 = vmul.f32 0.2, %v8511_v10 }
 0x349   :  { %vm3844_vm6 = vcmp.ge.f32.partialorder %v10575_v37, 0.0  ;;  %v10590_v29 = vadd.f32 %v3687_v27, %v10542_v42  ;;  %vm3846_vm12 = vcmp.ge.f32.partialorder %v8513_v7, 0.0  ;;  %v3971_v24 = vmul.f32 0.2, %v8512_v60 }
 0x34a   :  { %v3975_v56 = vmul.f32 0.2, %v8514_v46  ;;  %v10593_v34 = vadd.f32 %v3691_v14, %v10542_v42  ;;  %v4371_v28 = vadd.f32 %v4370_v47, %v4244_v41  ;;  %v3972_v2 = vmul.f32 0.2, %v10575_v37 }
 0x34b   :  { %v3309_v22 = vpop.f32.mrb[72].mxu0  ;;  %v3695_v30 = vpop.f32.mrb[72].mxu1  ;;  %vm3843_vm4 = vcmp.ge.f32.partialorder %v8512_v60, 0.0  ;;  %v3976_v48 = vmul.f32 0.2, %v8577_v61  ;;  %vm3847_vm8 = vcmp.ge.f32.partialorder %v8514_v46, 0.0  ;;  %v4102_v45 = vsel %vm3846_vm12, %v8513_v7, %v3974_v31 }
 0x34c   :  { %v3311_v33 = vpop.f32.mrb[73].mxu0  ;;  %v3697_v32 = vpop.f32.mrb[73].mxu1  ;;  %vm3848_vm15 = vcmp.ge.f32.partialorder %v8577_v61, 0.0  ;;  %4372 = vadd.xlane.f32.xlu0 %v4371_v28  ;;  %v8515_v62 = vadd.f32 %v3309_v22, %v10532_v23  ;;  %v10598_v11 = vadd.f32 %v3695_v30, %v10538_v63  ;;  %v4098_v26 = vsel %vm3842_vm5, %v8511_v10, %v3970_v53 }
 0x34d   :  { %v3313_v49 = vpop.f32.mrb[74].mxu0  ;;  %v3699_v16 = vpop.f32.mrb[74].mxu1  ;;  %vm3845_vm14 = vcmp.ge.f32.partialorder %v10590_v29, 0.0  ;;  %v3973_v44 = vmul.f32 0.2, %v10590_v29  ;;  %v8516_v39 = vadd.f32 %v3311_v33, %v10535_v12  ;;  %v4099_v54 = vsel %vm3843_vm4, %v8512_v60, %v3971_v24 }
 0x34e   :  { %v3315_v35 = vpop.f32.mrb[75].mxu0  ;;  %v3701_v19 = vpop.f32.mrb[75].mxu1  ;;  %v4103_v4 = vsel %vm3847_vm8, %v8514_v46, %v3975_v56  ;;  %v10605_v51 = vmul.f32 0.2, %v10593_v34  ;;  %v8517_v13 = vadd.f32 %v3313_v49, %v10532_v23  ;;  %v10609_v27 = vmul.f32 %v10553_v58, %v4102_v45 }
 0x34f   :  { %v10612_v0 = vsel %vm3848_vm15, %v8577_v61, %v3976_v48  ;;  %v8518_v5 = vadd.f32 %v3315_v35, %v10535_v12  ;;  %v4097_v18 = vsel %vm3841_vm11, %v10560_v15, %v3969_v52  ;;  %vm3850_vm9 = vcmp.ge.f32.partialorder %v8515_v62, 0.0 }
 0x350   :  { %v3978_v1 = vmul.f32 0.2, %v8515_v62  ;;  %v3980_v21 = vmul.f32 0.2, %v10598_v11  ;;  %v10622_v6 = vadd.f32 %v3697_v32, %v10542_v42  ;;  %v10625_v10 = vmul.f32 %v10556_v17, %v4103_v4 }
 0x351   :  { %vm3852_vm13 = vcmp.ge.f32.partialorder %v10598_v11, 0.0  ;;  %vm3851_vm3 = vcmp.ge.f32.partialorder %v8516_v39, 0.0  ;;  %v3979_v7 = vmul.f32 0.2, %v8516_v39  ;;  %vm3849_vm10 = vcmp.ge.f32.partialorder %v10593_v34, 0.0 }
 0x352   :  { %vm3854_vm1 = vcmp.ge.f32.partialorder %v8517_v13, 0.0  ;;  %v8581_v15 = vadd.f32 %v3699_v16, %v10538_v63  ;;  %v4247_v50 = vmul.f32 %v10565_v43, %v4096_v36  ;;  %v4374_v59 = vadd.f32 %v4246_v40, %v10582_v9 }
 0x353   :  { %v3319_v25 = vpop.f32.mrb[76].mxu0  ;;  %v3705_v20 = vpop.f32.mrb[76].mxu1  ;;  %v3982_v46 = vmul.f32 0.2, %v8517_v13  ;;  %v3983_v8 = vmul.f32 0.2, %v8518_v5  ;;  %v4100_v61 = vsel %vm3844_vm6, %v10575_v37, %v3972_v2  ;;  %v4249_v31 = vmul.f32 %v10553_v58, %v4098_v26 }
 0x354   :  { %v3321_v3 = vpop.f32.mrb[77].mxu0  ;;  %v10618_v38 = vpop.f32.mrb[77].mxu1  ;;  %vm3853_vm2 = vcmp.ge.f32.partialorder %v10622_v6, 0.0  ;;  %vm3855_vm7 = vcmp.ge.f32.partialorder %v8518_v5, 0.0  ;;  %v4248_v41 = vmul.f32 %v10569_v57, %v4097_v18  ;;  %v4375_v47 = vadd.f32 %v4374_v59, %v4247_v50 }
 0x355   :  { %v3323_v55 = vpop.f32.mrb[78].mxu0  ;;  %v3709_v14 = vpop.f32.mrb[78].mxu1  ;;  %v4250_v36 = vmul.f32 %v10556_v17, %v4099_v54  ;;  %v4106_v9 = vsel %vm3850_vm9, %v8515_v62, %v3978_v1  ;;  %v4107_v40 = vsel %vm3851_vm3, %v8516_v39, %v3979_v7  ;;  %v3981_v22 = vmul.f32 0.2, %v10622_v6 }
 0x356   :  { %v3325_v52 = vpop.f32.mrb[79].mxu0  ;;  %v10632_v60 = vpop.f32.mrb[79].mxu1  ;;  %v4101_v37 = vsel %vm3845_vm14, %v10590_v29, %v3973_v44  ;;  %v10648_v30 = vadd.f32 %v3701_v19, %v10542_v42  ;;  %v4376_v53 = vadd.f32 %v4375_v47, %v4248_v41  ;;  %v4251_v33 = vmul.f32 %v10565_v43, %v4100_v61 }
 0x357   :  { %v4379_v32 = vadd.f32 %v4250_v36, %v4249_v31  ;;  %v4110_v28 = vsel %vm3854_vm1, %v8517_v13, %v3982_v46  ;;  %vm3856_vm0 = vcmp.ge.f32.partialorder %v8581_v15, 0.0  ;;  %v3984_v49 = vmul.f32 0.2, %v8581_v15 }
 0x358   :  { %v4111_v16 = vsel %vm3855_vm7, %v8518_v5, %v3983_v8  ;;  %4377 = vadd.xlane.f32.xlu0 %v4376_v53  ;;  %v4252_v29 = vmul.f32 %v10569_v57, %v4101_v37  ;;  %v8519_v48 = vadd.f32 %v3319_v25, %v10532_v23  ;;  %v8583_v45 = vadd.f32 %v3705_v20, %v10538_v63 }
 0x359   :  { %v4380_v2 = vadd.f32 %v4379_v32, %v4251_v33  ;;  %v4257_v44 = vmul.f32 %v10553_v58, %v4106_v9  ;;  %v4108_v39 = vsel %vm3852_vm13, %v10598_v11, %v3980_v21  ;;  %v4258_v35 = vmul.f32 %v10556_v17, %v4107_v40 }
 0x35a   :  { %v8520_v19 = vadd.f32 %v3321_v3, %v10535_v12  ;;  %vm3857_vm11 = vcmp.ge.f32.partialorder %v10648_v30, 0.0  ;;  %v3985_v13 = vmul.f32 0.2, %v10648_v30  ;;  %v8521_v20 = vadd.f32 %v3323_v55, %v10532_v23 }
 0x35b   :  { %v10651_v24 = vpop.f32.mrb[80].mxu0  ;;  %v10653_v56 = vpop.f32.mrb[80].mxu1  ;;  %v4381_v25 = vadd.f32 %v4380_v2, %v4252_v29  ;;  %v4261_v11 = vmul.f32 %v10553_v58, %v4110_v28  ;;  %v4112_v1 = vsel %vm3856_vm0, %v8581_v15, %v3984_v49  ;;  %v4262_v3 = vmul.f32 %v10556_v17, %v4111_v16 }
 0x35c   :  { %v10660_v62 = vpop.f32.mrb[81].mxu0  ;;  %v10662_v26 = vpop.f32.mrb[81].mxu1  ;;  %v10686_v21 = vadd.f32 %v10618_v38, %v10542_v42  ;;  %vm3858_vm5 = vcmp.ge.f32.partialorder %v8519_v48, 0.0  ;;  %v3986_v7 = vmul.f32 0.2, %v8519_v48  ;;  %vm3860_vm6 = vcmp.ge.f32.partialorder %v8583_v45, 0.0 }
 0x35d   :  { %v10670_v54 = vpop.f32.mrb[82].mxu0  ;;  %v10672_v4 = vpop.f32.mrb[82].mxu1  ;;  %4382 = vadd.xlane.f32.xlu1 %v4381_v25  ;;  %v8585_v55 = vadd.f32 %v3709_v14, %v10538_v63  ;;  %v3988_v50 = vmul.f32 0.2, %v8583_v45  ;;  %v3987_v59 = vmul.f32 0.2, %v8520_v19  ;;  %v8522_v46 = vadd.f32 %v3325_v52, %v10535_v12 }
 0x35e   :  { %v10677_v5 = vpop.f32.mrb[83].mxu0  ;;  %v10679_v18 = vpop.f32.mrb[83].mxu1  ;;  %v4105_v15 = vsel %vm3849_vm10, %v10593_v34, %v10605_v51  ;;  %vm3859_vm12 = vcmp.ge.f32.partialorder %v8520_v19, 0.0  ;;  %v3990_v8 = vmul.f32 0.2, %v8521_v20  ;;  %v4255_v38 = vmul.f32 %v10565_v43, %v10612_v0 }
 0x35f   :  { %v4384_v61 = vadd.f32 %v10625_v10, %v10609_v27  ;;  %vm3862_vm4 = vcmp.ge.f32.partialorder %v8521_v20, 0.0  ;;  %v4109_v52 = vsel %vm3853_vm2, %v10622_v6, %v3981_v22  ;;  %v4259_v41 = vmul.f32 %v10565_v43, %v4108_v39 }
 0x360   :  { %v4389_v34 = vadd.f32 %v4258_v35, %v4257_v44  ;;  %v4114_v0 = vsel %vm3858_vm5, %v8519_v48, %v3986_v7  ;;  %vm3861_vm8 = vcmp.ge.f32.partialorder %v10686_v21, 0.0  ;;  %v4256_v27 = vmul.f32 %v10569_v57, %v4105_v15 }
 0x361   :  { %v4385_v10 = vadd.f32 %v4384_v61, %v4255_v38  ;;  %v4115_v6 = vsel %vm3859_vm12, %v8520_v19, %v3987_v59  ;;  %v3991_v40 = vmul.f32 0.2, %v8522_v46  ;;  %v4260_v22 = vmul.f32 %v10569_v57, %v4109_v52 }
 0x362   :  { %v4390_v37 = vadd.f32 %v4389_v34, %v4259_v41  ;;  %v4118_v32 = vsel %vm3862_vm4, %v8521_v20, %v3990_v8  ;;  %vm3863_vm15 = vcmp.ge.f32.partialorder %v8522_v46, 0.0  ;;  %v8523_v49 = vadd.f32 %v10651_v24, %v10532_v23 }
 0x363   :  { %v10698_v31 = vpop.f32.mrb[84].mxu0  ;;  %v10700_v14 = vpop.f32.mrb[84].mxu1  ;;  %v4386_v28 = vadd.f32 %v4385_v10, %v4256_v27  ;;  %v4116_v16 = vsel %vm3860_vm6, %v8583_v45, %v3988_v50  ;;  %v3989_v29 = vmul.f32 0.2, %v10686_v21  ;;  %v3992_v2 = vmul.f32 0.2, %v8585_v55 }
 0x364   :  { %v10706_v51 = vpop.f32.mrb[85].mxu0  ;;  %v10708_v47 = vpop.f32.mrb[85].mxu1  ;;  %v4391_v48 = vadd.f32 %v4390_v37, %v4260_v22  ;;  %v4265_v44 = vmul.f32 %v10553_v58, %v4114_v0  ;;  %vm3864_vm14 = vcmp.ge.f32.partialorder %v8585_v55, 0.0  ;;  %v10731_v39 = vadd.f32 %v10632_v60, %v10542_v42 }
 0x365   :  { %v10713_v36 = vpop.f32.mrb[86].mxu0  ;;  %v10715_v9 = vpop.f32.mrb[86].mxu1  ;;  %4387 = vadd.xlane.f32.xlu1 %v4386_v28  ;;  %v8524_v35 = vadd.f32 %v10660_v62, %v10535_v12  ;;  %v4266_v19 = vmul.f32 %v10556_v17, %v4115_v6  ;;  %v10737_v24 = vmul.f32 %v10553_v58, %v4118_v32  ;;  %v4119_v45 = vsel %vm3863_vm15, %v8522_v46, %v3991_v40 }
 0x366   :  { %v10719_v53 = vpop.f32.mrb[87].mxu0  ;;  %v10721_v33 = vpop.f32.mrb[87].mxu1  ;;  %4392 = vadd.xlane.f32.xlu0 %v4391_v48  ;;  %v4113_v25 = vsel %vm3857_vm11, %v10648_v30, %v3985_v13  ;;  %v3994_v20 = vmul.f32 0.2, %v8523_v49  ;;  %v8587_v60 = vadd.f32 %v10653_v56, %v10538_v63  ;;  %v4263_v7 = vmul.f32 %v10565_v43, %v4112_v1 }
 0x367   :  { %v4394_v50 = vadd.f32 %v4262_v3, %v4261_v11  ;;  %v4120_v15 = vsel %vm3864_vm14, %v8585_v55, %v3992_v2  ;;  %vm3866_vm9 = vcmp.ge.f32.partialorder %v8523_v49, 0.0  ;;  %v10751_v46 = vadd.f32 %v10662_v26, %v10542_v42 }
 0x368   :  { %v8525_v30 = vadd.f32 %v10670_v54, %v10532_v23  ;;  %vm3865_vm13 = vcmp.ge.f32.partialorder %v10731_v39, 0.0  ;;  %v3995_v56 = vmul.f32 0.2, %v8524_v35  ;;  %v4264_v11 = vmul.f32 %v10569_v57, %v4113_v25 }
 0x369   :  { %v4395_v1 = vadd.f32 %v4394_v50, %v4263_v7  ;;  %v4270_v26 = vmul.f32 %v10556_v17, %v4119_v45  ;;  %v3993_v38 = vmul.f32 0.2, %v10731_v39  ;;  %vm3867_vm3 = vcmp.ge.f32.partialorder %v8524_v35, 0.0 }
 0x36a   :  { %v8526_v54 = vadd.f32 %v10677_v5, %v10535_v12  ;;  %v4122_v61 = vsel %vm3866_vm9, %v8523_v49, %v3994_v20  ;;  %vm3868_vm10 = vcmp.ge.f32.partialorder %v8587_v60, 0.0  ;;  %v3996_v52 = vmul.f32 0.2, %v8587_v60 }
 0x36b   :  { %v10745_v59 = vpop.f32.mrb[88].mxu0  ;;  %v10747_v62 = vpop.f32.mrb[88].mxu1  ;;  %v4396_v41 = vadd.f32 %v4395_v1, %v4264_v11  ;;  %vm3869_vm1 = vcmp.ge.f32.partialorder %v10751_v46, 0.0  ;;  %v3998_v27 = vmul.f32 0.2, %v8525_v30  ;;  %v8589_v10 = vadd.f32 %v10672_v4, %v10538_v63 }
 0x36c   :  { %v10755_v13 = vpop.f32.mrb[89].mxu0  ;;  %v10757_v8 = vpop.f32.mrb[89].mxu1  ;;  %v4117_v6 = vsel %vm3861_vm8, %v10686_v21, %v3989_v29  ;;  %v4123_v40 = vsel %vm3867_vm3, %v8524_v35, %v3995_v56  ;;  %vm3870_vm2 = vcmp.ge.f32.partialorder %v8525_v30, 0.0  ;;  %v4267_v5 = vmul.f32 %v10565_v43, %v4116_v16 }
 0x36d   :  { %v10761_v3 = vpop.f32.mrb[90].mxu0  ;;  %v10763_v55 = vpop.f32.mrb[90].mxu1  ;;  %4397 = vadd.xlane.f32.xlu1 %v4396_v41  ;;  %v4399_v22 = vadd.f32 %v4266_v19, %v4265_v44  ;;  %v4273_v37 = vmul.f32 %v10553_v58, %v4122_v61  ;;  %v3997_v32 = vmul.f32 0.2, %v10751_v46  ;;  %v3999_v28 = vmul.f32 0.2, %v8526_v54 }
 0x36e   :  { %v10769_v34 = vpop.f32.mrb[91].mxu0  ;;  %v10771_v0 = vpop.f32.mrb[91].mxu1  ;;  %v10784_v49 = vadd.f32 %v10679_v18, %v10542_v42  ;;  %vm3871_vm7 = vcmp.ge.f32.partialorder %v8526_v54, 0.0  ;;  %v4268_v4 = vmul.f32 %v10569_v57, %v4117_v6  ;;  %v8527_v21 = vadd.f32 %v10698_v31, %v10532_v23 }
 0x36f   :  { %v4400_v2 = vadd.f32 %v4399_v22, %v4267_v5  ;;  %v4124_v48 = vsel %vm3868_vm10, %v8587_v60, %v3996_v52  ;;  %v4274_v44 = vmul.f32 %v10556_v17, %v4123_v40  ;;  %v4126_v35 = vsel %vm3870_vm2, %v8525_v30, %v3998_v27 }
 0x370   :  { %vm3872_vm0 = vcmp.ge.f32.partialorder %v8589_v10, 0.0  ;;  %v4000_v19 = vmul.f32 0.2, %v8589_v10  ;;  %v8528_v45 = vadd.f32 %v10706_v51, %v10535_v12  ;;  %v4121_v25 = vsel %vm3865_vm13, %v10731_v39, %v3993_v38 }
 0x371   :  { %v4401_v18 = vadd.f32 %v4400_v2, %v4268_v4  ;;  %v4127_v7 = vsel %vm3871_vm7, %v8526_v54, %v3999_v28  ;;  %vm3873_vm11 = vcmp.ge.f32.partialorder %v10784_v49, 0.0  ;;  %v8591_v60 = vadd.f32 %v10700_v14, %v10538_v63 }
 0x372   :  { %v4271_v50 = vmul.f32 %v10565_v43, %v4120_v15  ;;  %v4404_v30 = vadd.f32 %v4270_v26, %v10737_v24  ;;  %v4277_v39 = vmul.f32 %v10553_v58, %v4126_v35  ;;  %v4001_v11 = vmul.f32 0.2, %v10784_v49 }
 0x373   :  { %v10789_v29 = vpop.f32.mrb[92].mxu0  ;;  %v10791_v16 = vpop.f32.mrb[92].mxu1  ;;  %4402 = vadd.xlane.f32.xlu0 %v4401_v18  ;;  %v4002_v1 = vmul.f32 0.2, %v8527_v21  ;;  %v10818_v38 = vadd.f32 %v10708_v47, %v10542_v42  ;;  %vm3874_vm5 = vcmp.ge.f32.partialorder %v8527_v21, 0.0  ;;  %v4272_v24 = vmul.f32 %v10569_v57, %v4121_v25 }
 0x374   :  { %v10800_v31 = vpop.f32.mrb[93].mxu0  ;;  %v10802_v20 = vpop.f32.mrb[93].mxu1  ;;  %v4405_v15 = vadd.f32 %v4404_v30, %v4271_v50  ;;  %v8529_v26 = vadd.f32 %v10713_v36, %v10532_v23  ;;  %v4128_v61 = vsel %vm3872_vm0, %v8589_v10, %v4000_v19  ;;  %v4278_v52 = vmul.f32 %v10556_v17, %v4127_v7 }
 0x375   :  { %v10810_v51 = vpop.f32.mrb[94].mxu0  ;;  %v10812_v56 = vpop.f32.mrb[94].mxu1  ;;  %v4003_v41 = vmul.f32 0.2, %v8528_v45  ;;  %v8530_v47 = vadd.f32 %v10719_v53, %v10535_v12  ;;  %vm3876_vm6 = vcmp.ge.f32.partialorder %v8591_v60, 0.0  ;;  %vm3875_vm12 = vcmp.ge.f32.partialorder %v8528_v45, 0.0 }
 0x376   :  { %v10820_v54 = vpop.f32.mrb[95].mxu0  ;;  %v10822_v14 = vpop.f32.mrb[95].mxu1  ;;  %v4004_v27 = vmul.f32 0.2, %v8591_v60  ;;  %v4406_v6 = vadd.f32 %v4405_v15, %v4272_v24  ;;  %v4130_v40 = vsel %vm3874_vm5, %v8527_v21, %v4002_v1  ;;  %v10832_v5 = vmul.f32 0.2, %v10818_v38 }
 0x377   :  { %v8593_v22 = vadd.f32 %v10715_v9, %v10538_v63  ;;  %v4125_v36 = vsel %vm3869_vm1, %v10751_v46, %v3997_v32  ;;  %vm3877_vm4 = vcmp.ge.f32.partialorder %v10818_v38, 0.0  ;;  %vm3878_vm8 = vcmp.ge.f32.partialorder %v8529_v26, 0.0 }
 0x378   :  { %4407 = vadd.xlane.f32.xlu1 %v4406_v6  ;;  %v4275_v53 = vmul.f32 %v10565_v43, %v4124_v48  ;;  %v4409_v4 = vadd.f32 %v4274_v44, %v4273_v37  ;;  %v8531_v2 = vadd.f32 %v10745_v59, %v10532_v23  ;;  %v4131_v46 = vsel %vm3875_vm12, %v8528_v45, %v4003_v41 }
 0x379   :  { %v4006_v32 = vmul.f32 0.2, %v8529_v26  ;;  %v4007_v35 = vmul.f32 0.2, %v8530_v47  ;;  %v10854_v19 = vadd.f32 %v10721_v33, %v10542_v42  ;;  %vm3879_vm15 = vcmp.ge.f32.partialorder %v8530_v47, 0.0 }
 0x37a   :  { %v4276_v37 = vmul.f32 %v10569_v57, %v4125_v36  ;;  %v4410_v59 = vadd.f32 %v4409_v4, %v4275_v53  ;;  %v8532_v48 = vadd.f32 %v10755_v13, %v10535_v12  ;;  %v4281_v7 = vmul.f32 %v10553_v58, %v4130_v40 }
 0x37b   :  { %v10839_v10 = vpop.f32.mrb[96].mxu0  ;;  %v10841_v28 = vpop.f32.mrb[96].mxu1  ;;  %v4132_v33 = vsel %vm3876_vm6, %v8591_v60, %v4004_v27  ;;  %v4008_v50 = vmul.f32 0.2, %v8593_v22  ;;  %v4010_v30 = vmul.f32 0.2, %v8531_v2  ;;  %v4282_v1 = vmul.f32 %v10556_v17, %v4131_v46 }
 0x37c   :  { %v10847_v21 = vpop.f32.mrb[97].mxu0  ;;  %v10849_v9 = vpop.f32.mrb[97].mxu1  ;;  %vm3880_vm14 = vcmp.ge.f32.partialorder %v8593_v22, 0.0  ;;  %v4411_v24 = vadd.f32 %v4410_v59, %v4276_v37  ;;  %vm3882_vm9 = vcmp.ge.f32.partialorder %v8531_v2, 0.0  ;;  %v4134_v15 = vsel %vm3878_vm8, %v8529_v26, %v4006_v32 }
 0x37d   :  { %v10856_v18 = vpop.f32.mrb[98].mxu0  ;;  %v10858_v25 = vpop.f32.mrb[98].mxu1  ;;  %v4135_v41 = vsel %vm3879_vm15, %v8530_v47, %v4007_v35  ;;  %vm3881_vm13 = vcmp.ge.f32.partialorder %v10854_v19, 0.0  ;;  %v8595_v13 = vadd.f32 %v10747_v62, %v10538_v63  ;;  %v4129_v6 = vsel %vm3873_vm11, %v10784_v49, %v4001_v11 }
 0x37e   :  { %v10863_v44 = vpop.f32.mrb[99].mxu0  ;;  %v10865_v45 = vpop.f32.mrb[99].mxu1  ;;  %4412 = vadd.xlane.f32.xlu0 %v4411_v24  ;;  %v4011_v60 = vmul.f32 0.2, %v8532_v48  ;;  %v10879_v27 = vadd.f32 %v10757_v8, %v10542_v42  ;;  %v4279_v40 = vmul.f32 %v10565_v43, %v4128_v61  ;;  %v4414_v36 = vadd.f32 %v4278_v52, %v4277_v39 }
 0x37f   :  { %v4136_v26 = vsel %vm3880_vm14, %v8593_v22, %v4008_v50  ;;  %v4138_v47 = vsel %vm3882_vm9, %v8531_v2, %v4010_v30  ;;  %vm3883_vm3 = vcmp.ge.f32.partialorder %v8532_v48, 0.0  ;;  %v8533_v53 = vadd.f32 %v10761_v3, %v10532_v23 }
 0x380   :  { %v4285_v49 = vmul.f32 %v10553_v58, %v4134_v15  ;;  %v4009_v11 = vmul.f32 0.2, %v10854_v19  ;;  %v4280_v8 = vmul.f32 %v10569_v57, %v4129_v6  ;;  %v4415_v46 = vadd.f32 %v4414_v36, %v4279_v40 }
 0x381   :  { %v4286_v61 = vmul.f32 %v10556_v17, %v4135_v41  ;;  %vm3884_vm10 = vcmp.ge.f32.partialorder %v8595_v13, 0.0  ;;  %v4012_v52 = vmul.f32 0.2, %v8595_v13  ;;  %v8534_v3 = vadd.f32 %v10769_v34, %v10535_v12 }
 0x382   :  { %v10899_v22 = vmul.f32 %v10553_v58, %v4138_v47  ;;  %v4139_v2 = vsel %vm3883_vm3, %v8532_v48, %v4011_v60  ;;  %v10902_v35 = vmul.f32 0.2, %v10879_v27  ;;  %v4416_v37 = vadd.f32 %v4415_v46, %v4280_v8 }
 0x383   :  { %v10884_v62 = vpop.f32.mrb[100].mxu0  ;;  %v10886_v4 = vpop.f32.mrb[100].mxu1  ;;  %vm3885_vm1 = vcmp.ge.f32.partialorder %v10879_v27, 0.0  ;;  %v4014_v30 = vmul.f32 0.2, %v8533_v53  ;;  %v8597_v24 = vadd.f32 %v10763_v55, %v10538_v63  ;;  %v10913_v34 = vadd.f32 %v10771_v0, %v10542_v42 }
 0x384   :  { %v10891_v32 = vpop.f32.mrb[101].mxu0  ;;  %v10893_v39 = vpop.f32.mrb[101].mxu1  ;;  %v4133_v48 = vsel %vm3877_vm4, %v10818_v38, %v10832_v5  ;;  %4417 = vadd.xlane.f32.xlu1 %v4416_v37  ;;  %vm3886_vm2 = vcmp.ge.f32.partialorder %v8533_v53, 0.0  ;;  %v4283_v6 = vmul.f32 %v10565_v43, %v4132_v33  ;;  %v4419_v60 = vadd.f32 %v4282_v1, %v4281_v7 }
 0x385   :  { %v10904_v59 = vpop.f32.mrb[102].mxu0  ;;  %v10906_v50 = vpop.f32.mrb[102].mxu1  ;;  %v8535_v55 = vadd.f32 %v10789_v29, %v10532_v23  ;;  %v4140_v0 = vsel %vm3884_vm10, %v8595_v13, %v4012_v52  ;;  %v4290_v40 = vmul.f32 %v10556_v17, %v4139_v2  ;;  %vm3887_vm7 = vcmp.ge.f32.partialorder %v8534_v3, 0.0 }
 0x386   :  { %v10919_v15 = vpop.f32.mrb[103].mxu0  ;;  %v10921_v41 = vpop.f32.mrb[103].mxu1  ;;  %v4015_v36 = vmul.f32 0.2, %v8534_v3  ;;  %v4284_v38 = vmul.f32 %v10569_v57, %v4133_v48  ;;  %v4420_v5 = vadd.f32 %v4419_v60, %v4283_v6  ;;  %v8536_v8 = vadd.f32 %v10800_v31, %v10535_v12 }
 0x387   :  { %v4018_v47 = vmul.f32 0.2, %v8535_v55  ;;  %v4142_v46 = vsel %vm3886_vm2, %v8533_v53, %v4014_v30  ;;  %vm3888_vm0 = vcmp.ge.f32.partialorder %v8597_v24, 0.0  ;;  %v4016_v33 = vmul.f32 0.2, %v8597_v24 }
 0x388   :  { %vm3890_vm11 = vcmp.ge.f32.partialorder %v8535_v55, 0.0  ;;  %v10932_v7 = vmul.f32 0.2, %v10913_v34  ;;  %v4421_v29 = vadd.f32 %v4420_v5, %v4284_v38  ;;  %v8599_v1 = vadd.f32 %v10791_v16, %v10538_v63 }
 0x389   :  { %v4137_v13 = vsel %vm3881_vm13, %v10854_v19, %v4009_v11  ;;  %v4143_v31 = vsel %vm3887_vm7, %v8534_v3, %v4015_v36  ;;  %vm3889_vm5 = vcmp.ge.f32.partialorder %v10913_v34, 0.0  ;;  %v10947_v53 = vadd.f32 %v10802_v20, %v10542_v42 }
 0x38a   :  { %v4287_v37 = vmul.f32 %v10565_v43, %v4136_v26  ;;  %v4424_v30 = vadd.f32 %v4286_v61, %v4285_v49  ;;  %v4293_v19 = vmul.f32 %v10553_v58, %v4142_v46  ;;  %4422 = vadd.xlane.f32.xlu0 %v4421_v29  ;;  %v4146_v11 = vsel %vm3890_vm11, %v8535_v55, %v4018_v47 }
 0x38b   :  { %v10939_v52 = vpop.f32.mrb[104].mxu0  ;;  %v10941_v2 = vpop.f32.mrb[104].mxu1  ;;  %vm3891_vm6 = vcmp.ge.f32.partialorder %v8536_v8, 0.0  ;;  %v4019_v3 = vmul.f32 0.2, %v8536_v8  ;;  %v4288_v20 = vmul.f32 %v10569_v57, %v4137_v13  ;;  %v8537_v26 = vadd.f32 %v10810_v51, %v10532_v23 }
 0x38c   :  { %v10950_v16 = vpop.f32.mrb[105].mxu0  ;;  %v10952_v48 = vpop.f32.mrb[105].mxu1  ;;  %v4425_v36 = vadd.f32 %v4424_v30, %v4287_v37  ;;  %v8601_v49 = vadd.f32 %v10812_v56, %v10538_v63  ;;  %v4144_v55 = vsel %vm3888_vm0, %v8597_v24, %v4016_v33  ;;  %v4294_v5 = vmul.f32 %v10556_v17, %v4143_v31 }
 0x38d   :  { %v10956_v6 = vpop.f32.mrb[106].mxu0  ;;  %v10958_v60 = vpop.f32.mrb[106].mxu1  ;;  %vm3892_vm12 = vcmp.ge.f32.partialorder %v8599_v1, 0.0  ;;  %v8538_v47 = vadd.f32 %v10820_v54, %v10535_v12  ;;  %v10974_v46 = vmul.f32 %v10553_v58, %v4146_v11  ;;  %v4020_v29 = vmul.f32 0.2, %v8599_v1 }
 0x38e   :  { %v10965_v61 = vpop.f32.mrb[107].mxu0  ;;  %v10967_v38 = vpop.f32.mrb[107].mxu1  ;;  %v10977_v51 = vmul.f32 0.2, %v10947_v53  ;;  %v4426_v56 = vadd.f32 %v4425_v36, %v4288_v20  ;;  %v4147_v13 = vsel %vm3891_vm6, %v8536_v8, %v4019_v3  ;;  %v10982_v37 = vadd.f32 %v10822_v14, %v10542_v42 }
 0x38f   :  { %v4141_v24 = vsel %vm3885_vm1, %v10879_v27, %v10902_v35  ;;  %v4291_v54 = vmul.f32 %v10565_v43, %v4140_v0  ;;  %vm3893_vm4 = vcmp.ge.f32.partialorder %v10947_v53, 0.0  ;;  %v4022_v33 = vmul.f32 0.2, %v8537_v26 }
 0x390   :  { %12782 = vst [vmem:[#allocation24_spill] sm:$0xff] %v10982_v37  ;;  %4427 = vadd.xlane.f32.xlu1 %v4426_v56  ;;  %v4024_v31 = vmul.f32 0.2, %v8601_v49  ;;  %v4429_v30 = vadd.f32 %v4290_v40, %v10899_v22  ;;  %v8539_v8 = vadd.f32 %v10839_v10, %v10532_v23  ;;  %vm3894_vm8 = vcmp.ge.f32.partialorder %v8537_v26, 0.0 }
 0x391   :  { %vm3896_vm15 = vcmp.ge.f32.partialorder %v8601_v49, 0.0  ;;  %v4023_v3 = vmul.f32 0.2, %v8538_v47  ;;  %v8603_v27 = vadd.f32 %v10841_v28, %v10538_v63  ;;  %vm3895_vm14 = vcmp.ge.f32.partialorder %v8538_v47, 0.0 }
 0x392   :  { %v4292_v22 = vmul.f32 %v10569_v57, %v4141_v24  ;;  %v4430_v40 = vadd.f32 %v4429_v30, %v4291_v54  ;;  %v4026_v20 = vmul.f32 0.2, %v8539_v8  ;;  %v4148_v56 = vsel %vm3892_vm12, %v8599_v1, %v4020_v29 }
 0x393   :  { %v10993_v11 = vpop.f32.mrb[108].mxu0  ;;  %v10995_v14 = vpop.f32.mrb[108].mxu1  ;;  %vm3898_vm9 = vcmp.ge.f32.partialorder %v8539_v8, 0.0  ;;  %v8540_v28 = vadd.f32 %v10847_v21, %v10535_v12  ;;  %v11017_v24 = vmul.f32 0.2, %v10982_v37  ;;  %v4151_v1 = vsel %vm3895_vm14, %v8538_v47, %v4023_v3 }
 0x394   :  { %12783 = vst [vmem:[#allocation25_spill] sm:$0xff] %v10995_v14  ;;  %v10999_v35 = vpop.f32.mrb[109].mxu0  ;;  %v11001_v0 = vpop.f32.mrb[109].mxu1  ;;  %v4298_v14 = vmul.f32 %v10556_v17, %v4147_v13  ;;  %v4431_v54 = vadd.f32 %v4430_v40, %v4292_v22  ;;  %v4028_v29 = vmul.f32 0.2, %v8603_v27  ;;  %v11026_v13 = vadd.f32 %v10849_v9, %v10542_v42 }
 0x395   :  { %12784 = vst [vmem:[#allocation23_spill] sm:$0xff] %v10999_v35  ;;  %12785 = vst [vmem:[#allocation27_spill] sm:$0xff] %v11001_v0  ;;  %v11004_v10 = vpop.f32.mrb[110].mxu0  ;;  %v11006_v36 = vpop.f32.mrb[110].mxu1  ;;  %v4150_v35 = vsel %vm3894_vm8, %v8537_v26, %v4022_v33  ;;  %v11014_v0 = vsel %vm3896_vm15, %v8601_v49, %v4024_v31  ;;  %v4145_v21 = vsel %vm3889_vm5, %v10913_v34, %v10932_v7  ;;  %vm3900_vm13 = vcmp.ge.f32.partialorder %v8603_v27, 0.0 }
 0x396   :  { %12786 = vst [vmem:[#allocation30_spill] sm:$0xff] %v11006_v36  ;;  %12787 = vst [vmem:[#allocation32_spill] sm:$0xff] %v11014_v0  ;;  %v11019_v30 = vpop.f32.mrb[111].mxu0  ;;  %v11021_v36 = vpop.f32.mrb[111].mxu1  ;;  %4432 = vadd.xlane.f32.xlu0 %v4431_v54  ;;  %v4154_v26 = vsel %vm3898_vm9, %v8539_v8, %v4026_v20  ;;  %v4295_v49 = vmul.f32 %v10565_v43, %v4144_v55  ;;  %v4434_v33 = vadd.f32 %v4294_v5, %v4293_v19 }
 0x397   :  { %12788 = vst [vmem:[#allocation51_spill] sm:$0xff] %v11017_v24  ;;  %v8541_v31 = vadd.f32 %v10856_v18, %v10532_v23  ;;  %v11036_v47 = vmul.f32 %v10553_v58, %v4150_v35  ;;  %v4027_v3 = vmul.f32 0.2, %v8540_v28  ;;  %v8542_v9 = vadd.f32 %v10863_v44, %v10535_v12 }
 0x398   :  { %v11041_v22 = vmul.f32 %v10556_v17, %v4151_v1  ;;  %vm3899_vm3 = vcmp.ge.f32.partialorder %v8540_v28, 0.0  ;;  %v4296_v34 = vmul.f32 %v10569_v57, %v4145_v21  ;;  %v4435_v7 = vadd.f32 %v4434_v33, %v4295_v49 }
 0x399   :  { %12789 = vst [vmem:[#allocation61_spill] sm:$0xff] %v11036_v47  ;;  %v11049_v18 = vmul.f32 %v10553_v58, %v4154_v26  ;;  %vm3901_vm10 = vcmp.ge.f32.partialorder %v11026_v13, 0.0  ;;  %v4029_v5 = vmul.f32 0.2, %v11026_v13  ;;  %v8605_v44 = vadd.f32 %v10858_v25, %v10538_v63 }
 0x39a   :  { %12790 = vst [vmem:[#allocation62_spill] sm:$0xff] %v11041_v22  ;;  %v11055_v8 = vsel %vm3900_vm13, %v8603_v27, %v4028_v29  ;;  %v4436_v35 = vadd.f32 %v4435_v7, %v4296_v34  ;;  %v4030_v40 = vmul.f32 0.2, %v8541_v31  ;;  %v11059_v20 = vadd.f32 %v10865_v45, %v10542_v42 }
 0x39b   :  { %v11044_v55 = vpop.f32.mrb[112].mxu0  ;;  %v11046_v19 = vpop.f32.mrb[112].mxu1  ;;  %v4155_v21 = vsel %vm3899_vm3, %v8540_v28, %v4027_v3  ;;  %vm3902_vm1 = vcmp.ge.f32.partialorder %v8541_v31, 0.0  ;;  %v4031_v26 = vmul.f32 0.2, %v8542_v9  ;;  %v4149_v25 = vsel %vm3893_vm4, %v10947_v53, %v10977_v51 }
 0x39c   :  { %v11061_v54 = vpop.f32.mrb[113].mxu0  ;;  %v11063_v1 = vpop.f32.mrb[113].mxu1  ;;  %4437 = vadd.xlane.f32.xlu1 %v4436_v35  ;;  %vm3903_vm2 = vcmp.ge.f32.partialorder %v8542_v9, 0.0  ;;  %v4299_v45 = vmul.f32 %v10565_v43, %v4148_v56  ;;  %v4439_v49 = vadd.f32 %v4298_v14, %v10974_v46  ;;  %v8543_v28 = vadd.f32 %v10884_v62, %v10532_v23 }
 0x39d   :  { %v11069_v27 = vpop.f32.mrb[114].mxu0  ;;  %v11071_v29 = vpop.f32.mrb[114].mxu1  ;;  %vm3904_vm7 = vcmp.ge.f32.partialorder %v8605_v44, 0.0  ;;  %v4032_v34 = vmul.f32 0.2, %v8605_v44  ;;  %v8544_v53 = vadd.f32 %v10891_v32, %v10535_v12  ;;  %v8545_v51 = vadd.f32 %v10904_v59, %v10532_v23 }
 0x39e   :  { %v11077_v33 = vpop.f32.mrb[115].mxu0  ;;  %v11079_v3 = vpop.f32.mrb[115].mxu1  ;;  %v4158_v7 = vsel %vm3902_vm1, %v8541_v31, %v4030_v40  ;;  %v11087_v56 = vmul.f32 0.2, %v11059_v20  ;;  %v4300_v46 = vmul.f32 %v10569_v57, %v4149_v25  ;;  %v4440_v62 = vadd.f32 %v4439_v49, %v4299_v45 }
 0x39f   :  { %v4159_v14 = vsel %vm3903_vm2, %v8542_v9, %v4031_v26  ;;  %v4034_v35 = vmul.f32 0.2, %v8543_v28  ;;  %v8607_v22 = vadd.f32 %v10886_v4, %v10538_v63  ;;  %v11094_v47 = vadd.f32 %v10893_v39, %v10542_v42 }
 0x3a0   :  { %v4441_v32 = vadd.f32 %v4440_v62, %v4300_v46  ;;  %vm3906_vm0 = vcmp.ge.f32.partialorder %v8543_v28, 0.0  ;;  %v4035_v59 = vmul.f32 0.2, %v8544_v53  ;;  %v8609_v31 = vadd.f32 %v10906_v50, %v10538_v63 }
 0x3a1   :  { %v4306_v9 = vmul.f32 %v10556_v17, %v4155_v21  ;;  %vm3905_vm11 = vcmp.ge.f32.partialorder %v11059_v20, 0.0  ;;  %vm3907_vm5 = vcmp.ge.f32.partialorder %v8544_v53, 0.0  ;;  %v4038_v4 = vmul.f32 0.2, %v8545_v51 }
 0x3a2   :  { %v4309_v25 = vmul.f32 %v10553_v58, %v4158_v7  ;;  %v4160_v45 = vsel %vm3904_vm7, %v8605_v44, %v4032_v34  ;;  %4442 = vadd.xlane.f32.xlu0 %v4441_v32  ;;  %vm3910_vm6 = vcmp.ge.f32.partialorder %v8545_v51, 0.0  ;;  %v8546_v50 = vadd.f32 %v10919_v15, %v10535_v12 }
 0x3a3   :  { %v11098_v40 = vpop.f32.mrb[116].mxu0  ;;  %v11100_v0 = vpop.f32.mrb[116].mxu1  ;;  %v4310_v46 = vmul.f32 %v10556_v17, %v4159_v14  ;;  %v4162_v62 = vsel %vm3906_vm0, %v8543_v28, %v4034_v35  ;;  %vm3908_vm12 = vcmp.ge.f32.partialorder %v8607_v22, 0.0  ;;  %v4036_v24 = vmul.f32 0.2, %v8607_v22 }
 0x3a4   :  { %v11104_v26 = vpop.f32.mrb[117].mxu0  ;;  %v11106_v39 = vpop.f32.mrb[117].mxu1  ;;  %v4163_v44 = vsel %vm3907_vm5, %v8544_v53, %v4035_v59  ;;  %v4037_v34 = vmul.f32 0.2, %v11094_v47  ;;  %v4040_v32 = vmul.f32 0.2, %v8609_v31  ;;  %v4157_v15 = vsel %vm3901_vm10, %v11026_v13, %v4029_v5 }
 0x3a5   :  { %v11112_v49 = vpop.f32.mrb[118].mxu0  ;;  %v11114_v21 = vpop.f32.mrb[118].mxu1  ;;  %vm3909_vm4 = vcmp.ge.f32.partialorder %v11094_v47, 0.0  ;;  %v4166_v14 = vsel %vm3910_vm6, %v8545_v51, %v4038_v4  ;;  %v4307_v28 = vmul.f32 %v10565_v43, %v11055_v8  ;;  %v4449_v35 = vadd.f32 %v4306_v9, %v11049_v18 }
 0x3a6   :  { %12791 = vst [vmem:[#allocation29_spill] sm:$0xff] %v11114_v21  ;;  %v11118_v37 = vpop.f32.mrb[119].mxu0  ;;  %v11120_v7 = vpop.f32.mrb[119].mxu1  ;;  %v4039_v21 = vmul.f32 0.2, %v8546_v50  ;;  %vm3912_vm8 = vcmp.ge.f32.partialorder %v8609_v31, 0.0  ;;  %v8547_v53 = vadd.f32 %v10939_v52, %v10532_v23  ;;  %v8611_v59 = vadd.f32 %v10941_v2, %v10538_v63 }
 0x3a7   :  { %12792 = vst [vmem:[#allocation31_spill] sm:$0xff] %v11118_v37  ;;  %12793 = vst [vmem:[#allocation34_spill] sm:$0xff] %v11120_v7  ;;  %vm3911_vm15 = vcmp.ge.f32.partialorder %v8546_v50, 0.0  ;;  %v11137_v13 = vadd.f32 %v10921_v41, %v10542_v42  ;;  %v4308_v5 = vmul.f32 %v10569_v57, %v4157_v15  ;;  %v4450_v51 = vadd.f32 %v4449_v35, %v4307_v28 }
 0x3a8   :  { %v8548_v8 = vadd.f32 %v10950_v16, %v10535_v12  ;;  %v4313_v18 = vmul.f32 %v10553_v58, %v4162_v62  ;;  %v4164_v9 = vsel %vm3908_vm12, %v8607_v22, %v4036_v24  ;;  %v4314_v4 = vmul.f32 %v10556_v17, %v4163_v44 }
 0x3a9   :  { %v11146_v52 = vmul.f32 %v10553_v58, %v4166_v14  ;;  %v11148_v2 = vsel %vm3912_vm8, %v8609_v31, %v4040_v32  ;;  %v4167_v7 = vsel %vm3911_vm15, %v8546_v50, %v4039_v21  ;;  %v4451_v41 = vadd.f32 %v4450_v51, %v4308_v5 }
 0x3aa   :  { %vm3914_vm14 = vcmp.ge.f32.partialorder %v8547_v53, 0.0  ;;  %v4042_v28 = vmul.f32 0.2, %v8547_v53  ;;  %v4044_v16 = vmul.f32 0.2, %v8611_v59  ;;  %v11156_v62 = vadd.f32 %v10952_v48, %v10542_v42 }
 0x3ab   :  { %v11150_v37 = vpop.f32.mrb[120].mxu0  ;;  %v11152_v15 = vpop.f32.mrb[120].mxu1  ;;  %v4161_v24 = vsel %vm3905_vm11, %v11059_v20, %v11087_v56  ;;  %vm3913_vm9 = vcmp.ge.f32.partialorder %v11137_v13, 0.0  ;;  %4452 = vadd.xlane.f32.xlu1 %v4451_v41  ;;  %vm3916_vm13 = vcmp.ge.f32.partialorder %v8611_v59, 0.0  ;;  %v4043_v50 = vmul.f32 0.2, %v8548_v8 }
 0x3ac   :  { %v11162_v22 = vpop.f32.mrb[121].mxu0  ;;  %v11164_v31 = vpop.f32.mrb[121].mxu1  ;;  %v4311_v21 = vmul.f32 %v10565_v43, %v4160_v45  ;;  %v4454_v44 = vadd.f32 %v4310_v46, %v4309_v25  ;;  %vm3915_vm3 = vcmp.ge.f32.partialorder %v8548_v8, 0.0  ;;  %v8549_v20 = vadd.f32 %v10956_v6, %v10532_v23 }
 0x3ad   :  { %v11168_v32 = vpop.f32.mrb[122].mxu0  ;;  %v11170_v48 = vpop.f32.mrb[122].mxu1  ;;  %v8613_v56 = vadd.f32 %v10958_v60, %v10538_v63  ;;  %v8550_v14 = vadd.f32 %v10965_v61, %v10535_v12  ;;  %v4318_v25 = vmul.f32 %v10556_v17, %v4167_v7  ;;  %v4041_v45 = vmul.f32 0.2, %v11137_v13 }
 0x3ae   :  { %12794 = vst [vmem:[#allocation63_spill] sm:$0xff] %v11168_v32  ;;  %12795 = vst [vmem:[#allocation36_spill] sm:$0xff] %v11170_v48  ;;  %v11178_v35 = vpop.f32.mrb[123].mxu0  ;;  %v11180_v5 = vpop.f32.mrb[123].mxu1  ;;  %v4312_v46 = vmul.f32 %v10569_v57, %v4161_v24  ;;  %v4455_v51 = vadd.f32 %v4454_v44, %v4311_v21  ;;  %v4170_v41 = vsel %vm3914_vm14, %v8547_v53, %v4042_v28  ;;  %v11190_v60 = vmul.f32 0.2, %v11156_v62 }
 0x3af   :  { %12796 = vst [vmem:[#allocation33_spill] sm:$0xff] %v11178_v35  ;;  %12797 = vst [vmem:[#allocation35_spill] sm:$0xff] %v11180_v5  ;;  %v11187_v6 = vsel %vm3916_vm13, %v8611_v59, %v4044_v16  ;;  %v4046_v61 = vmul.f32 0.2, %v8549_v20  ;;  %v4171_v48 = vsel %vm3915_vm3, %v8548_v8, %v4043_v50  ;;  %vm3918_vm10 = vcmp.ge.f32.partialorder %v8549_v20, 0.0  ;;  %v12800_v21 = vld [vmem:[#allocation25_spill] sm:$0xff] }
 0x3b0   :  { %v4456_v35 = vadd.f32 %v4455_v51, %v4312_v46  ;;  %v4047_v5 = vmul.f32 0.2, %v8550_v14  ;;  %v4048_v32 = vmul.f32 0.2, %v8613_v56  ;;  %vm3919_vm1 = vcmp.ge.f32.partialorder %v8550_v14, 0.0 }
 0x3b1   :  { %v11194_v7 = vadd.f32 %v10967_v38, %v10542_v42  ;;  %v4165_v53 = vsel %vm3909_vm4, %v11094_v47, %v4037_v34  ;;  %vm3917_vm2 = vcmp.ge.f32.partialorder %v11156_v62, 0.0  ;;  %vm3920_vm7 = vcmp.ge.f32.partialorder %v8613_v56, 0.0 }
 0x3b2   :  { %4457 = vadd.xlane.f32.xlu0 %v4456_v35  ;;  %v4315_v8 = vmul.f32 %v10565_v43, %v4164_v9  ;;  %v4459_v16 = vadd.f32 %v4314_v4, %v4313_v18  ;;  %v8551_v24 = vadd.f32 %v10993_v11, %v10532_v23  ;;  %v4321_v47 = vmul.f32 %v10553_v58, %v4170_v41  ;;  %v12801_v35 = vld [vmem:[#allocation23_spill] sm:$0xff] }
 0x3b3   :  { %v11199_v59 = vpop.f32.mrb[124].mxu0  ;;  %v11201_v28 = vpop.f32.mrb[124].mxu1  ;;  %v4174_v34 = vsel %vm3918_vm10, %v8549_v20, %v4046_v61  ;;  %v8615_v44 = vadd.f32 %v12800_v21, %v10538_v63  ;;  %v8552_v46 = vadd.f32 %v12801_v35, %v10535_v12  ;;  %v4175_v11 = vsel %vm3919_vm1, %v8550_v14, %v4047_v5 }
 0x3b4   :  { %v11207_v38 = vpop.f32.mrb[125].mxu0  ;;  %v11209_v50 = vpop.f32.mrb[125].mxu1  ;;  %v4316_v9 = vmul.f32 %v10569_v57, %v4165_v53  ;;  %v4460_v4 = vadd.f32 %v4459_v16, %v4315_v8  ;;  %v4322_v20 = vmul.f32 %v10556_v17, %v4171_v48  ;;  %v4176_v61 = vsel %vm3920_vm7, %v8613_v56, %v4048_v32  ;;  %v12804_v53 = vld [vmem:[#allocation27_spill] sm:$0xff] }
 0x3b5   :  { %12798 = vst [vmem:[#allocation68_spill] sm:$0xff] %v11207_v38  ;;  %12799 = vst [vmem:[#allocation70_spill] sm:$0xff] %v11209_v50  ;;  %v11217_v51 = vpop.f32.mrb[126].mxu0  ;;  %v11219_v18 = vpop.f32.mrb[126].mxu1  ;;  %v4050_v50 = vmul.f32 0.2, %v8551_v24  ;;  %v4325_v35 = vmul.f32 %v10553_v58, %v4174_v34  ;;  %v4326_v14 = vmul.f32 %v10556_v17, %v4175_v11  ;;  %v11235_v8 = vadd.f32 %v12804_v53, %v10542_v42 }
 0x3b6   :  { %12802 = vst [vmem:[#allocation38_spill] sm:$0xff] %v11217_v51  ;;  %12803 = vst [vmem:[#allocation69_spill] sm:$0xff] %v11219_v18  ;;  %v11223_v38 = vpop.f32.mrb[127].mxu0  ;;  %v11225_v41 = vpop.f32.mrb[127].mxu1  ;;  %vm3922_vm0 = vcmp.ge.f32.partialorder %v8551_v24, 0.0  ;;  %v4461_v51 = vadd.f32 %v4460_v4, %v4316_v9  ;;  %vm3923_vm11 = vcmp.ge.f32.partialorder %v8552_v46, 0.0  ;;  %v4169_v32 = vsel %vm3913_vm9, %v11137_v13, %v4041_v45 }
 0x3b7   :  { %v4051_v21 = vmul.f32 0.2, %v8552_v46  ;;  %v4049_v18 = vmul.f32 0.2, %v11194_v7  ;;  %vm3921_vm5 = vcmp.ge.f32.partialorder %v11194_v7, 0.0  ;;  %v4178_v48 = vsel %vm3922_vm0, %v8551_v24, %v4050_v50  ;;  %v12805_v9 = vld [vmem:[#allocation30_spill] sm:$0xff] }
 0x3b8   :  { %v4052_v5 = vmul.f32 0.2, %v8615_v44  ;;  %4462 = vadd.xlane.f32.xlu1 %v4461_v51  ;;  %v4319_v56 = vmul.f32 %v10565_v43, %v11148_v2  ;;  %v4464_v16 = vadd.f32 %v4318_v25, %v11146_v52  ;;  %v8553_v34 = vadd.f32 %v11004_v10, %v10532_v23 }
 0x3b9   :  { %vm3924_vm6 = vcmp.ge.f32.partialorder %v8615_v44, 0.0  ;;  %v4179_v11 = vsel %vm3923_vm11, %v8552_v46, %v4051_v21  ;;  %v8617_v4 = vadd.f32 %v12805_v9, %v10538_v63  ;;  %v8554_v53 = vadd.f32 %v11019_v30, %v10535_v12 }
 0x3ba   :  { %v4320_v13 = vmul.f32 %v10569_v57, %v4169_v32  ;;  %v4465_v45 = vadd.f32 %v4464_v16, %v4319_v56  ;;  %vm3926_vm12 = vcmp.ge.f32.partialorder %v8553_v34, 0.0  ;;  %v4054_v24 = vmul.f32 0.2, %v8553_v34 }
 0x3bb   :  { %v11251_v2 = vmul.f32 %v10553_v58, %v4178_v48  ;;  %v4053_v52 = vmul.f32 0.2, %v11235_v8  ;;  %v4055_v25 = vmul.f32 0.2, %v8554_v53  ;;  %v11256_v10 = vadd.f32 %v11021_v36, %v10542_v42 }
 0x3bc   :  { %v4180_v50 = vsel %vm3924_vm6, %v8615_v44, %v4052_v5  ;;  %vm3925_vm4 = vcmp.ge.f32.partialorder %v11235_v8, 0.0  ;;  %v4466_v46 = vadd.f32 %v4465_v45, %v4320_v13  ;;  %v4182_v30 = vsel %vm3926_vm12, %v8553_v34, %v4054_v24 }
 0x3bd   :  { %vm3927_vm8 = vcmp.ge.f32.partialorder %v8554_v53, 0.0  ;;  %v4330_v51 = vmul.f32 %v10556_v17, %v4179_v11  ;;  %v4056_v21 = vmul.f32 0.2, %v8617_v4  ;;  %v4173_v32 = vsel %vm3917_vm2, %v11156_v62, %v11190_v60 }
 0x3be   :  { %v4323_v48 = vmul.f32 %v10565_v43, %v11187_v6  ;;  %4467 = vadd.xlane.f32.xlu0 %v4466_v46  ;;  %vm3928_vm15 = vcmp.ge.f32.partialorder %v8617_v4, 0.0  ;;  %v4469_v36 = vadd.f32 %v4322_v20, %v4321_v47  ;;  %v8555_v44 = vadd.f32 %v11044_v55, %v10532_v23 }
 0x3bf   :  { %v8619_v5 = vadd.f32 %v11046_v19, %v10538_v63  ;;  %v11271_v56 = vmul.f32 %v10553_v58, %v4182_v30  ;;  %v4183_v16 = vsel %vm3927_vm8, %v8554_v53, %v4055_v25  ;;  %v11274_v34 = vmul.f32 0.2, %v11256_v10 }
 0x3c0   :  { %v8556_v62 = vadd.f32 %v11061_v54, %v10535_v12  ;;  %v4324_v6 = vmul.f32 %v10569_v57, %v4173_v32  ;;  %v4470_v60 = vadd.f32 %v4469_v36, %v4323_v48  ;;  %vm3930_vm14 = vcmp.ge.f32.partialorder %v8555_v44, 0.0 }
 0x3c1   :  { %v4058_v47 = vmul.f32 0.2, %v8555_v44  ;;  %v11279_v20 = vsel %vm3928_vm15, %v8617_v4, %v4056_v21  ;;  %v11283_v19 = vadd.f32 %v11063_v1, %v10542_v42  ;;  %v4334_v11 = vmul.f32 %v10556_v17, %v4183_v16 }
 0x3c2   :  { %vm3931_vm9 = vcmp.ge.f32.partialorder %v8556_v62, 0.0  ;;  %v4059_v55 = vmul.f32 0.2, %v8556_v62  ;;  %v4471_v9 = vadd.f32 %v4470_v60, %v4324_v6  ;;  %v4060_v53 = vmul.f32 0.2, %v8619_v5 }
 0x3c3   :  { %v4177_v54 = vsel %vm3921_vm5, %v11194_v7, %v4049_v18  ;;  %vm3929_vm13 = vcmp.ge.f32.partialorder %v11256_v10, 0.0  ;;  %v4186_v13 = vsel %vm3930_vm14, %v8555_v44, %v4058_v47  ;;  %vm3932_vm3 = vcmp.ge.f32.partialorder %v8619_v5, 0.0 }
 0x3c4   :  { %v4327_v4 = vmul.f32 %v10565_v43, %v4176_v61  ;;  %v4474_v45 = vadd.f32 %v4326_v14, %v4325_v35  ;;  %4472 = vadd.xlane.f32.xlu1 %v4471_v9  ;;  %v4187_v24 = vsel %vm3931_vm9, %v8556_v62, %v4059_v55  ;;  %v8557_v1 = vadd.f32 %v11069_v27, %v10532_v23 }
 0x3c5   :  { %v8621_v25 = vadd.f32 %v11071_v29, %v10538_v63  ;;  %v8558_v46 = vadd.f32 %v11077_v33, %v10535_v12  ;;  %v11298_v7 = vmul.f32 0.2, %v11283_v19  ;;  %v4328_v18 = vmul.f32 %v10569_v57, %v4177_v54 }
 0x3c6   :  { %v4475_v30 = vadd.f32 %v4474_v45, %v4327_v4  ;;  %v11303_v61 = vadd.f32 %v11079_v3, %v10542_v42  ;;  %v11306_v35 = vmul.f32 %v10553_v58, %v4186_v13  ;;  %v11308_v27 = vsel %vm3932_vm3, %v8619_v5, %v4060_v53 }
 0x3c7   :  { %vm3934_vm10 = vcmp.ge.f32.partialorder %v8557_v1, 0.0  ;;  %v4062_v29 = vmul.f32 0.2, %v8557_v1  ;;  %v11311_v14 = vmul.f32 %v10556_v17, %v4187_v24  ;;  %v4063_v21 = vmul.f32 0.2, %v8558_v46 }
 0x3c8   :  { %v4476_v33 = vadd.f32 %v4475_v30, %v4328_v18  ;;  %v4181_v32 = vsel %vm3925_vm4, %v11235_v8, %v4053_v52  ;;  %vm3933_vm1 = vcmp.ge.f32.partialorder %v11283_v19, 0.0  ;;  %vm3936_vm2 = vcmp.ge.f32.partialorder %v8621_v25, 0.0  ;;  %v12807_v18 = vld [vmem:[#allocation31_spill] sm:$0xff] }
 0x3c9   :  { %v4064_v3 = vmul.f32 0.2, %v8621_v25  ;;  %vm3935_vm7 = vcmp.ge.f32.partialorder %v8558_v46, 0.0  ;;  %v4331_v48 = vmul.f32 %v10565_v43, %v4180_v50  ;;  %v4190_v36 = vsel %vm3934_vm10, %v8557_v1, %v4062_v29 }
 0x3ca   :  { %4477 = vadd.xlane.f32.xlu0 %v4476_v33  ;;  %v11319_v44 = vmul.f32 0.2, %v11303_v61  ;;  %v4479_v5 = vadd.f32 %v4330_v51, %v11251_v2  ;;  %v8559_v16 = vadd.f32 %v11098_v40, %v10532_v23  ;;  %v4332_v62 = vmul.f32 %v10569_v57, %v4181_v32 }
 0x3cb   :  { %v8623_v8 = vadd.f32 %v11100_v0, %v10538_v63  ;;  %v8560_v52 = vadd.f32 %v11104_v26, %v10535_v12  ;;  %v11331_v50 = vadd.f32 %v11106_v39, %v10542_v42  ;;  %v4191_v6 = vsel %vm3935_vm7, %v8558_v46, %v4063_v21 }
 0x3cc   :  { %v4480_v60 = vadd.f32 %v4479_v5, %v4331_v48  ;;  %vm3938_vm0 = vcmp.ge.f32.partialorder %v8559_v16, 0.0  ;;  %v4066_v47 = vmul.f32 0.2, %v8559_v16  ;;  %v4192_v2 = vsel %vm3936_vm2, %v8621_v25, %v4064_v3  ;;  %v12806_v25 = vld [vmem:[#allocation29_spill] sm:$0xff] }
 0x3cd   :  { %vm3937_vm11 = vcmp.ge.f32.partialorder %v11303_v61, 0.0  ;;  %vm3940_vm5 = vcmp.ge.f32.partialorder %v8623_v8, 0.0  ;;  %v4068_v40 = vmul.f32 0.2, %v8623_v8  ;;  %v4067_v51 = vmul.f32 0.2, %v8560_v52 }
 0x3ce   :  { %v4341_v0 = vmul.f32 %v10553_v58, %v4190_v36  ;;  %v4481_v55 = vadd.f32 %v4480_v60, %v4332_v62  ;;  %v4194_v9 = vsel %vm3938_vm0, %v8559_v16, %v4066_v47  ;;  %vm3939_vm6 = vcmp.ge.f32.partialorder %v8560_v52, 0.0 }
 0x3cf   :  { %v4342_v26 = vmul.f32 %v10556_v17, %v4191_v6  ;;  %v11338_v39 = vmul.f32 %v10553_v58, %v4194_v9  ;;  %v11341_v53 = vmul.f32 0.2, %v11331_v50  ;;  %v4185_v54 = vsel %vm3929_vm13, %v11256_v10, %v11274_v34  ;;  %v12808_v10 = vld [vmem:[#allocation34_spill] sm:$0xff] }
 0x3d0   :  { %4482 = vadd.xlane.f32.xlu1 %v4481_v55  ;;  %v11347_v13 = vsel %vm3940_vm5, %v8623_v8, %v4068_v40  ;;  %v4335_v4 = vmul.f32 %v10565_v43, %v11279_v20  ;;  %v4484_v45 = vadd.f32 %v4334_v11, %v11271_v56  ;;  %v8561_v24 = vadd.f32 %v11112_v49, %v10532_v23 }
 0x3d1   :  { %v4195_v1 = vsel %vm3939_vm6, %v8560_v52, %v4067_v51  ;;  %v8625_v46 = vadd.f32 %v12806_v25, %v10538_v63  ;;  %v8562_v30 = vadd.f32 %v12807_v18, %v10535_v12  ;;  %v11360_v34 = vadd.f32 %v12808_v10, %v10542_v42  ;;  %v12811_v25 = vld [vmem:[#allocation33_spill] sm:$0xff] }
 0x3d2   :  { %vm3941_vm12 = vcmp.ge.f32.partialorder %v11331_v50, 0.0  ;;  %v4336_v20 = vmul.f32 %v10569_v57, %v4185_v54  ;;  %v4485_v29 = vadd.f32 %v4484_v45, %v4335_v4  ;;  %vm3942_vm4 = vcmp.ge.f32.partialorder %v8561_v24, 0.0 }
 0x3d3   :  { %v4070_v56 = vmul.f32 0.2, %v8561_v24  ;;  %vm3944_vm8 = vcmp.ge.f32.partialorder %v8625_v46, 0.0  ;;  %v4072_v49 = vmul.f32 0.2, %v8625_v46  ;;  %vm3943_vm15 = vcmp.ge.f32.partialorder %v8562_v30, 0.0 }
 0x3d4   :  { %v4071_v11 = vmul.f32 0.2, %v8562_v30  ;;  %v4346_v33 = vmul.f32 %v10556_v17, %v4195_v1  ;;  %v4486_v21 = vadd.f32 %v4485_v29, %v4336_v20  ;;  %v4189_v3 = vsel %vm3933_vm1, %v11283_v19, %v11298_v7 }
 0x3d5   :  { %v4198_v32 = vsel %vm3942_vm4, %v8561_v24, %v4070_v56  ;;  %v11373_v5 = vmul.f32 0.2, %v11360_v34  ;;  %v4339_v16 = vmul.f32 %v10565_v43, %v11308_v27  ;;  %v11377_v62 = vsel %vm3944_vm8, %v8625_v46, %v4072_v49  ;;  %v12810_v24 = vld [vmem:[#allocation36_spill] sm:$0xff] }
 0x3d6   :  { %v11370_v48 = vmul.f32 %v10553_v58, %v4198_v32  ;;  %v4199_v36 = vsel %vm3943_vm15, %v8562_v30, %v4071_v11  ;;  %4487 = vadd.xlane.f32.xlu0 %v4486_v21  ;;  %v4489_v8 = vadd.f32 %v11311_v14, %v11306_v35  ;;  %v8563_v52 = vadd.f32 %v11150_v37, %v10532_v23  ;;  %v12812_v30 = vld [vmem:[#allocation35_spill] sm:$0xff] }
 0x3d7   :  { %v8627_v19 = vadd.f32 %v11152_v15, %v10538_v63  ;;  %v11386_v7 = vmul.f32 %v10556_v17, %v4199_v36  ;;  %v4340_v6 = vmul.f32 %v10569_v57, %v4189_v3  ;;  %v8564_v27 = vadd.f32 %v11162_v22, %v10535_v12 }
 0x3d8   :  { %v11393_v60 = vadd.f32 %v11164_v31, %v10542_v42  ;;  %vm3945_vm14 = vcmp.ge.f32.partialorder %v11360_v34, 0.0  ;;  %v4490_v35 = vadd.f32 %v4489_v8, %v4339_v16  ;;  %vm3946_vm9 = vcmp.ge.f32.partialorder %v8563_v52, 0.0 }
 0x3d9   :  { %v4074_v37 = vmul.f32 0.2, %v8563_v52  ;;  %v4193_v15 = vsel %vm3937_vm11, %v11303_v61, %v11319_v44  ;;  %vm3948_vm13 = vcmp.ge.f32.partialorder %v8627_v19, 0.0  ;;  %v4076_v14 = vmul.f32 0.2, %v8627_v19  ;;  %v12809_v44 = vld [vmem:[#allocation63_spill] sm:$0xff] }
 0x3da   :  { %vm3947_vm3 = vcmp.ge.f32.partialorder %v8564_v27, 0.0  ;;  %v4075_v47 = vmul.f32 0.2, %v8564_v27  ;;  %v4491_v40 = vadd.f32 %v4490_v35, %v4340_v6  ;;  %v11401_v51 = vmul.f32 0.2, %v11393_v60  ;;  %v12814_v6 = vld [vmem:[#allocation70_spill] sm:$0xff] }
 0x3db   :  { %v4202_v22 = vsel %vm3946_vm9, %v8563_v52, %v4074_v37  ;;  %v4343_v31 = vmul.f32 %v10565_v43, %v4192_v2  ;;  %v4344_v54 = vmul.f32 %v10569_v57, %v4193_v15  ;;  %v4494_v4 = vadd.f32 %v4342_v26, %v4341_v0  ;;  %v12813_v52 = vld [vmem:[#allocation68_spill] sm:$0xff] }
 0x3dc   :  { %v11405_v55 = vmul.f32 %v10553_v58, %v4202_v22  ;;  %v4203_v9 = vsel %vm3947_vm3, %v8564_v27, %v4075_v47  ;;  %4492 = vadd.xlane.f32.xlu1 %v4491_v40  ;;  %v4204_v61 = vsel %vm3948_vm13, %v8627_v19, %v4076_v14  ;;  %v8565_v45 = vadd.f32 %v12809_v44, %v10532_v23  ;;  %v12815_v35 = vld [vmem:[#allocation24_spill] sm:$0xff] }
 0x3dd   :  { %v8629_v1 = vadd.f32 %v12810_v24, %v10538_v63  ;;  %v8566_v46 = vadd.f32 %v12811_v25, %v10535_v12  ;;  %v11415_v2 = vmul.f32 %v10556_v17, %v4203_v9  ;;  %vm3949_vm10 = vcmp.ge.f32.partialorder %v11393_v60, 0.0 }
 0x3de   :  { %v4495_v18 = vadd.f32 %v4494_v4, %v4343_v31  ;;  %v11420_v0 = vadd.f32 %v12812_v30, %v10542_v42  ;;  %v4197_v26 = vsel %vm3941_vm12, %v11331_v50, %v11341_v53  ;;  %vm3950_vm1 = vcmp.ge.f32.partialorder %v8565_v45, 0.0  ;;  %v12816_v4 = vld [vmem:[#allocation38_spill] sm:$0xff] }
 0x3df   :  { %v4078_v10 = vmul.f32 0.2, %v8565_v45  ;;  %vm3952_vm2 = vcmp.ge.f32.partialorder %v8629_v1, 0.0  ;;  %v4080_v20 = vmul.f32 0.2, %v8629_v1  ;;  %vm3951_vm7 = vcmp.ge.f32.partialorder %v8566_v46, 0.0 }
 0x3e0   :  { %v4496_v29 = vadd.f32 %v4495_v18, %v4344_v54  ;;  %v4079_v56 = vmul.f32 0.2, %v8566_v46  ;;  %v4347_v49 = vmul.f32 %v10565_v43, %v11347_v13  ;;  %v4081_v32 = vmul.f32 0.2, %v11420_v0  ;;  %v4373_v18 = vpop.xlane.xlu0 %4372 }
 0x3e1   :  { %v4206_v11 = vsel %vm3950_vm1, %v8565_v45, %v4078_v10  ;;  %v4208_v21 = vsel %vm3952_vm2, %v8629_v1, %v4080_v20  ;;  %v4348_v3 = vmul.f32 %v10569_v57, %v4197_v26  ;;  %v4499_v53 = vadd.f32 %v4346_v33, %v11338_v39  ;;  %v12817_v45 = vld [vmem:[#allocation69_spill] sm:$0xff] }
 0x3e2   :  { %4497 = vadd.xlane.f32.xlu0 %v4496_v29  ;;  %v4357_v36 = vmul.f32 %v10553_v58, %v4206_v11  ;;  %v4207_v50 = vsel %vm3951_vm7, %v8566_v46, %v4079_v56  ;;  %v8567_v16 = vadd.f32 %v11199_v59, %v10532_v23  ;;  %vm3953_vm0 = vcmp.ge.f32.partialorder %v11420_v0, 0.0  ;;  %v12819_v11 = vld [vmem:[#allocation32_spill] sm:$0xff] }
 0x3e3   :  { %v4358_v8 = vmul.f32 %v10556_v17, %v4207_v50  ;;  %v8631_v13 = vadd.f32 %v11201_v28, %v10538_v63  ;;  %v8568_v19 = vadd.f32 %v12813_v52, %v10535_v12  ;;  %v8632_v27 = vadd.f32 %v12814_v6, %v10542_v42  ;;  %v12821_v50 = vld [vmem:[#allocation62_spill] sm:$0xff] }
 0x3e4   :  { %vm3897_vm11 = vcmp.ge.f32.partialorder %v12815_v35, 0.0  ;;  %v4500_v37 = vadd.f32 %v4499_v53, %v4347_v49  ;;  %vm3954_vm5 = vcmp.ge.f32.partialorder %v8567_v16, 0.0  ;;  %v4082_v39 = vmul.f32 0.2, %v8567_v16 }
 0x3e5   :  { %v4201_v59 = vsel %vm3945_vm14, %v11360_v34, %v11373_v5  ;;  %vm3956_vm6 = vcmp.ge.f32.partialorder %v8631_v13, 0.0  ;;  %v4084_v33 = vmul.f32 0.2, %v8631_v13  ;;  %vm3955_vm12 = vcmp.ge.f32.partialorder %v8568_v19, 0.0  ;;  %v4378_v52 = vpop.xlane.xlu0 %4377 }
 0x3e6   :  { %v4083_v28 = vmul.f32 0.2, %v8568_v19  ;;  %v4501_v15 = vadd.f32 %v4500_v37, %v4348_v3  ;;  %v4210_v14 = vsel %vm3954_vm5, %v8567_v16, %v4082_v39  ;;  %vm3957_vm4 = vcmp.ge.f32.partialorder %v8632_v27, 0.0 }
 0x3e7   :  { %v4085_v47 = vmul.f32 0.2, %v8632_v27  ;;  %v4361_v40 = vmul.f32 %v10553_v58, %v4210_v14  ;;  %v4212_v22 = vsel %vm3956_vm6, %v8631_v13, %v4084_v33  ;;  %v4351_v9 = vmul.f32 %v10565_v43, %v11377_v62  ;;  %v11489_v13 = vld [vmem:[#allocation2] ss:$0 sm:$0xff] }
 0x3e8   :  { %v4211_v31 = vsel %vm3955_vm12, %v8568_v19, %v4083_v28  ;;  %4502 = vadd.xlane.f32.xlu1 %v4501_v15  ;;  %v4352_v34 = vmul.f32 %v10569_v57, %v4201_v59  ;;  %v4504_v5 = vadd.f32 %v11386_v7, %v11370_v48  ;;  %v8569_v44 = vadd.f32 %v12816_v4, %v10532_v23 }
 0x3e9   :  { %v4362_v54 = vmul.f32 %v10556_v17, %v4211_v31  ;;  %v8633_v24 = vadd.f32 %v12817_v45, %v10538_v63  ;;  %v8570_v1 = vadd.f32 %v11223_v38, %v10535_v12  ;;  %v8634_v62 = vadd.f32 %v11225_v41, %v10542_v42 }
 0x3ea   :  { %v4205_v25 = vsel %vm3949_vm10, %v11393_v60, %v11401_v51  ;;  %v4505_v46 = vadd.f32 %v4504_v5, %v4351_v9  ;;  %vm3958_vm8 = vcmp.ge.f32.partialorder %v8569_v44, 0.0  ;;  %v4086_v48 = vmul.f32 0.2, %v8569_v44 }
 0x3eb   :  { %v4355_v7 = vmul.f32 %v10565_v43, %v4204_v61  ;;  %vm3960_vm15 = vcmp.ge.f32.partialorder %v8633_v24, 0.0  ;;  %v4088_v23 = vmul.f32 0.2, %v8633_v24  ;;  %vm3959_vm14 = vcmp.ge.f32.partialorder %v8570_v1, 0.0 }
 0x3ec   :  { %v4087_v63 = vmul.f32 0.2, %v8570_v1  ;;  %v4506_v30 = vadd.f32 %v4505_v46, %v4352_v34  ;;  %v4214_v12 = vsel %vm3958_vm8, %v8569_v44, %v4086_v48  ;;  %vm3961_vm9 = vcmp.ge.f32.partialorder %v8634_v62, 0.0 }
 0x3ed   :  { %v4089_v38 = vmul.f32 0.2, %v8634_v62  ;;  %v4365_v42 = vmul.f32 %v10553_v58, %v4214_v12  ;;  %v4216_v41 = vsel %vm3960_vm15, %v8633_v24, %v4088_v23  ;;  %v4356_v60 = vmul.f32 %v10569_v57, %v4205_v25  ;;  %v12818_v58 = vld [vmem:[#allocation51_spill] sm:$0xff] }
 0x3ee   :  { %v4215_v26 = vsel %vm3959_vm14, %v8570_v1, %v4087_v63  ;;  %4507 = vadd.xlane.f32.xlu0 %v4506_v30  ;;  %v4509_v61 = vadd.f32 %v11415_v2, %v11405_v55  ;;  %v4209_v10 = vsel %vm3953_vm0, %v11420_v0, %v4081_v32  ;;  %v4359_v20 = vmul.f32 %v10565_v43, %v4208_v21  ;;  %v12820_v2 = vld [vmem:[#allocation61_spill] sm:$0xff]  ;;  %v4383_v21 = vpop.xlane.xlu1 %4382 }
 0x3ef   :  { %v4366_v51 = vmul.f32 %v10556_v17, %v4215_v26  ;;  %v4360_v29 = vmul.f32 %v10569_v57, %v4209_v10  ;;  %v4514_v56 = vadd.f32 %v4358_v8, %v4357_v36  ;;  %v4153_v49 = vsel %vm3897_vm11, %v12815_v35, %v12818_v58  ;;  %v12822_v1 = vld [vmem:[#allocation13_spill] sm:$0xff] }
 0x3f0   :  { %v4303_v17 = vmul.f32 %v10565_v43, %v12819_v11  ;;  %v4510_v3 = vadd.f32 %v4509_v61, %v4355_v7  ;;  %v4304_v55 = vmul.f32 %v10569_v57, %v4153_v49  ;;  %v4444_v53 = vadd.f32 %v12821_v50, %v12820_v2 }
 0x3f1   :  { %v4213_v0 = vsel %vm3957_vm4, %v8632_v27, %v4085_v47  ;;  %v4515_v32 = vadd.f32 %v4514_v56, %v4359_v20  ;;  %v4363_v36 = vmul.f32 %v10565_v43, %v4212_v22  ;;  %v4519_v8 = vadd.f32 %v4362_v54, %v4361_v40 }
 0x3f2   :  { %v4364_v16 = vmul.f32 %v10569_v57, %v4213_v0  ;;  %v4511_v19 = vadd.f32 %v4510_v3, %v4356_v60  ;;  %v4445_v6 = vadd.f32 %v4444_v53, %v4303_v17  ;;  %v4217_v35 = vsel %vm3961_vm9, %v8634_v62, %v4089_v38 }
 0x3f3   :  { %v4367_v37 = vmul.f32 %v10565_v43, %v4216_v41  ;;  %v4516_v39 = vadd.f32 %v4515_v32, %v4360_v29  ;;  %v4520_v59 = vadd.f32 %v4519_v8, %v4363_v36  ;;  %v4368_v27 = vmul.f32 %v10569_v57, %v4217_v35  ;;  %v4388_v43 = vpop.xlane.xlu1 %4387  ;;  %v4393_v44 = vpop.xlane.xlu0 %4392 }
 0x3f4   :  { %v4524_v33 = vadd.f32 %v4366_v51, %v4365_v42  ;;  %4512 = vadd.xlane.f32.xlu1 %v4511_v19  ;;  %v4446_v28 = vadd.f32 %v4445_v6, %v4304_v55  ;;  %v4535_v15 = vadd.f32 %v11489_v13, %v4373_v18  ;;  %v4536_v14 = vadd.f32 %v11489_v13, %v4378_v52 }
 0x3f5   :  { %4517 = vadd.xlane.f32.xlu0 %v4516_v39  ;;  %v4521_v47 = vadd.f32 %v4520_v59, %v4364_v16  ;;  %v9389_v22 = vmov 1966171168   ;;  %v4537_v9 = vadd.f32 %v11489_v13, %v4383_v21  ;;  %v4538_v57 = vadd.f32 %v11489_v13, %v4388_v43 }
 0x3f6   :  { %v4525_v40 = vadd.f32 %v4524_v33, %v4367_v37  ;;  %v4601_v31 = vunpack.c.l.s4 %v9389_v22  ;;  %v4599_v54 = vcombine.high %v4535_v15, %v4535_v15  ;;  %v4648_v4 = vcombine.high %v4536_v14, %v4536_v14 }
 0x3f7   :  { %v9390_v45 = vmov 0   ;;  %v4697_v24 = vcombine.high %v4537_v9, %v4537_v9  ;;  %v4539_v25 = vadd.f32 %v11489_v13, %v4393_v44  ;;  %v4746_v46 = vcombine.high %v4538_v57, %v4538_v57 }
 0x3f8   :  { %v4526_v34 = vadd.f32 %v4525_v40, %v4368_v27  ;;  %v4602_v5 = vunpack.c.0.s8 %v4601_v31  ;;  %8901 = vset.pattern.permute.xlu0 %v9390_v45  ;;  %8902 = vset.pattern.permute.xlu1 %v9390_v45  ;;  %vm7842_vm13 = vcmask 130112   ;;  %vm7849_vm3 = vcmask 195712  }
 0x3f9   :  { %4522 = vadd.xlane.f32.xlu1 %v4521_v47  ;;  %4447 = vadd.xlane.f32.xlu0 %v4446_v28  ;;  %v4795_v41 = vcombine.high %v4539_v25, %v4539_v25  ;;  %vm7856_vm10 = vcmask 261312   ;;  %vm7863_vm1 = vcmask 326912   ;;  %vm7870_vm2 = vcmask 392512  }
 0x3fa   :  { %v11499_v62 = vsub.s32 %v4602_v5, %v12822_v1  ;;  %vm7877_vm7 = vcmask 458112   ;;  %vm7884_vm0 = vcmask 523712   ;;  %vm7891_vm11 = vcmask 589312  }
 0x3fb   :  { %vm7898_vm5 = vcmask 654912   ;;  %vm7905_vm6 = vcmask 720512   ;;  %vm7912_vm12 = vcmask 786112   ;;  %vm7919_vm4 = vcmask 851712  }
 0x3fc   :  { %v4606_v48 = vrot.slane %v4535_v15, %v11499_v62  ;;  %v4613_v7 = vrot.slane %v4599_v54, %v11499_v62  ;;  %v4655_v23 = vrot.slane %v4536_v14, %v11499_v62  ;;  %v4662_v63 = vrot.slane %v4648_v4, %v11499_v62  ;;  %v4398_v54 = vpop.xlane.xlu1 %4397 }
 0x3fd   :  { %4527 = vadd.xlane.f32.xlu1 %v4526_v34  ;;  %v4704_v18 = vrot.slane %v4537_v9, %v11499_v62  ;;  %v4711_v30 = vrot.slane %v4697_v24, %v11499_v62  ;;  %v4753_v42 = vrot.slane %v4538_v57, %v11499_v62  ;;  %v4760_v61 = vrot.slane %v4746_v46, %v11499_v62 }
 0x3fe   :  { %v4614_v12 = vcombine.high %v4606_v48, %v4606_v48  ;;  %v4615_v38 = vcombine.high %v4613_v7, %v4613_v7  ;;  %v4622_v26 = vrot.slane %v4606_v48, %v11499_v62  ;;  %v4663_v60 = vcombine.high %v4655_v23, %v4655_v23 }
 0x3ff   :  { %v4664_v51 = vcombine.high %v4662_v63, %v4662_v63  ;;  %v4712_v29 = vcombine.high %v4704_v18, %v4704_v18  ;;  %v4713_v56 = vcombine.high %v4711_v30, %v4711_v30  ;;  %v4629_v58 = vrot.slane %v4613_v7, %v11499_v62 }
 0x400   :  { %v4636_v10 = vrot.slane %v4614_v12, %v11499_v62  ;;  %v4643_v20 = vrot.slane %v4615_v38, %v11499_v62  ;;  %v4671_v49 = vrot.slane %v4655_v23, %v11499_v62  ;;  %v4685_v11 = vrot.slane %v4663_v60, %v11499_v62 }
 0x401   :  { %v11517_v17 = vrot.slane %v4664_v51, %v11499_v62  ;;  %v11520_v2 = vrot.slane %v4662_v63, %v11499_v62  ;;  %v4720_v50 = vrot.slane %v4704_v18, %v11499_v62  ;;  %v11524_v32 = vrot.slane %v4711_v30, %v11499_v62 }
 0x402   :  { %v6167_v3 = vcombine.low %v4622_v26, %v4636_v10  ;;  %v8315_v55 = vcombine.high %v4622_v26, %v4636_v10  ;;  %v6169_v53 = vcombine.low %v4629_v58, %v4643_v20  ;;  %v6216_v0 = vcombine.low %v4671_v49, %v4685_v11 }
 0x403   :  { %v8317_v21 = vcombine.high %v4671_v49, %v4685_v11  ;;  %v8316_v36 = vcombine.high %v4629_v58, %v4643_v20  ;;  %v6218_v16 = vcombine.low %v11520_v2, %v11517_v17  ;;  %v4734_v8 = vrot.slane %v4712_v29, %v11499_v62 }
 0x404   :  { %v11530_v52 = vrot.slane %v4713_v56, %v11499_v62  ;;  %v6177_v19 = vrot.slane %v6167_v3, %v11499_v62  ;;  %v8318_v6 = vcombine.high %v11520_v2, %v11517_v17  ;;  %v4761_v35 = vcombine.high %v4753_v42, %v4753_v42 }
 0x405   :  { %v4762_v37 = vcombine.high %v4760_v61, %v4760_v61  ;;  %v6184_v39 = vrot.slane %v8315_v55, %v11499_v62  ;;  %v11537_v59 = vrot.slane %v6216_v0, %v11499_v62  ;;  %v6265_v27 = vcombine.low %v4720_v50, %v4734_v8 }
 0x406   :  { %v8319_v33 = vcombine.high %v4720_v50, %v4734_v8  ;;  %v11540_v28 = vrot.slane %v8317_v21, %v11499_v62  ;;  %v4769_v15 = vrot.slane %v4753_v42, %v11499_v62  ;;  %v4783_v14 = vrot.slane %v4761_v35, %v11499_v62 }
 0x407   :  { %v11545_v47 = vrot.slane %v4762_v37, %v11499_v62  ;;  %v6267_v40 = vcombine.low %v11524_v32, %v11530_v52  ;;  %v11550_v22 = vrot.slane %v4760_v61, %v11499_v62  ;;  %v4802_v31 = vrot.slane %v4539_v25, %v11499_v62  ;;  %v4403_v25 = vpop.xlane.xlu0 %4402 }
 0x408   :  { %v4809_v9 = vrot.slane %v4795_v41, %v11499_v62  ;;  %v8320_v43 = vcombine.high %v11524_v32, %v11530_v52  ;;  %v11557_v34 = vrot.slane %v6265_v27, %v11499_v62  ;;  %v11560_v5 = vrot.slane %v8319_v33, %v11499_v62 }
 0x409   :  { %v6314_v4 = vcombine.low %v4769_v15, %v4783_v14  ;;  %v8321_v57 = vcombine.high %v4769_v15, %v4783_v14  ;;  %v6316_v44 = vcombine.low %v11550_v22, %v11545_v47  ;;  %v4810_v45 = vcombine.high %v4802_v31, %v4802_v31  ;;  %v4408_v14 = vpop.xlane.xlu1 %4407 }
 0x40a   :  { %v4811_v24 = vcombine.high %v4809_v9, %v4809_v9  ;;  %v8322_v46 = vcombine.high %v11550_v22, %v11545_v47  ;;  %v4818_v48 = vrot.slane %v4802_v31, %v11499_v62  ;;  %v4540_v7 = vadd.f32 %v11489_v13, %v4398_v54 }
 0x40b   :  { %v6191_v23 = vrot.slane %v6169_v53, %v11499_v62  ;;  %v11570_v63 = vrot.slane %v4809_v9, %v11499_v62  ;;  %v4832_v18 = vrot.slane %v4810_v45, %v11499_v62  ;;  %v6198_v12 = vrot.slane %v8316_v36, %v11499_v62 }
 0x40c   :  { %v11574_v30 = vrot.slane %v4811_v24, %v11499_v62  ;;  %v4844_v38 = vcombine.high %v4540_v7, %v4540_v7  ;;  %v4851_v42 = vrot.slane %v4540_v7, %v11499_v62  ;;  %v6199_v41 = vcombine.low %v6177_v19, %v6184_v39  ;;  %v4413_v7 = vpop.xlane.xlu0 %4412 }
 0x40d   :  { %v4541_v26 = vadd.f32 %v11489_v13, %v4403_v25  ;;  %v11580_v60 = vrot.slane %v6314_v4, %v11499_v62  ;;  %v11583_v51 = vrot.slane %v8321_v57, %v11499_v62  ;;  %v6363_v61 = vcombine.low %v4818_v48, %v4832_v18 }
 0x40e   :  { %v6240_v10 = vrot.slane %v6218_v16, %v11499_v62  ;;  %v8323_v20 = vcombine.high %v4818_v48, %v4832_v18  ;;  %v4858_v29 = vrot.slane %v4844_v38, %v11499_v62  ;;  %v4859_v56 = vcombine.high %v4851_v42, %v4851_v42 }
 0x40f   :  { %v6200_v58 = vcombine.low %v6191_v23, %v6198_v12  ;;  %v6365_v49 = vcombine.low %v11570_v63, %v11574_v30  ;;  %v8324_v11 = vcombine.high %v11570_v63, %v11574_v30  ;;  %v4867_v17 = vrot.slane %v4851_v42, %v11499_v62 }
 0x410   :  { %v4893_v3 = vcombine.high %v4541_v26, %v4541_v26  ;;  %v4860_v55 = vcombine.high %v4858_v29, %v4858_v29  ;;  %v4881_v2 = vrot.slane %v4859_v56, %v11499_v62  ;;  %v6207_v50 = vrot.slane %v6199_v41, %v11499_v62 }
 0x411   :  { %v6214_v53 = vrot.slane %v6200_v58, %v11499_v62  ;;  %v11596_v0 = vrot.slane %v6363_v61, %v11499_v62  ;;  %v4900_v21 = vrot.slane %v4541_v26, %v11499_v62  ;;  %v6247_v16 = vrot.slane %v8318_v6, %v11499_v62 }
 0x412   :  { %v4907_v36 = vrot.slane %v4893_v3, %v11499_v62  ;;  %v11602_v8 = vrot.slane %v4858_v29, %v11499_v62  ;;  %v11605_v19 = vrot.slane %v4860_v55, %v11499_v62  ;;  %v6248_v37 = vcombine.low %v11537_v59, %v11540_v28 }
 0x413   :  { %v6215_v35 = vcombine.low %v6207_v50, %v6214_v53  ;;  %v6412_v39 = vcombine.low %v4867_v17, %v4881_v2  ;;  %v8325_v27 = vcombine.high %v4867_v17, %v4881_v2  ;;  %v4908_v33 = vcombine.high %v4900_v21, %v4900_v21 }
 0x414   :  { %v4909_v15 = vcombine.high %v4907_v36, %v4907_v36  ;;  %v11610_v31 = vrot.slane %v8323_v20, %v11499_v62  ;;  %v6414_v6 = vcombine.low %v11602_v8, %v11605_v19  ;;  %v4916_v9 = vrot.slane %v4900_v21, %v11499_v62 }
 0x415   :  { %7736 = vperm.xlu0 %8901, %v6215_v35   ;;  %v11616_v54 = vrot.slane %v4907_v36, %v11499_v62  ;;  %v8326_v59 = vcombine.high %v11602_v8, %v11605_v19  ;;  %v4930_v28 = vrot.slane %v4908_v33, %v11499_v62  ;;  %v6249_v57 = vcombine.low %v6240_v10, %v6247_v16  ;;  %v4418_v33 = vpop.xlane.xlu1 %4417 }
 0x416   :  { %v11622_v4 = vrot.slane %v4909_v15, %v11499_v62  ;;  %v4542_v45 = vadd.f32 %v11489_v13, %v4408_v14  ;;  %v6289_v24 = vrot.slane %v6267_v40, %v11499_v62  ;;  %v6296_v25 = vrot.slane %v8320_v43, %v11499_v62 }
 0x417   :  { %v6297_v48 = vcombine.low %v11557_v34, %v11560_v5  ;;  %v11633_v23 = vrot.slane %v6412_v39, %v11499_v62  ;;  %v11636_v18 = vrot.slane %v8325_v27, %v11499_v62  ;;  %v6461_v12 = vcombine.low %v4916_v9, %v4930_v28 }
 0x418   :  { %v6256_v38 = vrot.slane %v6248_v37, %v11499_v62  ;;  %v6263_v42 = vrot.slane %v6249_v57, %v11499_v62  ;;  %v4942_v41 = vcombine.high %v4542_v45, %v4542_v45  ;;  %v4949_v32 = vrot.slane %v4542_v45, %v11499_v62 }
 0x419   :  { %v6298_v52 = vcombine.low %v6289_v24, %v6296_v25  ;;  %v8327_v40 = vcombine.high %v4916_v9, %v4930_v28  ;;  %v6463_v43 = vcombine.low %v11616_v54, %v11622_v4  ;;  %v8328_v34 = vcombine.high %v11616_v54, %v11622_v4 }
 0x41a   :  { %v4543_v5 = vadd.f32 %v11489_v13, %v4413_v7  ;;  %v6264_v26 = vcombine.low %v6256_v38, %v6263_v42  ;;  %v4956_v61 = vrot.slane %v4942_v41, %v11499_v62  ;;  %v4957_v10 = vcombine.high %v4949_v32, %v4949_v32 }
 0x41b   :  { %v6305_v20 = vrot.slane %v6297_v48, %v11499_v62  ;;  %v6312_v29 = vrot.slane %v6298_v52, %v11499_v62  ;;  %v6338_v17 = vrot.slane %v6316_v44, %v11499_v62  ;;  %v4965_v55 = vrot.slane %v4949_v32, %v11499_v62 }
 0x41c   :  { %v4991_v56 = vcombine.high %v4543_v5, %v4543_v5  ;;  %v4998_v58 = vrot.slane %v4543_v5, %v11499_v62  ;;  %7739 = vperm.xlu1 %8902, %v6264_v26   ;;  %v4958_v3 = vcombine.high %v4956_v61, %v4956_v61  ;;  %v4979_v2 = vrot.slane %v4957_v10, %v11499_v62 }
 0x41d   :  { %v6345_v50 = vrot.slane %v8322_v46, %v11499_v62  ;;  %v11661_v53 = vrot.slane %v6461_v12, %v11499_v62  ;;  %v6313_v21 = vcombine.low %v6305_v20, %v6312_v29  ;;  %v11665_v44 = vrot.slane %v4956_v61, %v11499_v62  ;;  %v4423_v12 = vpop.xlane.xlu0 %4422 }
 0x41e   :  { %v5005_v36 = vrot.slane %v4991_v56, %v11499_v62  ;;  %v5006_v16 = vcombine.high %v4998_v58, %v4998_v58  ;;  %v11668_v35 = vrot.slane %v4958_v3, %v11499_v62  ;;  %v6510_v37 = vcombine.low %v4965_v55, %v4979_v2 }
 0x41f   :  { %v6346_v39 = vcombine.low %v11580_v60, %v11583_v51  ;;  %v8329_v27 = vcombine.high %v4965_v55, %v4979_v2  ;;  %v6347_v46 = vcombine.low %v6338_v17, %v6345_v50  ;;  %v11674_v15 = vrot.slane %v8327_v40, %v11499_v62 }
 0x420   :  { %v5007_v47 = vcombine.high %v5005_v36, %v5005_v36  ;;  %v5028_v22 = vrot.slane %v5006_v16, %v11499_v62  ;;  %v6512_v14 = vcombine.low %v11665_v44, %v11668_v35  ;;  %7742 = vperm.xlu1 %8902, %v6313_v21   ;;  %v5014_v9 = vrot.slane %v4998_v58, %v11499_v62 }
 0x421   :  { %v11680_v28 = vrot.slane %v5005_v36, %v11499_v62  ;;  %v8330_v60 = vcombine.high %v11665_v44, %v11668_v35  ;;  %v11685_v51 = vrot.slane %v6510_v37, %v11499_v62  ;;  %v6354_v45 = vrot.slane %v6346_v39, %v11499_v62 }
 0x422   :  { %v11688_v57 = vrot.slane %v5007_v47, %v11499_v62  ;;  %v6361_v24 = vrot.slane %v6347_v46, %v11499_v62  ;;  %v4544_v25 = vadd.f32 %v11489_v13, %v4418_v33  ;;  %v6387_v48 = vrot.slane %v6365_v49, %v11499_v62 }
 0x423   :  { %v6394_v7 = vrot.slane %v8324_v11, %v11499_v62  ;;  %v11702_v38 = vrot.slane %v8329_v27, %v11499_v62  ;;  %v6559_v42 = vcombine.low %v5014_v9, %v5028_v22  ;;  %v8331_v41 = vcombine.high %v5014_v9, %v5028_v22  ;;  %v4428_v27 = vpop.xlane.xlu1 %4427 }
 0x424   :  { %v6561_v32 = vcombine.low %v11680_v28, %v11688_v57  ;;  %v6362_v52 = vcombine.low %v6354_v45, %v6361_v24  ;;  %v5040_v40 = vcombine.high %v4544_v25, %v4544_v25  ;;  %v5047_v5 = vrot.slane %v4544_v25, %v11499_v62 }
 0x425   :  { %v6395_v49 = vcombine.low %v11596_v0, %v11610_v31  ;;  %v6396_v26 = vcombine.low %v6387_v48, %v6394_v7  ;;  %v4545_v63 = vadd.f32 %v11489_v13, %v4423_v12  ;;  %v6436_v30 = vrot.slane %v6414_v6, %v11499_v62 }
 0x426   :  { %v6443_v11 = vrot.slane %v8326_v59, %v11499_v62  ;;  %v8332_v61 = vcombine.high %v11680_v28, %v11688_v57  ;;  %7745 = vperm.xlu1 %8902, %v6362_v52   ;;  %v5054_v10 = vrot.slane %v5040_v40, %v11499_v62  ;;  %v5055_v0 = vcombine.high %v5047_v5, %v5047_v5 }
 0x427   :  { %v6403_v31 = vrot.slane %v6395_v49, %v11499_v62  ;;  %v6410_v20 = vrot.slane %v6396_v26, %v11499_v62  ;;  %v5089_v29 = vcombine.high %v4545_v63, %v4545_v63  ;;  %v5096_v56 = vrot.slane %v4545_v63, %v11499_v62 }
 0x428   :  { %v6444_v6 = vcombine.low %v11633_v23, %v11636_v18  ;;  %v5056_v58 = vcombine.high %v5054_v10, %v5054_v10  ;;  %v5063_v8 = vrot.slane %v5047_v5, %v11499_v62  ;;  %v5077_v19 = vrot.slane %v5055_v0, %v11499_v62 }
 0x429   :  { %v6445_v59 = vcombine.low %v6436_v30, %v6443_v11  ;;  %v11729_v17 = vrot.slane %v6559_v42, %v11499_v62  ;;  %v6411_v3 = vcombine.low %v6403_v31, %v6410_v20  ;;  %v5103_v55 = vrot.slane %v5089_v29, %v11499_v62 }
 0x42a   :  { %v5104_v2 = vcombine.high %v5096_v56, %v5096_v56  ;;  %v11733_v50 = vrot.slane %v5054_v10, %v11499_v62  ;;  %v11736_v21 = vrot.slane %v5056_v58, %v11499_v62  ;;  %v6608_v23 = vcombine.low %v5063_v8, %v5077_v19 }
 0x42b   :  { %v8333_v18 = vcombine.high %v5063_v8, %v5077_v19  ;;  %7748 = vperm.xlu1 %8902, %v6411_v3   ;;  %v5105_v36 = vcombine.high %v5103_v55, %v5103_v55  ;;  %v6452_v37 = vrot.slane %v6444_v6, %v11499_v62  ;;  %v6459_v39 = vrot.slane %v6445_v59, %v11499_v62 }
 0x42c   :  { %v5126_v16 = vrot.slane %v5104_v2, %v11499_v62  ;;  %v11742_v47 = vrot.slane %v8331_v41, %v11499_v62  ;;  %v6610_v22 = vcombine.low %v11733_v50, %v11736_v21  ;;  %v5112_v46 = vrot.slane %v5096_v56, %v11499_v62  ;;  %v4433_v41 = vpop.xlane.xlu0 %4432  ;;  %v4438_v56 = vpop.xlane.xlu1 %4437 }
 0x42d   :  { %v11748_v33 = vrot.slane %v5103_v55, %v11499_v62  ;;  %v8334_v9 = vcombine.high %v11733_v50, %v11736_v21  ;;  %v11753_v45 = vrot.slane %v6608_v23, %v11499_v62  ;;  %v11756_v24 = vrot.slane %v5105_v36, %v11499_v62 }
 0x42e   :  { %v6460_v25 = vcombine.low %v6452_v37, %v6459_v39  ;;  %v4546_v48 = vadd.f32 %v11489_v13, %v4428_v27  ;;  %v6485_v7 = vrot.slane %v6463_v43, %v11499_v62  ;;  %v6492_v12 = vrot.slane %v8328_v34, %v11499_v62 }
 0x42f   :  { %v6493_v42 = vcombine.low %v11661_v53, %v11674_v15  ;;  %v11770_v52 = vrot.slane %v8333_v18, %v11499_v62  ;;  %v6657_v40 = vcombine.low %v5112_v46, %v5126_v16  ;;  %v8335_v5 = vcombine.high %v5112_v46, %v5126_v16 }
 0x430   :  { %v6659_v49 = vcombine.low %v11748_v33, %v11756_v24  ;;  %7751 = vperm.xlu1 %8902, %v6460_v25   ;;  %v8336_v43 = vcombine.high %v11748_v33, %v11756_v24  ;;  %v5138_v26 = vcombine.high %v4546_v48, %v4546_v48  ;;  %v5145_v54 = vrot.slane %v4546_v48, %v11499_v62 }
 0x431   :  { %v6494_v4 = vcombine.low %v6485_v7, %v6492_v12  ;;  %v4547_v34 = vadd.f32 %v11489_v13, %v4433_v41  ;;  %v6534_v53 = vrot.slane %v6512_v14, %v11499_v62  ;;  %v6541_v15 = vrot.slane %v8330_v60, %v11499_v62 }
 0x432   :  { %v6542_v63 = vcombine.low %v11685_v51, %v11702_v38  ;;  %v5152_v30 = vrot.slane %v5138_v26, %v11499_v62  ;;  %v5153_v11 = vcombine.high %v5145_v54, %v5145_v54  ;;  %v6501_v10 = vrot.slane %v6493_v42, %v11499_v62 }
 0x433   :  { %v6508_v0 = vrot.slane %v6494_v4, %v11499_v62  ;;  %v11792_v31 = vrot.slane %v6657_v40, %v11499_v62  ;;  %v5187_v20 = vcombine.high %v4547_v34, %v4547_v34  ;;  %v5194_v14 = vrot.slane %v4547_v34, %v11499_v62 }
 0x434   :  { %v6543_v29 = vcombine.low %v6534_v53, %v6541_v15  ;;  %v5154_v44 = vcombine.high %v5152_v30, %v5152_v30  ;;  %v5161_v35 = vrot.slane %v5145_v54, %v11499_v62  ;;  %v5175_v60 = vrot.slane %v5153_v11, %v11499_v62 }
 0x435   :  { %v6509_v51 = vcombine.low %v6501_v10, %v6508_v0  ;;  %v5201_v38 = vrot.slane %v5187_v20, %v11499_v62  ;;  %v5202_v6 = vcombine.high %v5194_v14, %v5194_v14  ;;  %v6550_v58 = vrot.slane %v6542_v63, %v11499_v62 }
 0x436   :  { %v6557_v8 = vrot.slane %v6543_v29, %v11499_v62  ;;  %v11801_v19 = vrot.slane %v5152_v30, %v11499_v62  ;;  %v11804_v59 = vrot.slane %v5154_v44, %v11499_v62  ;;  %v5210_v3 = vrot.slane %v5194_v14, %v11499_v62 }
 0x437   :  { %7754 = vperm.xlu1 %8902, %v6509_v51   ;;  %v4548_v55 = vadd.f32 %v11489_v13, %v4438_v56  ;;  %v6706_v2 = vcombine.low %v5161_v35, %v5175_v60  ;;  %v8337_v23 = vcombine.high %v5161_v35, %v5175_v60  ;;  %v5203_v18 = vcombine.high %v5201_v38, %v5201_v38 }
 0x438   :  { %v5224_v36 = vrot.slane %v5202_v6, %v11499_v62  ;;  %v6674_v16 = vrot.slane %v8335_v5, %v11499_v62  ;;  %v6708_v37 = vcombine.low %v11801_v19, %v11804_v59  ;;  %v11813_v39 = vrot.slane %v5201_v38, %v11499_v62  ;;  %v4453_v35 = vpop.xlane.xlu1 %4452 }
 0x439   :  { %v6558_v27 = vcombine.low %v6550_v58, %v6557_v8  ;;  %v8338_v46 = vcombine.high %v11801_v19, %v11804_v59  ;;  %v11818_v25 = vrot.slane %v5203_v18, %v11499_v62  ;;  %v5236_v7 = vcombine.high %v4548_v55, %v4548_v55 }
 0x43a   :  { %v6755_v48 = vcombine.low %v5210_v3, %v5224_v36  ;;  %v5243_v12 = vrot.slane %v4548_v55, %v11499_v62  ;;  %v6583_v42 = vrot.slane %v6561_v32, %v11499_v62  ;;  %v6590_v41 = vrot.slane %v8332_v61, %v11499_v62  ;;  %v4443_v61 = vpop.xlane.xlu0 %4442 }
 0x43b   :  { %7757 = vperm.xlu1 %8902, %v6558_v27   ;;  %v6591_v40 = vcombine.low %v11729_v17, %v11742_v47  ;;  %v11832_v5 = vrot.slane %v6706_v2, %v11499_v62  ;;  %v11835_v26 = vrot.slane %v8337_v23, %v11499_v62  ;;  %v8339_v54 = vcombine.high %v5210_v3, %v5224_v36 }
 0x43c   :  { %v6757_v4 = vcombine.low %v11813_v39, %v11818_v25  ;;  %v8340_v32 = vcombine.high %v11813_v39, %v11818_v25  ;;  %v5250_v34 = vrot.slane %v5236_v7, %v11499_v62  ;;  %v5251_v28 = vcombine.high %v5243_v12, %v5243_v12 }
 0x43d   :  { %v6592_v57 = vcombine.low %v6583_v42, %v6590_v41  ;;  %v11843_v17 = vrot.slane %v6755_v48, %v11499_v62  ;;  %v6632_v47 = vrot.slane %v6610_v22, %v11499_v62  ;;  %v6639_v53 = vrot.slane %v8334_v9, %v11499_v62 }
 0x43e   :  { %v6640_v15 = vcombine.low %v11753_v45, %v11770_v52  ;;  %v5252_v63 = vcombine.high %v5250_v34, %v5250_v34  ;;  %v5273_v30 = vrot.slane %v5251_v28, %v11499_v62  ;;  %v6599_v11 = vrot.slane %v6591_v40, %v11499_v62 }
 0x43f   :  { %v6606_v10 = vrot.slane %v6592_v57, %v11499_v62  ;;  %v5259_v0 = vrot.slane %v5243_v12, %v11499_v62  ;;  %v11860_v20 = vrot.slane %v5250_v34, %v11499_v62  ;;  %v6641_v22 = vcombine.low %v6632_v47, %v6639_v53  ;;  %v4458_v40 = vpop.xlane.xlu0 %4457 }
 0x440   :  { %v4549_v14 = vadd.f32 %v11489_v13, %v4443_v61  ;;  %v11864_v50 = vrot.slane %v5252_v63, %v11499_v62  ;;  %v6648_v9 = vrot.slane %v6640_v15, %v11499_v62  ;;  %v6681_v45 = vrot.slane %v6659_v49, %v11499_v62 }
 0x441   :  { %v6607_v21 = vcombine.low %v6599_v11, %v6606_v10  ;;  %v6655_v52 = vrot.slane %v6641_v22, %v11499_v62  ;;  %v6688_v44 = vrot.slane %v8336_v43, %v11499_v62  ;;  %v6772_v60 = vrot.slane %v8339_v54, %v11499_v62 }
 0x442   :  { %v5285_v29 = vcombine.high %v4549_v14, %v4549_v14  ;;  %v5292_v56 = vrot.slane %v4549_v14, %v11499_v62  ;;  %v6804_v51 = vcombine.low %v5259_v0, %v5273_v30  ;;  %v8341_v38 = vcombine.high %v5259_v0, %v5273_v30 }
 0x443   :  { %v6806_v6 = vcombine.low %v11860_v20, %v11864_v50  ;;  %7760 = vperm.xlu1 %8902, %v6607_v21   ;;  %v8342_v49 = vcombine.high %v11860_v20, %v11864_v50  ;;  %v6656_v58 = vcombine.low %v6648_v9, %v6655_v52  ;;  %v6689_v33 = vcombine.low %v11792_v31, %v6674_v16 }
 0x444   :  { %v5299_v8 = vrot.slane %v5285_v29, %v11499_v62  ;;  %v5300_v19 = vcombine.high %v5292_v56, %v5292_v56  ;;  %v5308_v59 = vrot.slane %v5292_v56, %v11499_v62  ;;  %v6690_v24 = vcombine.low %v6681_v45, %v6688_v44 }
 0x445   :  { %v4551_v43 = vadd.f32 %v11489_v13, %v4453_v35  ;;  %7763 = vperm.xlu0 %8901, %v6656_v58   ;;  %v6730_v2 = vrot.slane %v6708_v37, %v11499_v62  ;;  %v6737_v23 = vrot.slane %v8338_v46, %v11499_v62  ;;  %v6697_v18 = vrot.slane %v6689_v33, %v11499_v62  ;;  %v4463_v45 = vpop.xlane.xlu1 %4462 }
 0x446   :  { %v5301_v3 = vcombine.high %v5299_v8, %v5299_v8  ;;  %v5322_v55 = vrot.slane %v5300_v19, %v11499_v62  ;;  %v6704_v36 = vrot.slane %v6690_v24, %v11499_v62  ;;  %v11893_v31 = vrot.slane %v6804_v51, %v11499_v62 }
 0x447   :  { %v5383_v27 = vcombine.high %v4551_v43, %v4551_v43  ;;  %v5390_v48 = vrot.slane %v4551_v43, %v11499_v62  ;;  %v11896_v16 = vrot.slane %v5299_v8, %v11499_v62  ;;  %v6738_v41 = vcombine.low %v11832_v5, %v11835_v26 }
 0x448   :  { %v11899_v7 = vrot.slane %v5301_v3, %v11499_v62  ;;  %v6853_v12 = vcombine.low %v5308_v59, %v5322_v55  ;;  %v6705_v37 = vcombine.low %v6697_v18, %v6704_v36  ;;  %v6821_v54 = vrot.slane %v8341_v38, %v11499_v62 }
 0x449   :  { %v5397_v46 = vrot.slane %v5383_v27, %v11499_v62  ;;  %v5398_v42 = vcombine.high %v5390_v48, %v5390_v48  ;;  %v8343_v34 = vcombine.high %v5308_v59, %v5322_v55  ;;  %v5406_v57 = vrot.slane %v5390_v48, %v11499_v62 }
 0x44a   :  { %v6855_v28 = vcombine.low %v11896_v16, %v11899_v7  ;;  %v8344_v61 = vcombine.high %v11896_v16, %v11899_v7  ;;  %7766 = vperm.xlu1 %8902, %v6705_v37   ;;  %v6739_v15 = vcombine.low %v6730_v2, %v6737_v23  ;;  %v11912_v63 = vrot.slane %v6853_v12, %v11499_v62 }
 0x44b   :  { %v5399_v47 = vcombine.high %v5397_v46, %v5397_v46  ;;  %v5420_v53 = vrot.slane %v5398_v42, %v11499_v62  ;;  %v4552_v5 = vadd.f32 %v11489_v13, %v4458_v40  ;;  %v6779_v26 = vrot.slane %v6757_v4, %v11499_v62 }
 0x44c   :  { %v6786_v30 = vrot.slane %v8340_v32, %v11499_v62  ;;  %v11924_v11 = vrot.slane %v5397_v46, %v11499_v62  ;;  %v6746_v0 = vrot.slane %v6738_v41, %v11499_v62  ;;  %v6753_v22 = vrot.slane %v6739_v15, %v11499_v62 }
 0x44d   :  { %v11927_v10 = vrot.slane %v5399_v47, %v11499_v62  ;;  %v5432_v14 = vcombine.high %v4552_v5, %v4552_v5  ;;  %v5439_v21 = vrot.slane %v4552_v5, %v11499_v62  ;;  %v6787_v4 = vcombine.low %v11843_v17, %v6772_v60 }
 0x44e   :  { %v6788_v9 = vcombine.low %v6779_v26, %v6786_v30  ;;  %v11934_v39 = vrot.slane %v8343_v34, %v11499_v62  ;;  %v6951_v25 = vcombine.low %v5406_v57, %v5420_v53  ;;  %v8347_v32 = vcombine.high %v5406_v57, %v5420_v53 }
 0x44f   :  { %v6953_v52 = vcombine.low %v11924_v11, %v11927_v10  ;;  %v6754_v29 = vcombine.low %v6746_v0, %v6753_v22  ;;  %v5446_v56 = vrot.slane %v5432_v14, %v11499_v62  ;;  %v5447_v44 = vcombine.high %v5439_v21, %v5439_v21 }
 0x450   :  { %v5455_v35 = vrot.slane %v5439_v21, %v11499_v62  ;;  %v6795_v51 = vrot.slane %v6787_v4, %v11499_v62  ;;  %v6802_v17 = vrot.slane %v6788_v9, %v11499_v62  ;;  %v4553_v60 = vadd.f32 %v11489_v13, %v4463_v45 }
 0x451   :  { %v6828_v38 = vrot.slane %v6806_v6, %v11499_v62  ;;  %7769 = vperm.xlu1 %8902, %v6754_v29   ;;  %v5448_v58 = vcombine.high %v5446_v56, %v5446_v56  ;;  %v11945_v8 = vrot.slane %v5446_v56, %v11499_v62  ;;  %v5469_v19 = vrot.slane %v5447_v44, %v11499_v62  ;;  %v4473_v27 = vpop.xlane.xlu1 %4472 }
 0x452   :  { %v6835_v59 = vrot.slane %v8342_v49, %v11499_v62  ;;  %v6803_v33 = vcombine.low %v6795_v51, %v6802_v17  ;;  %v5481_v24 = vcombine.high %v4553_v60, %v4553_v60  ;;  %v5488_v43 = vrot.slane %v4553_v60, %v11499_v62  ;;  %v4468_v49 = vpop.xlane.xlu0 %4467 }
 0x453   :  { %v6836_v3 = vcombine.low %v11893_v31, %v6821_v54  ;;  %v11955_v6 = vrot.slane %v5448_v58, %v11499_v62  ;;  %v7000_v55 = vcombine.low %v5455_v35, %v5469_v19  ;;  %v8349_v2 = vcombine.high %v5455_v35, %v5469_v19 }
 0x454   :  { %v6837_v23 = vcombine.low %v6828_v38, %v6835_v59  ;;  %v8348_v18 = vcombine.high %v11924_v11, %v11927_v10  ;;  %v11960_v36 = vrot.slane %v6951_v25, %v11499_v62  ;;  %v5495_v20 = vrot.slane %v5481_v24, %v11499_v62 }
 0x455   :  { %v5496_v50 = vcombine.high %v5488_v43, %v5488_v43  ;;  %v11964_v48 = vrot.slane %v8347_v32, %v11499_v62  ;;  %v7002_v31 = vcombine.low %v11945_v8, %v11955_v6  ;;  %7772 = vperm.xlu1 %8902, %v6803_v33   ;;  %v5504_v12 = vrot.slane %v5488_v43, %v11499_v62 }
 0x456   :  { %v6844_v37 = vrot.slane %v6836_v3, %v11499_v62  ;;  %v8350_v46 = vcombine.high %v11945_v8, %v11955_v6  ;;  %v5497_v42 = vcombine.high %v5495_v20, %v5495_v20  ;;  %v6851_v40 = vrot.slane %v6837_v23, %v11499_v62 }
 0x457   :  { %v5518_v41 = vrot.slane %v5496_v50, %v11499_v62  ;;  %v11975_v54 = vrot.slane %v7000_v55, %v11499_v62  ;;  %v11978_v34 = vrot.slane %v8349_v2, %v11499_v62  ;;  %v4554_v57 = vadd.f32 %v11489_v13, %v4468_v49  ;;  %v4478_v22 = vpop.xlane.xlu0 %4477 }
 0x458   :  { %v4555_v47 = vadd.f32 %v11489_v13, %v4473_v27  ;;  %v11983_v53 = vrot.slane %v5495_v20, %v11499_v62  ;;  %v11986_v15 = vrot.slane %v5497_v42, %v11499_v62  ;;  %v6852_v26 = vcombine.low %v6844_v37, %v6851_v40 }
 0x459   :  { %v7049_v5 = vcombine.low %v5504_v12, %v5518_v41  ;;  %v5530_v30 = vcombine.high %v4554_v57, %v4554_v57  ;;  %v5537_v11 = vrot.slane %v4554_v57, %v11499_v62  ;;  %v8351_v14 = vcombine.high %v5504_v12, %v5518_v41 }
 0x45a   :  { %v5579_v10 = vcombine.high %v4555_v47, %v4555_v47  ;;  %v5586_v0 = vrot.slane %v4555_v47, %v11499_v62  ;;  %v7051_v21 = vcombine.low %v11983_v53, %v11986_v15  ;;  %7775 = vperm.xlu1 %8902, %v6852_v26   ;;  %v6975_v4 = vrot.slane %v6953_v52, %v11499_v62 }
 0x45b   :  { %v6982_v9 = vrot.slane %v8348_v18, %v11499_v62  ;;  %v8352_v45 = vcombine.high %v11983_v53, %v11986_v15  ;;  %v5544_v25 = vrot.slane %v5530_v30, %v11499_v62  ;;  %v5545_v32 = vcombine.high %v5537_v11, %v5537_v11 }
 0x45c   :  { %v5593_v29 = vrot.slane %v5579_v10, %v11499_v62  ;;  %v11999_v56 = vrot.slane %v7049_v5, %v11499_v62  ;;  %v5553_v44 = vrot.slane %v5537_v11, %v11499_v62  ;;  %v5594_v35 = vcombine.high %v5586_v0, %v5586_v0 }
 0x45d   :  { %v4556_v51 = vadd.f32 %v11489_v13, %v4478_v22  ;;  %v5546_v17 = vcombine.high %v5544_v25, %v5544_v25  ;;  %v5567_v52 = vrot.slane %v5545_v32, %v11499_v62  ;;  %v5602_v38 = vrot.slane %v5586_v0, %v11499_v62 }
 0x45e   :  { %v5595_v60 = vcombine.high %v5593_v29, %v5593_v29  ;;  %v12006_v58 = vrot.slane %v5544_v25, %v11499_v62  ;;  %v5616_v19 = vrot.slane %v5594_v35, %v11499_v62  ;;  %v12017_v2 = vrot.slane %v5593_v29, %v11499_v62 }
 0x45f   :  { %v5628_v59 = vcombine.high %v4556_v51, %v4556_v51  ;;  %v5635_v33 = vrot.slane %v4556_v51, %v11499_v62  ;;  %v12011_v24 = vrot.slane %v5546_v17, %v11499_v62  ;;  %v7098_v43 = vcombine.low %v5553_v44, %v5567_v52 }
 0x460   :  { %v8353_v3 = vcombine.high %v5553_v44, %v5567_v52  ;;  %v12014_v55 = vrot.slane %v5595_v60, %v11499_v62  ;;  %v7147_v23 = vcombine.low %v5602_v38, %v5616_v19  ;;  %v7066_v50 = vrot.slane %v8351_v14, %v11499_v62 }
 0x461   :  { %v5642_v18 = vrot.slane %v5628_v59, %v11499_v62  ;;  %v5643_v20 = vcombine.high %v5635_v33, %v5635_v33  ;;  %v7100_v49 = vcombine.low %v12006_v58, %v12011_v24  ;;  %v8355_v27 = vcombine.high %v5602_v38, %v5616_v19 }
 0x462   :  { %v6983_v12 = vcombine.low %v11960_v36, %v11964_v48  ;;  %v8354_v37 = vcombine.high %v12006_v58, %v12011_v24  ;;  %v12028_v42 = vrot.slane %v7098_v43, %v11499_v62  ;;  %v12031_v41 = vrot.slane %v8353_v3, %v11499_v62  ;;  %v4483_v48 = vpop.xlane.xlu1 %4482 }
 0x463   :  { %v7149_v40 = vcombine.low %v12017_v2, %v12014_v55  ;;  %v8356_v57 = vcombine.high %v12017_v2, %v12014_v55  ;;  %v12038_v47 = vrot.slane %v7147_v23, %v11499_v62  ;;  %v5644_v5 = vcombine.high %v5642_v18, %v5642_v18  ;;  %v4488_v0 = vpop.xlane.xlu0 %4487 }
 0x464   :  { %v5665_v36 = vrot.slane %v5643_v20, %v11499_v62  ;;  %v5651_v26 = vrot.slane %v5635_v33, %v11499_v62  ;;  %v6984_v30 = vcombine.low %v6975_v4, %v6982_v9  ;;  %v7024_v11 = vrot.slane %v7002_v31, %v11499_v62 }
 0x465   :  { %v7031_v10 = vrot.slane %v8350_v46, %v11499_v62  ;;  %v12048_v22 = vrot.slane %v5642_v18, %v11499_v62  ;;  %v12051_v14 = vrot.slane %v5644_v5, %v11499_v62  ;;  %v6991_v25 = vrot.slane %v6983_v12, %v11499_v62 }
 0x466   :  { %v7032_v32 = vcombine.low %v11975_v54, %v11978_v34  ;;  %v6998_v4 = vrot.slane %v6984_v30, %v11499_v62  ;;  %v4557_v8 = vadd.f32 %v11489_v13, %v4483_v48  ;;  %v4558_v6 = vadd.f32 %v11489_v13, %v4488_v0 }
 0x467   :  { %v7033_v9 = vcombine.low %v7024_v11, %v7031_v10  ;;  %v12060_v31 = vrot.slane %v8355_v27, %v11499_v62  ;;  %v7196_v46 = vcombine.low %v5651_v26, %v5665_v36  ;;  %v8357_v29 = vcombine.high %v5651_v26, %v5665_v36 }
 0x468   :  { %v7198_v44 = vcombine.low %v12048_v22, %v12051_v14  ;;  %v6999_v35 = vcombine.low %v6991_v25, %v6998_v4  ;;  %v7040_v51 = vrot.slane %v7032_v32, %v11499_v62  ;;  %v5677_v34 = vcombine.high %v4557_v8, %v4557_v8 }
 0x469   :  { %v7047_v54 = vrot.slane %v7033_v9, %v11499_v62  ;;  %v5684_v17 = vrot.slane %v4557_v8, %v11499_v62  ;;  %v5726_v52 = vcombine.high %v4558_v6, %v4558_v6  ;;  %v5733_v60 = vrot.slane %v4558_v6, %v11499_v62  ;;  %v4493_v9 = vpop.xlane.xlu1 %4492 }
 0x46a   :  { %v7073_v13 = vrot.slane %v7051_v21, %v11499_v62  ;;  %7784 = vperm.xlu1 %8902, %v6999_v35   ;;  %v5691_v19 = vrot.slane %v5677_v34, %v11499_v62  ;;  %v7080_v59 = vrot.slane %v8352_v45, %v11499_v62  ;;  %v7081_v33 = vcombine.low %v11999_v56, %v7066_v50 }
 0x46b   :  { %v7048_v38 = vcombine.low %v7040_v51, %v7047_v54  ;;  %v8358_v43 = vcombine.high %v12048_v22, %v12051_v14  ;;  %v5692_v3 = vcombine.high %v5684_v17, %v5684_v17  ;;  %v5740_v23 = vrot.slane %v5726_v52, %v11499_v62 }
 0x46c   :  { %v5741_v18 = vcombine.high %v5733_v60, %v5733_v60  ;;  %v12082_v21 = vrot.slane %v7196_v46, %v11499_v62  ;;  %v12085_v20 = vrot.slane %v8357_v29, %v11499_v62  ;;  %v5693_v27 = vcombine.high %v5691_v19, %v5691_v19 }
 0x46d   :  { %7787 = vperm.xlu0 %8901, %v7048_v38   ;;  %v7082_v12 = vcombine.low %v7073_v13, %v7080_v59  ;;  %v5700_v53 = vrot.slane %v5684_v17, %v11499_v62  ;;  %v5714_v15 = vrot.slane %v5692_v3, %v11499_v62  ;;  %v5742_v45 = vcombine.high %v5740_v23, %v5740_v23  ;;  %v12131_v17 = vld [vmem:[#allocation2] ss:$0 sm:$0xff] }
 0x46e   :  { %v12090_v56 = vrot.slane %v5741_v18, %v11499_v62  ;;  %v12093_v50 = vrot.slane %v5693_v27, %v11499_v62  ;;  %v5749_v5 = vrot.slane %v5733_v60, %v11499_v62  ;;  %v7089_v36 = vrot.slane %v7081_v33, %v11499_v62 }
 0x46f   :  { %v7096_v48 = vrot.slane %v7082_v12, %v11499_v62  ;;  %v12099_v26 = vrot.slane %v5691_v19, %v11499_v62  ;;  %v7245_v30 = vcombine.low %v5700_v53, %v5714_v15  ;;  %v8359_v11 = vcombine.high %v5700_v53, %v5714_v15  ;;  %v4498_v8 = vpop.xlane.xlu0 %4497 }
 0x470   :  { %v12102_v10 = vrot.slane %v5742_v45, %v11499_v62  ;;  %v12105_v0 = vrot.slane %v5740_v23, %v11499_v62  ;;  %v7294_v25 = vcombine.low %v5749_v5, %v12090_v56  ;;  %v7122_v4 = vrot.slane %v7100_v49, %v11499_v62 }
 0x471   :  { %v7097_v32 = vcombine.low %v7089_v36, %v7096_v48  ;;  %v7247_v6 = vcombine.low %v12099_v26, %v12093_v50  ;;  %v8360_v46 = vcombine.high %v12099_v26, %v12093_v50  ;;  %v12117_v29 = vrot.slane %v7245_v30, %v11499_v62 }
 0x472   :  { %v8361_v35 = vcombine.high %v5749_v5, %v12090_v56  ;;  %v12121_v51 = vrot.slane %v8359_v11, %v11499_v62  ;;  %v7296_v54 = vcombine.low %v12105_v0, %v12102_v10  ;;  %v7129_v49 = vrot.slane %v8354_v37, %v11499_v62 }
 0x473   :  { %7790 = vperm.xlu1 %8902, %v7097_v32   ;;  %v7130_v34 = vcombine.low %v12028_v42, %v12031_v41  ;;  %v4559_v52 = vadd.f32 %v12131_v17, %v4493_v9  ;;  %v4560_v60 = vadd.f32 %v12131_v17, %v4498_v8  ;;  %v7171_v13 = vrot.slane %v7149_v40, %v11499_v62 }
 0x474   :  { %v7178_v58 = vrot.slane %v8356_v57, %v11499_v62  ;;  %v8362_v24 = vcombine.high %v12105_v0, %v12102_v10  ;;  %v7131_v37 = vcombine.low %v7122_v4, %v7129_v49  ;;  %v7179_v41 = vcombine.low %v12038_v47, %v12060_v31 }
 0x475   :  { %v7138_v42 = vrot.slane %v7130_v34, %v11499_v62  ;;  %v5775_v38 = vcombine.high %v4559_v52, %v4559_v52  ;;  %v5782_v19 = vrot.slane %v4559_v52, %v11499_v62  ;;  %v5824_v59 = vcombine.high %v4560_v60, %v4560_v60  ;;  %v4503_v49 = vpop.xlane.xlu1 %4502 }
 0x476   :  { %v5831_v40 = vrot.slane %v4560_v60, %v11499_v62  ;;  %v7145_v33 = vrot.slane %v7131_v37, %v11499_v62  ;;  %v7180_v3 = vcombine.low %v7171_v13, %v7178_v58  ;;  %v7187_v55 = vrot.slane %v7179_v41, %v11499_v62 }
 0x477   :  { %v7220_v2 = vrot.slane %v7198_v44, %v11499_v62  ;;  %v5789_v57 = vrot.slane %v5775_v38, %v11499_v62  ;;  %v5790_v23 = vcombine.high %v5782_v19, %v5782_v19  ;;  %v5838_v47 = vrot.slane %v5824_v59, %v11499_v62 }
 0x478   :  { %v7227_v31 = vrot.slane %v8358_v43, %v11499_v62  ;;  %v7146_v18 = vcombine.low %v7138_v42, %v7145_v33  ;;  %v5798_v27 = vrot.slane %v5782_v19, %v11499_v62  ;;  %v5839_v12 = vcombine.high %v5831_v40, %v5831_v40 }
 0x479   :  { %v7194_v53 = vrot.slane %v7180_v3, %v11499_v62  ;;  %v5791_v15 = vcombine.high %v5789_v57, %v5789_v57  ;;  %v5812_v45 = vrot.slane %v5790_v23, %v11499_v62  ;;  %v5840_v56 = vcombine.high %v5838_v47, %v5838_v47 }
 0x47a   :  { %v12163_v22 = vrot.slane %v5831_v40, %v11499_v62  ;;  %7793 = vperm.xlu0 %8901, %v7146_v18   ;;  %v12166_v14 = vrot.slane %v5789_v57, %v11499_v62  ;;  %v5861_v44 = vrot.slane %v5839_v12, %v11499_v62  ;;  %v7228_v5 = vcombine.low %v12082_v21, %v12085_v20 }
 0x47b   :  { %v7195_v43 = vcombine.low %v7187_v55, %v7194_v53  ;;  %v12172_v36 = vrot.slane %v5791_v15, %v11499_v62  ;;  %v7343_v48 = vcombine.low %v5798_v27, %v5812_v45  ;;  %v8363_v30 = vcombine.high %v5798_v27, %v5812_v45  ;;  %v4508_v21 = vpop.xlane.xlu0 %4507 }
 0x47c   :  { %v12175_v11 = vrot.slane %v5840_v56, %v11499_v62  ;;  %v12178_v32 = vrot.slane %v7294_v25, %v11499_v62  ;;  %v7311_v4 = vrot.slane %v8361_v35, %v11499_v62  ;;  %v12182_v9 = vrot.slane %v5838_v47, %v11499_v62 }
 0x47d   :  { %7796 = vperm.xlu1 %8902, %v7195_v43   ;;  %v7229_v8 = vcombine.low %v7220_v2, %v7227_v31  ;;  %v7345_v20 = vcombine.low %v12166_v14, %v12172_v36  ;;  %v7392_v34 = vcombine.low %v12163_v22, %v5861_v44  ;;  %v8365_v52 = vcombine.high %v12163_v22, %v5861_v44 }
 0x47e   :  { %v7236_v60 = vrot.slane %v7228_v5, %v11499_v62  ;;  %v8364_v25 = vcombine.high %v12166_v14, %v12172_v36  ;;  %v12192_v35 = vrot.slane %v7343_v48, %v11499_v62  ;;  %v12195_v13 = vrot.slane %v8363_v30, %v11499_v62 }
 0x47f   :  { %v7394_v58 = vcombine.low %v12182_v9, %v12175_v11  ;;  %v7243_v37 = vrot.slane %v7229_v8, %v11499_v62  ;;  %v4561_v42 = vadd.f32 %v12131_v17, %v4503_v49  ;;  %v4562_v41 = vadd.f32 %v12131_v17, %v4508_v21 }
 0x480   :  { %v7269_v38 = vrot.slane %v7247_v6, %v11499_v62  ;;  %v7276_v19 = vrot.slane %v8360_v46, %v11499_v62  ;;  %v7277_v59 = vcombine.low %v12117_v29, %v12121_v51  ;;  %v7318_v40 = vrot.slane %v7296_v54, %v11499_v62 }
 0x481   :  { %v7325_v33 = vrot.slane %v8362_v24, %v11499_v62  ;;  %v7244_v3 = vcombine.low %v7236_v60, %v7243_v37  ;;  %v5873_v55 = vcombine.high %v4561_v42, %v4561_v42  ;;  %v5880_v2 = vrot.slane %v4561_v42, %v11499_v62  ;;  %v4513_v15 = vpop.xlane.xlu1 %4512 }
 0x482   :  { %v5922_v6 = vcombine.high %v4562_v41, %v4562_v41  ;;  %v8366_v57 = vcombine.high %v12182_v9, %v12175_v11  ;;  %v12221_v50 = vrot.slane %v7392_v34, %v11499_v62  ;;  %v5929_v26 = vrot.slane %v4562_v41, %v11499_v62  ;;  %v4518_v54 = vpop.xlane.xlu0 %4517 }
 0x483   :  { %v7278_v46 = vcombine.low %v7269_v38, %v7276_v19  ;;  %7799 = vperm.xlu0 %8901, %v7244_v3   ;;  %v5887_v10 = vrot.slane %v5873_v55, %v11499_v62  ;;  %v5888_v0 = vcombine.high %v5880_v2, %v5880_v2  ;;  %v7285_v51 = vrot.slane %v7277_v59, %v11499_v62 }
 0x484   :  { %v5936_v29 = vrot.slane %v5922_v6, %v11499_v62  ;;  %v5937_v24 = vcombine.high %v5929_v26, %v5929_v26  ;;  %v7326_v47 = vcombine.low %v12178_v32, %v7311_v4  ;;  %v7327_v31 = vcombine.low %v7318_v40, %v7325_v33 }
 0x485   :  { %v7292_v23 = vrot.slane %v7278_v46, %v11499_v62  ;;  %v5889_v18 = vcombine.high %v5887_v10, %v5887_v10  ;;  %v5896_v27 = vrot.slane %v5880_v2, %v11499_v62  ;;  %v5910_v12 = vrot.slane %v5888_v0, %v11499_v62 }
 0x486   :  { %v5938_v53 = vcombine.high %v5936_v29, %v5936_v29  ;;  %v12232_v45 = vrot.slane %v5887_v10, %v11499_v62  ;;  %v5945_v56 = vrot.slane %v5929_v26, %v11499_v62  ;;  %v5959_v22 = vrot.slane %v5937_v24, %v11499_v62  ;;  %v4448_v42 = vpop.xlane.xlu0 %4447 }
 0x487   :  { %v7293_v44 = vcombine.low %v7285_v51, %v7292_v23  ;;  %v12237_v43 = vrot.slane %v5889_v18, %v11499_v62  ;;  %v7441_v5 = vcombine.low %v5896_v27, %v5910_v12  ;;  %v8367_v48 = vcombine.high %v5896_v27, %v5910_v12 }
 0x488   :  { %v12240_v30 = vrot.slane %v5938_v53, %v11499_v62  ;;  %v12243_v32 = vrot.slane %v8365_v52, %v11499_v62  ;;  %v12246_v4 = vrot.slane %v5936_v29, %v11499_v62  ;;  %v7341_v8 = vrot.slane %v7327_v31, %v11499_v62 }
 0x489   :  { %7802 = vperm.xlu1 %8902, %v7293_v44   ;;  %v4563_v49 = vadd.f32 %v12131_v17, %v4513_v15  ;;  %v7443_v21 = vcombine.low %v12232_v45, %v12237_v43  ;;  %v7490_v34 = vcombine.low %v5945_v56, %v5959_v22  ;;  %v8369_v60 = vcombine.high %v5945_v56, %v5959_v22 }
 0x48a   :  { %v7334_v37 = vrot.slane %v7326_v47, %v11499_v62  ;;  %v8368_v52 = vcombine.high %v12232_v45, %v12237_v43  ;;  %v12256_v41 = vrot.slane %v7441_v5, %v11499_v62  ;;  %v12259_v38 = vrot.slane %v8367_v48, %v11499_v62 }
 0x48b   :  { %v7492_v19 = vcombine.low %v12246_v4, %v12240_v30  ;;  %v5971_v40 = vcombine.high %v4563_v49, %v4563_v49  ;;  %v5978_v33 = vrot.slane %v4563_v49, %v11499_v62  ;;  %v4564_v3 = vadd.f32 %v12131_v17, %v4518_v54 }
 0x48c   :  { %v7342_v59 = vcombine.low %v7334_v37, %v7341_v8  ;;  %v7367_v55 = vrot.slane %v7345_v20, %v11499_v62  ;;  %v7374_v2 = vrot.slane %v8364_v25, %v11499_v62  ;;  %v7375_v6 = vcombine.low %v12192_v35, %v12195_v13 }
 0x48d   :  { %v4550_v26 = vadd.f32 %v12131_v17, %v4448_v42  ;;  %v8370_v46 = vcombine.high %v12246_v4, %v12240_v30  ;;  %v5985_v10 = vrot.slane %v5971_v40, %v11499_v62  ;;  %v5986_v0 = vcombine.high %v5978_v33, %v5978_v33 }
 0x48e   :  { %7805 = vperm.xlu0 %8901, %v7342_v59   ;;  %v6020_v29 = vcombine.high %v4564_v3, %v4564_v3  ;;  %v5994_v51 = vrot.slane %v5978_v33, %v11499_v62  ;;  %v6027_v14 = vrot.slane %v4564_v3, %v11499_v62  ;;  %v7376_v36 = vcombine.low %v7367_v55, %v7374_v2  ;;  %v4523_v59 = vpop.xlane.xlu1 %4522 }
 0x48f   :  { %v5334_v20 = vcombine.high %v4550_v26, %v4550_v26  ;;  %v5987_v25 = vcombine.high %v5985_v10, %v5985_v10  ;;  %v6008_v54 = vrot.slane %v5986_v0, %v11499_v62  ;;  %v7383_v13 = vrot.slane %v7375_v6, %v11499_v62 }
 0x490   :  { %v6034_v35 = vrot.slane %v6020_v29, %v11499_v62  ;;  %v12282_v24 = vrot.slane %v5985_v10, %v11499_v62  ;;  %v6035_v23 = vcombine.high %v6027_v14, %v6027_v14  ;;  %v7390_v47 = vrot.slane %v7376_v36, %v11499_v62 }
 0x491   :  { %v5341_v31 = vrot.slane %v4550_v26, %v11499_v62  ;;  %v12287_v18 = vrot.slane %v5987_v25, %v11499_v62  ;;  %v7539_v27 = vcombine.low %v5994_v51, %v6008_v54  ;;  %v8371_v12 = vcombine.high %v5994_v51, %v6008_v54 }
 0x492   :  { %v6036_v53 = vcombine.high %v6034_v35, %v6034_v35  ;;  %v12290_v15 = vrot.slane %v7490_v34, %v11499_v62  ;;  %v6057_v56 = vrot.slane %v6035_v23, %v11499_v62  ;;  %v7391_v22 = vcombine.low %v7383_v13, %v7390_v47  ;;  %v4528_v16 = vpop.xlane.xlu1 %4527 }
 0x493   :  { %v5348_v44 = vrot.slane %v5334_v20, %v11499_v62  ;;  %v12295_v5 = vrot.slane %v8369_v60, %v11499_v62  ;;  %v7541_v48 = vcombine.low %v12282_v24, %v12287_v18  ;;  %v6043_v8 = vrot.slane %v6027_v14, %v11499_v62 }
 0x494   :  { %v12301_v49 = vrot.slane %v6034_v35, %v11499_v62  ;;  %v8372_v34 = vcombine.high %v12282_v24, %v12287_v18  ;;  %v12306_v37 = vrot.slane %v7539_v27, %v11499_v62  ;;  %v12309_v42 = vrot.slane %v6036_v53, %v11499_v62  ;;  %7808 = vperm.xlu1 %8902, %v7391_v22  }
 0x495   :  { %v5349_v60 = vcombine.high %v5341_v31, %v5341_v31  ;;  %v12312_v40 = vrot.slane %v8371_v12, %v11499_v62  ;;  %v7588_v33 = vcombine.low %v6043_v8, %v6057_v56  ;;  %v8373_v3 = vcombine.high %v6043_v8, %v6057_v56 }
 0x496   :  { %v5350_v55 = vcombine.high %v5348_v44, %v5348_v44  ;;  %v7590_v2 = vcombine.low %v12301_v49, %v12309_v42  ;;  %v5357_v6 = vrot.slane %v5341_v31, %v11499_v62  ;;  %v12318_v26 = vrot.slane %v5348_v44, %v11499_v62 }
 0x497   :  { %v7416_v10 = vrot.slane %v7394_v58, %v11499_v62  ;;  %v5371_v0 = vrot.slane %v5349_v60, %v11499_v62  ;;  %v7423_v51 = vrot.slane %v8366_v57, %v11499_v62  ;;  %v7424_v14 = vcombine.low %v12221_v50, %v12243_v32 }
 0x498   :  { %v12326_v29 = vrot.slane %v5350_v55, %v11499_v62  ;;  %v4565_v36 = vadd.f32 %v12131_v17, %v4523_v59  ;;  %v6877_v58 = vrot.slane %v6855_v28, %v11499_v62  ;;  %v6884_v20 = vrot.slane %v8344_v61, %v11499_v62 }
 0x499   :  { %v6885_v25 = vcombine.low %v11912_v63, %v11934_v39  ;;  %v8374_v11 = vcombine.high %v12301_v49, %v12309_v42  ;;  %v12348_v9 = vrot.slane %v7588_v33, %v11499_v62  ;;  %v12351_v57 = vrot.slane %v8373_v3, %v11499_v62 }
 0x49a   :  { %v6902_v50 = vcombine.low %v5357_v6, %v5371_v0  ;;  %v8345_v32 = vcombine.high %v5357_v6, %v5371_v0  ;;  %v7425_v28 = vcombine.low %v7416_v10, %v7423_v51  ;;  %v6069_v54 = vcombine.high %v4565_v36, %v4565_v36 }
 0x49b   :  { %v6076_v35 = vrot.slane %v4565_v36, %v11499_v62  ;;  %v6904_v7 = vcombine.low %v12318_v26, %v12326_v29  ;;  %v8346_v61 = vcombine.high %v12318_v26, %v12326_v29  ;;  %v7432_v63 = vrot.slane %v7424_v14, %v11499_v62 }
 0x49c   :  { %v6886_v39 = vcombine.low %v6877_v58, %v6884_v20  ;;  %v7439_v13 = vrot.slane %v7425_v28, %v11499_v62  ;;  %v6083_v23 = vrot.slane %v6069_v54, %v11499_v62  ;;  %v6893_v31 = vrot.slane %v6885_v25, %v11499_v62 }
 0x49d   :  { %v6084_v47 = vcombine.high %v6076_v35, %v6076_v35  ;;  %v4566_v12 = vadd.f32 %v12131_v17, %v4528_v16  ;;  %v7465_v53 = vrot.slane %v7443_v21, %v11499_v62  ;;  %v7472_v56 = vrot.slane %v8368_v52, %v11499_v62 }
 0x49e   :  { %v6900_v27 = vrot.slane %v6886_v39, %v11499_v62  ;;  %v7440_v22 = vcombine.low %v7432_v63, %v7439_v13  ;;  %v6085_v44 = vcombine.high %v6083_v23, %v6083_v23  ;;  %v6092_v8 = vrot.slane %v6076_v35, %v11499_v62 }
 0x49f   :  { %v6106_v60 = vrot.slane %v6084_v47, %v11499_v62  ;;  %v6118_v33 = vcombine.high %v4566_v12, %v4566_v12  ;;  %v6125_v17 = vrot.slane %v4566_v12, %v11499_v62  ;;  %v7473_v3 = vcombine.low %v12256_v41, %v12259_v38 }
 0x4a0   :  { %v6901_v59 = vcombine.low %v6893_v31, %v6900_v27  ;;  %v6912_v21 = vrot.slane %v6902_v50, %v11499_v62  ;;  %7811 = vperm.xlu0 %8901, %v7440_v22   ;;  %v6099_v55 = vrot.slane %v6083_v23, %v11499_v62  ;;  %v6113_v45 = vrot.slane %v6085_v44, %v11499_v62 }
 0x4a1   :  { %v7474_v43 = vcombine.low %v7465_v53, %v7472_v56  ;;  %v6919_v52 = vrot.slane %v8345_v32, %v11499_v62  ;;  %v7637_v6 = vcombine.low %v6092_v8, %v6106_v60  ;;  %v6132_v26 = vrot.slane %v6118_v33, %v11499_v62 }
 0x4a2   :  { %7778 = vperm.xlu1 %8902, %v6901_v59   ;;  %v6133_v10 = vcombine.high %v6125_v17, %v6125_v17  ;;  %v8375_v0 = vcombine.high %v6092_v8, %v6106_v60  ;;  %v7639_v29 = vcombine.low %v6099_v55, %v6113_v45  ;;  %v6141_v51 = vrot.slane %v6125_v17, %v11499_v62 }
 0x4a3   :  { %v7481_v41 = vrot.slane %v7473_v3, %v11499_v62  ;;  %v8376_v38 = vcombine.high %v6099_v55, %v6113_v45  ;;  %v6134_v14 = vcombine.high %v6132_v26, %v6132_v26  ;;  %v7488_v58 = vrot.slane %v7474_v43, %v11499_v62 }
 0x4a4   :  { %v6155_v36 = vrot.slane %v6133_v10, %v11499_v62  ;;  %v7514_v20 = vrot.slane %v7492_v19, %v11499_v62  ;;  %v7521_v25 = vrot.slane %v8370_v46, %v11499_v62  ;;  %v7522_v50 = vcombine.low %v12290_v15, %v12295_v5  ;;  %v7740_v10 = vpop.permute.xlu1 %7739 }
 0x4a5   :  { %v7563_v32 = vrot.slane %v7541_v48, %v11499_v62  ;;  %v7647_v28 = vrot.slane %v7637_v6, %v11499_v62  ;;  %v6148_v54 = vrot.slane %v6132_v26, %v11499_v62  ;;  %v6162_v35 = vrot.slane %v6134_v14, %v11499_v62 }
 0x4a6   :  { %v7489_v19 = vcombine.low %v7481_v41, %v7488_v58  ;;  %v7654_v16 = vrot.slane %v8375_v0, %v11499_v62  ;;  %v7523_v63 = vcombine.low %v7514_v20, %v7521_v25  ;;  %v7570_v30 = vrot.slane %v8372_v34, %v11499_v62  ;;  %v7737_v20 = vpop.permute.xlu0 %7736 }
 0x4a7   :  { %v7571_v4 = vcombine.low %v12306_v37, %v12312_v40  ;;  %v7686_v46 = vcombine.low %v6141_v51, %v6155_v36  ;;  %v8377_v15 = vcombine.high %v6141_v51, %v6155_v36  ;;  %v7688_v5 = vcombine.low %v6148_v54, %v6162_v35 }
 0x4a8   :  { %7814 = vperm.xlu0 %8901, %v7489_v19   ;;  %v7530_v48 = vrot.slane %v7522_v50, %v11499_v62  ;;  %v8378_v39 = vcombine.high %v6148_v54, %v6162_v35  ;;  %v7537_v13 = vrot.slane %v7523_v63, %v11499_v62  ;;  %v7572_v23 = vcombine.low %v7563_v32, %v7570_v30  ;;  %v7743_v0 = vpop.permute.xlu1 %7742 }
 0x4a9   :  { %v7612_v47 = vrot.slane %v7590_v2, %v11499_v62  ;;  %v7579_v24 = vrot.slane %v7571_v4, %v11499_v62  ;;  %v7619_v18 = vrot.slane %v8374_v11, %v11499_v62  ;;  %v6926_v34 = vrot.slane %v6904_v7, %v11499_v62 }
 0x4aa   :  { %v6933_v37 = vrot.slane %v8346_v61, %v11499_v62  ;;  %v7538_v40 = vcombine.low %v7530_v48, %v7537_v13  ;;  %v7586_v31 = vrot.slane %v7572_v23, %v11499_v62  ;;  %v6934_v27 = vcombine.low %v6912_v21, %v6919_v52 }
 0x4ab   :  { %v7661_v12 = vrot.slane %v7639_v29, %v11499_v62  ;;  %v7621_v53 = vcombine.low %v7612_v47, %v7619_v18  ;;  %v7668_v2 = vrot.slane %v8376_v38, %v11499_v62  ;;  %v7620_v49 = vcombine.low %v12348_v9, %v12351_v57 }
 0x4ac   :  { %v6935_v56 = vcombine.low %v6926_v34, %v6933_v37  ;;  %7817 = vperm.xlu0 %8901, %v7538_v40   ;;  %v7587_v22 = vcombine.low %v7579_v24, %v7586_v31  ;;  %v7710_v42 = vrot.slane %v7688_v5, %v11499_v62  ;;  %v6942_v11 = vrot.slane %v6934_v27, %v11499_v62  ;;  %v12440_v29 = vpop.permute.xlu1 %7745 }
 0x4ad   :  { %v7670_v61 = vcombine.low %v7661_v12, %v7668_v2  ;;  %v7717_v44 = vrot.slane %v8378_v39, %v11499_v62  ;;  %v7696_v8 = vrot.slane %v7686_v46, %v11499_v62  ;;  %v7703_v60 = vrot.slane %v8377_v15, %v11499_v62 }
 0x4ae   :  { %v6949_v7 = vrot.slane %v6935_v56, %v11499_v62  ;;  %v7635_v59 = vrot.slane %v7621_v53, %v11499_v62  ;;  %v7669_v33 = vcombine.low %v7647_v28, %v7654_v16  ;;  %v7628_v9 = vrot.slane %v7620_v49, %v11499_v62 }
 0x4af   :  { %v7684_v57 = vrot.slane %v7670_v61, %v11499_v62  ;;  %v7719_v3 = vcombine.low %v7710_v42, %v7717_v44  ;;  %v7718_v45 = vcombine.low %v7696_v8, %v7703_v60  ;;  %v12823_v16 = vlaneseq }
 0x4b0   :  { %v6950_v17 = vcombine.low %v6942_v11, %v6949_v7  ;;  %7820 = vperm.xlu0 %8901, %v7587_v22   ;;  %v7636_v21 = vcombine.low %v7628_v9, %v7635_v59  ;;  %v7677_v55 = vrot.slane %v7669_v33, %v11499_v62  ;;  %v12442_v51 = vpop.permute.xlu1 %7748  ;;  %vm7926_vm8 = vcmask 917312  }
 0x4b1   :  { %v7733_v52 = vrot.slane %v7719_v3, %v11499_v62  ;;  %v7726_v6 = vrot.slane %v7718_v45, %v11499_v62  ;;  %v12465_v63 = vand.u32 127, %v12823_v16  ;;  %vm7933_vm15 = vcmask 982912  }
 0x4b2   :  { %7781 = vperm.xlu1 %8902, %v6950_v17   ;;  %v7685_v43 = vcombine.low %v7677_v55, %v7684_v57  ;;  %vm7940_vm14 = vcmask 1048512   ;;  %vm8039_vm9 = vcmp.lt.s32.totalorder %v12823_v16, 256 }
 0x4b3   :  { %v7734_v26 = vcombine.low %v7726_v6, %v7733_v52  ;;  %v7837_v4 = vadd.s32 4294967288, %v12465_v63  ;;  %v7844_v15 = vadd.s32 4294967280, %v12465_v63  ;;  %v7851_v5 = vadd.s32 4294967272, %v12465_v63 }
 0x4b4   :  { %7823 = vperm.xlu0 %8901, %v7636_v21   ;;  %v12444_v41 = vpop.permute.xlu1 %7751  ;;  %v7835_v48 = vsub.s32 %v12465_v63, %v12822_v1  ;;  %v7858_v23 = vadd.s32 4294967264, %v12465_v63  ;;  %v7865_v18 = vadd.s32 4294967256, %v12465_v63  ;;  %v7872_v56 = vadd.s32 4294967248, %v12465_v63 }
 0x4b5   :  { %v7840_v13 = vsub.s32 %v7837_v4, %v12822_v1  ;;  %v7847_v24 = vsub.s32 %v7844_v15, %v12822_v1  ;;  %v7854_v34 = vsub.s32 %v7851_v5, %v12822_v1  ;;  %v7879_v11 = vadd.s32 4294967240, %v12465_v63 }
 0x4b6   :  { %v7836_v40 = vrot.slane %v7737_v20, %v7835_v48  ;;  %v7861_v53 = vsub.s32 %v7858_v23, %v12822_v1  ;;  %v7868_v42 = vsub.s32 %v7865_v18, %v12822_v1  ;;  %v7886_v8 = vadd.s32 4294967232, %v12465_v63 }
 0x4b7   :  { %v7841_v12 = vrot.slane %v7740_v10, %v7840_v13  ;;  %v7848_v49 = vrot.slane %v7743_v0, %v7847_v24  ;;  %v7855_v7 = vrot.slane %v12440_v29, %v7854_v34  ;;  %v7875_v57 = vsub.s32 %v7872_v56, %v12822_v1 }
 0x4b8   :  { %7826 = vperm.xlu0 %8901, %v7685_v43   ;;  %v12446_v38 = vpop.permute.xlu1 %7754  ;;  %v7862_v9 = vrot.slane %v12442_v51, %v7861_v53  ;;  %v7869_v21 = vrot.slane %v12444_v41, %v7868_v42  ;;  %v7882_v55 = vsub.s32 %v7879_v11, %v12822_v1  ;;  %v7893_v52 = vadd.s32 4294967224, %v12465_v63 }
 0x4b9   :  { %v7843_v17 = vsel %vm7842_vm13, %v7841_v12, %v7836_v40  ;;  %v7889_v10 = vsub.s32 %v7886_v8, %v12822_v1  ;;  %v7900_v0 = vadd.s32 4294967216, %v12465_v63  ;;  %v7921_v15 = vadd.s32 4294967192, %v12465_v63 }
 0x4ba   :  { %v7850_v3 = vsel %vm7849_vm3, %v7848_v49, %v7843_v17  ;;  %v7935_v40 = vadd.s32 4294967176, %v12465_v63 }
 0x4bb   :  { %v7857_v43 = vsel %vm7856_vm10, %v7855_v7, %v7850_v3 }
 0x4bc   :  { %7829 = vperm.xlu0 %8901, %v7734_v26   ;;  %v12448_v14 = vpop.permute.xlu1 %7757  ;;  %v7864_v20 = vsel %vm7863_vm1, %v7862_v9, %v7857_v43 }
 0x4bd   :  { %v7883_v4 = vrot.slane %v12448_v14, %v7882_v55 }
 0x4c2   :  { %v12450_v36 = vpop.permute.xlu1 %7760 }
 0x4c3   :  { %v7890_v23 = vrot.slane %v12450_v36, %v7889_v10 }
 0x4c4   :  { %v12456_v50 = vpop.permute.xlu0 %7763 }
 0x4c9   :  { %v12452_v58 = vpop.permute.xlu1 %7766 }
 0x4d0   :  { %v12454_v25 = vpop.permute.xlu1 %7769 }
 0x4d4   :  { %v12458_v28 = vpop.permute.xlu1 %7772 }
 0x4d9   :  { %v12460_v35 = vpop.permute.xlu1 %7775 }
 0x4e9   :  { %v7785_v30 = vpop.permute.xlu1 %7784 }
 0x4ea   :  { %v7945_v2 = vrot.slane %v7785_v30, %v7835_v48  ;;  %v7871_v30 = vsel %vm7870_vm2, %v7869_v21, %v7864_v20  ;;  %v7896_v48 = vsub.s32 %v7893_v52, %v12822_v1 }
 0x4ec   :  { %v7788_v32 = vpop.permute.xlu0 %7787 }
 0x4ed   :  { %v7949_v37 = vrot.slane %v7788_v32, %v7840_v13  ;;  %v7876_v32 = vrot.slane %v12446_v38, %v7875_v57  ;;  %v7928_v38 = vadd.s32 4294967184, %v12465_v63 }
 0x4ef   :  { %v7950_v61 = vsel %vm7842_vm13, %v7949_v37, %v7945_v2  ;;  %v7931_v49 = vsub.s32 %v7928_v38, %v12822_v1 }
 0x4f2   :  { %v7791_v39 = vpop.permute.xlu1 %7790 }
 0x4f3   :  { %v7954_v31 = vrot.slane %v7791_v39, %v7847_v24  ;;  %v7903_v24 = vsub.s32 %v7900_v0, %v12822_v1 }
 0x4f5   :  { %v7955_v60 = vsel %vm7849_vm3, %v7954_v31, %v7950_v61 }
 0x4f9   :  { %v7794_v54 = vpop.permute.xlu0 %7793 }
 0x4fa   :  { %v7959_v44 = vrot.slane %v7794_v54, %v7854_v34  ;;  %v7907_v54 = vadd.s32 4294967208, %v12465_v63  ;;  %v7878_v34 = vsel %vm7877_vm7, %v7876_v32, %v7871_v30 }
 0x4fb   :  { %v7885_v31 = vsel %vm7884_vm0, %v7883_v4, %v7878_v34 }
 0x4fc   :  { %v7797_v27 = vpop.permute.xlu1 %7796  ;;  %v7960_v6 = vsel %vm7856_vm10, %v7959_v44, %v7955_v60  ;;  %v7910_v37 = vsub.s32 %v7907_v54, %v12822_v1 }
 0x4fd   :  { %v7964_v59 = vrot.slane %v7797_v27, %v7861_v53  ;;  %v7924_v27 = vsub.s32 %v7921_v15, %v12822_v1  ;;  %v7897_v53 = vrot.slane %v12456_v50, %v7896_v48  ;;  %v7938_v50 = vsub.s32 %v7935_v40, %v12822_v1 }
 0x4fe   :  { %v7911_v61 = vrot.slane %v12454_v25, %v7910_v37 }
 0x4ff   :  { %v7965_v29 = vsel %vm7863_vm1, %v7964_v59, %v7960_v6 }
 0x502   :  { %v12462_v19 = vpop.permute.xlu0 %7799 }
 0x503   :  { %v7969_v26 = vrot.slane %v12462_v19, %v7868_v42  ;;  %v7914_v19 = vadd.s32 4294967200, %v12465_v63  ;;  %v7892_v42 = vsel %vm7891_vm11, %v7890_v23, %v7885_v31  ;;  %v7904_v63 = vrot.slane %v12452_v58, %v7903_v24 }
 0x504   :  { %v7899_v58 = vsel %vm7898_vm5, %v7897_v53, %v7892_v42 }
 0x505   :  { %v7970_v39 = vsel %vm7870_vm2, %v7969_v26, %v7965_v29  ;;  %v7906_v25 = vsel %vm7905_vm6, %v7904_v63, %v7899_v58 }
 0x506   :  { %v7913_v3 = vsel %vm7912_vm12, %v7911_v61, %v7906_v25 }
 0x508   :  { %v7803_v33 = vpop.permute.xlu1 %7802 }
 0x509   :  { %v7974_v51 = vrot.slane %v7803_v33, %v7875_v57  ;;  %v7925_v33 = vrot.slane %v12460_v35, %v7924_v27 }
 0x50b   :  { %v7975_v18 = vsel %vm7877_vm7, %v7974_v51, %v7970_v39 }
 0x50d   :  { %v12468_v46 = vpop.permute.xlu0 %7805 }
 0x50e   :  { %v7979_v13 = vrot.slane %v12468_v46, %v7882_v55  ;;  %v7917_v46 = vsub.s32 %v7914_v19, %v12822_v1 }
 0x510   :  { %v7980_v56 = vsel %vm7884_vm0, %v7979_v13, %v7975_v18 }
 0x513   :  { %v7809_v41 = vpop.permute.xlu1 %7808 }
 0x514   :  { %v7984_v14 = vrot.slane %v7809_v41, %v7889_v10 }
 0x516   :  { %v7985_v11 = vsel %vm7891_vm11, %v7984_v14, %v7980_v56 }
 0x51f   :  { %v12476_v47 = vpop.permute.xlu0 %7811 }
 0x520   :  { %v7989_v2 = vrot.slane %v12476_v47, %v7896_v48  ;;  %v7918_v47 = vrot.slane %v12458_v28, %v7917_v46 }
 0x521   :  { %v7779_v36 = vpop.permute.xlu1 %7778 }
 0x522   :  { %v7932_v9 = vrot.slane %v7779_v36, %v7931_v49  ;;  %v7920_v55 = vsel %vm7919_vm4, %v7918_v47, %v7913_v3 }
 0x523   :  { %v7927_v43 = vsel %vm7926_vm8, %v7925_v33, %v7920_v55 }
 0x524   :  { %v7934_v26 = vsel %vm7933_vm15, %v7932_v9, %v7927_v43 }
 0x527   :  { %v12483_v22 = vpop.permute.xlu0 %7814 }
 0x528   :  { %v7994_v7 = vrot.slane %v12483_v22, %v7903_v24  ;;  %v7990_v22 = vsel %vm7898_vm5, %v7989_v2, %v7985_v11 }
 0x52a   :  { %v7995_v57 = vsel %vm7905_vm6, %v7994_v7, %v7990_v22 }
 0x52b   :  { %v12497_v45 = vpop.permute.xlu0 %7817 }
 0x52c   :  { %v7999_v44 = vrot.slane %v12497_v45, %v7910_v37 }
 0x52e   :  { %v8000_v28 = vsel %vm7912_vm12, %v7999_v44, %v7995_v57 }
 0x52f   :  { %v7821_v5 = vpop.permute.xlu0 %7820 }
 0x530   :  { %v8004_v8 = vrot.slane %v7821_v5, %v7917_v46 }
 0x531   :  { %v7782_v60 = vpop.permute.xlu1 %7781 }
 0x532   :  { %v7939_v21 = vrot.slane %v7782_v60, %v7938_v50  ;;  %v8005_v45 = vsel %vm7919_vm4, %v8004_v8, %v8000_v28 }
 0x533   :  { %v7824_v12 = vpop.permute.xlu0 %7823 }
 0x534   :  { %v8009_v17 = vrot.slane %v7824_v12, %v7924_v27  ;;  %v7941_v0 = vsel %vm7940_vm14, %v7939_v21, %v7934_v26 }
 0x536   :  { %v8010_v52 = vsel %vm7926_vm8, %v8009_v17, %v8005_v45 }
 0x537   :  { %v7827_v59 = vpop.permute.xlu0 %7826 }
 0x538   :  { %v8014_v1 = vrot.slane %v7827_v59, %v7931_v49 }
 0x53a   :  { %v8015_v10 = vsel %vm7933_vm15, %v8014_v1, %v8010_v52 }
 0x53b   :  { %v7830_v35 = vpop.permute.xlu0 %7829 }
 0x53c   :  { %v8019_v6 = vrot.slane %v7830_v35, %v7938_v50 }
 0x53e   :  { %v8020_v29 = vsel %vm7940_vm14, %v8019_v6, %v8015_v10 }
 0x53f   :  { %v8021_v51 = vcombine.low %v7941_v0, %v8020_v29 }
 0x541   :  { %v8028_v41 = vrot.slane %v8021_v51, %v11499_v62 }
 0x543   :  { %v8035_v20 = vrot.slane %v8028_v41, %v11499_v62 }
 0x545   :  { %8041 = vst.msk [vmem:[#allocation9] sm:$0x3] %vm8039_vm9, %v8035_v20 }
 0x546   :  { %9365 = shalt.err (!%p9362_p0)
}
 0x547   :  { %s9366_s23 = scalar_lea.hbm %s12571_s7, 32 }
 0x548   :  { %p9367_p1 = scmp.ne.s32.totalorder %s12571_s7, %s9366_s23  ;;  %p9370_p2 = scmp.lt.u32.totalorder %s9366_s23, %s12571_s7 }
 0x54a   :  { %p9372_p3 = pnand %p9370_p2, %p9367_p1 }
 0x54c   :  { %9375 = shalt.err (!%p9372_p3)
}
 0x54d   :  { %8051 = dma.vmem_to_hbm [thread:$0]  %s8049_s19, 32, %s12571_s7, [#allocation5]  }
 0x54e   :  { %9380 = dma.done.wait [#allocation5], 32  }
 0x54f   :  { %9381 = vsyncadd [#allocation5], 4294967264 }
 0x550   :  { %8055 = vsyncpa [#allocation4], 1 }
 0x551   :  { %8056 = vsyncpa [#allocation7], 1 }
 0x552   :  { %8057 = vsyncpa [#allocation5], 1 }

</bundles_post_ra>
